<compile_context>
chip_gen: v6e
topology: v6e:2x2x1
jax: 0.10.0
libtpu: 0.0.40
codegen_flags: <defaults>
</compile_context>

<pallas_src>
import jax
import jax.numpy as jnp
from jax.experimental import pallas as pl
from jax.experimental.pallas import tpu as pltpu

EPS = 1e-5
INV_SQRT2 = 0.7071067811865476


def fused_mlp_kernel(x1_ref, x2_ref, g_ref, b_ref,
                     w1_ref, b1_ref, w2_ref, b2_ref,
                     out_ref, xn_ref):
    k = pl.program_id(0)

    # Step 0: residual add + LayerNorm (f32), cached as bf16 for the MXU, and
    # the resident f32 output accumulator initialized with Linear2's bias.
    @pl.when(k == 0)
    def _():
        x = x1_ref[...] + x2_ref[...]
        mean = jnp.mean(x, axis=-1, keepdims=True)
        xc = x - mean
        var = jnp.mean(xc * xc, axis=-1, keepdims=True)
        xn = xc * jax.lax.rsqrt(var + EPS)
        xn = xn * g_ref[...] + b_ref[...]
        xn_ref[...] = xn.astype(xn_ref.dtype)
        out_ref[...] = jnp.broadcast_to(b2_ref[...], out_ref.shape)

    # Per-step partial: hidden slice of Linear1 + exact GELU + Linear2 slice.
    h = jnp.dot(xn_ref[...], w1_ref[...],
                preferred_element_type=jnp.float32) + b1_ref[...]
    # exact GELU (approximate='none'): 0.5 * x * (1 + erf(x / sqrt(2)))
    g = 0.5 * h * (1.0 + jax.lax.erf(h * jnp.float32(INV_SQRT2)))
    # Dropout(p=0.0) layers are identities.
    out_ref[...] += jnp.dot(g.astype(w2_ref.dtype), w2_ref[...],
                            preferred_element_type=jnp.float32)


def fused_forward(x1, x2, gamma, beta, w1, b1, w2, b2, *, td=512):
    """x1, x2: [N, H, W, C]; w1: [C, D]; w2: [D, C] (stored as (in, out))."""
    N, H, W, C = x1.shape
    D = w1.shape[1]
    rows = N * H * W
    assert D % td == 0

    x1f = x1.reshape(rows, C).astype(jnp.float32)
    x2f = x2.reshape(rows, C).astype(jnp.float32)
    # bf16 weight streaming (accumulation stays f32 via preferred_element_type)
    w1b = w1.astype(jnp.bfloat16)
    w2b = w2.astype(jnp.bfloat16)

    out = pl.pallas_call(
        fused_mlp_kernel,
        out_shape=jax.ShapeDtypeStruct((rows, C), jnp.float32),
        grid=(D // td,),
        in_specs=[
            pl.BlockSpec((rows, C), lambda k: (0, 0)),   # x1   (resident)
            pl.BlockSpec((rows, C), lambda k: (0, 0)),   # x2   (resident)
            pl.BlockSpec((1, C),    lambda k: (0, 0)),   # gamma
            pl.BlockSpec((1, C),    lambda k: (0, 0)),   # beta
            pl.BlockSpec((C, td),   lambda k: (0, k)),   # W1 column block (bf16)
            pl.BlockSpec((1, td),   lambda k: (0, k)),   # b1 block
            pl.BlockSpec((td, C),   lambda k: (k, 0)),   # W2 row block (bf16)
            pl.BlockSpec((1, C),    lambda k: (0, 0)),   # b2
        ],
        out_specs=pl.BlockSpec((rows, C), lambda k: (0, 0)),  # resident accumulator
        scratch_shapes=[pltpu.VMEM((rows, C), jnp.bfloat16)],  # cached LN output
        compiler_params=pltpu.CompilerParams(
            dimension_semantics=("arbitrary",)),
    )(x1f, x2f,
      gamma.reshape(1, C).astype(jnp.float32),
      beta.reshape(1, C).astype(jnp.float32),
      w1b, b1.reshape(1, D).astype(jnp.float32),
      w2b, b2.reshape(1, C).astype(jnp.float32))

    return out.reshape(N, H, W, C)


if __name__ == "__main__":
    N, H, W, C = 1, 7, 7, 768
    D = 3072

    key = jax.random.PRNGKey(0)
    k1, k2, k3, k4, k5, k6 = jax.random.split(key, 6)

    # inputs (matching torch.randn([1, 7, 7, 768]) shapes)
    x533 = jax.random.normal(k1, (N, H, W, C), dtype=jnp.float32)
    x547 = jax.random.normal(k2, (N, H, W, C), dtype=jnp.float32)

    # deterministic synthetic parameters
    # LayerNorm: default init (gamma=1, beta=0)
    gamma = jnp.ones((C,), jnp.float32)
    beta = jnp.zeros((C,), jnp.float32)
    # Linear layers: uniform(-1/sqrt(fan_in), 1/sqrt(fan_in)), stored as (in, out)
    lim1 = 1.0 / jnp.sqrt(jnp.float32(C))
    w1 = jax.random.uniform(k3, (C, D), jnp.float32, -lim1, lim1)
    b1 = jax.random.uniform(k4, (D,), jnp.float32, -lim1, lim1)
    lim2 = 1.0 / jnp.sqrt(jnp.float32(D))
    w2 = jax.random.uniform(k5, (D, C), jnp.float32, -lim2, lim2)
    b2 = jax.random.uniform(k6, (C,), jnp.float32, -lim2, lim2)

    out = fused_forward(x533, x547, gamma, beta, w1, b1, w2, b2)
    out = jax.block_until_ready(out)

    assert out.shape == (N, H, W, C), out.shape
    assert jnp.all(jnp.isfinite(out))
    print("KERNEL_OK")
</pallas_src>

<mosaic_0001>
module attributes {stable_mosaic.version = 11 : i64} {
  func.func @fused_mlp_kernel(%arg0: i32, %arg1: memref<49x768xf32, #tpu.memory_space<vmem>>, %arg2: memref<49x768xf32, #tpu.memory_space<vmem>>, %arg3: memref<1x768xf32, #tpu.memory_space<vmem>>, %arg4: memref<1x768xf32, #tpu.memory_space<vmem>>, %arg5: memref<768x512xbf16, #tpu.memory_space<vmem>>, %arg6: memref<1x512xf32, #tpu.memory_space<vmem>>, %arg7: memref<512x768xbf16, #tpu.memory_space<vmem>>, %arg8: memref<1x768xf32, #tpu.memory_space<vmem>>, %arg9: memref<49x768xf32, #tpu.memory_space<vmem>>, %arg10: memref<49x768xbf16, #tpu.memory_space<vmem>>) attributes {dimension_semantics = [#tpu.dimension_semantics<arbitrary>], iteration_bounds = array<i64: 6>, scalar_prefetch = 0 : i64, scratch_operands = 1 : i64, tpu.core_type = #tpu.core_type<tc>, window_params = [{pipeline_mode = #tpu.pipeline_mode<synchronous>, transform_indices = @transform_0, window_bounds = array<i64: 49, 768>}, {pipeline_mode = #tpu.pipeline_mode<synchronous>, transform_indices = @transform_1, window_bounds = array<i64: 49, 768>}, {pipeline_mode = #tpu.pipeline_mode<synchronous>, transform_indices = @transform_2, window_bounds = array<i64: 1, 768>}, {pipeline_mode = #tpu.pipeline_mode<synchronous>, transform_indices = @transform_3, window_bounds = array<i64: 1, 768>}, {transform_indices = @transform_4, window_bounds = array<i64: 768, 512>}, {transform_indices = @transform_5, window_bounds = array<i64: 1, 512>}, {transform_indices = @transform_6, window_bounds = array<i64: 512, 768>}, {pipeline_mode = #tpu.pipeline_mode<synchronous>, transform_indices = @transform_7, window_bounds = array<i64: 1, 768>}, {pipeline_mode = #tpu.pipeline_mode<synchronous>, transform_indices = @transform_8, window_bounds = array<i64: 49, 768>}]} {
    %c0_i32 = arith.constant 0 : i32
    %0 = arith.cmpi eq, %arg0, %c0_i32 : i32
    %1 = arith.extui %0 : i1 to i32
    %c0_i32_0 = arith.constant 0 : i32
    %2 = arith.cmpi ne, %1, %c0_i32_0 : i32
    scf.if %2 {
      %c0_16 = arith.constant 0 : index
      %c0_17 = arith.constant 0 : index
      %23 = vector.load %arg1[%c0_16, %c0_17] : memref<49x768xf32, #tpu.memory_space<vmem>>, vector<49x768xf32>
      %c0_18 = arith.constant 0 : index
      %c0_19 = arith.constant 0 : index
      %24 = vector.load %arg2[%c0_18, %c0_19] : memref<49x768xf32, #tpu.memory_space<vmem>>, vector<49x768xf32>
      %25 = arith.addf %23, %24 : vector<49x768xf32>
      %cst_20 = arith.constant dense<0.000000e+00> : vector<49xf32>
      %26 = vector.multi_reduction <add>, %25, %cst_20 [1] : vector<49x768xf32> to vector<49xf32>
      %27 = vector.shape_cast %26 : vector<49xf32> to vector<49x1xf32>
      %cst_21 = arith.constant 7.680000e+02 : f32
      %28 = vector.broadcast %cst_21 : f32 to vector<49x1xf32>
      %29 = arith.divf %27, %28 : vector<49x1xf32>
      %30 = vector.broadcast %29 : vector<49x1xf32> to vector<49x768xf32>
      %31 = arith.subf %25, %30 : vector<49x768xf32>
      %32 = arith.mulf %31, %31 : vector<49x768xf32>
      %cst_22 = arith.constant dense<0.000000e+00> : vector<49xf32>
      %33 = vector.multi_reduction <add>, %32, %cst_22 [1] : vector<49x768xf32> to vector<49xf32>
      %34 = vector.shape_cast %33 : vector<49xf32> to vector<49x1xf32>
      %cst_23 = arith.constant 7.680000e+02 : f32
      %35 = vector.broadcast %cst_23 : f32 to vector<49x1xf32>
      %36 = arith.divf %34, %35 : vector<49x1xf32>
      %cst_24 = arith.constant 9.99999974E-6 : f32
      %37 = vector.broadcast %cst_24 : f32 to vector<49x1xf32>
      %38 = arith.addf %36, %37 : vector<49x1xf32>
      %39 = math.rsqrt %38 : vector<49x1xf32>
      %40 = vector.broadcast %39 : vector<49x1xf32> to vector<49x768xf32>
      %41 = arith.mulf %31, %40 : vector<49x768xf32>
      %c0_25 = arith.constant 0 : index
      %c0_26 = arith.constant 0 : index
      %42 = vector.load %arg3[%c0_25, %c0_26] : memref<1x768xf32, #tpu.memory_space<vmem>>, vector<1x768xf32>
      %43 = vector.broadcast %42 : vector<1x768xf32> to vector<49x768xf32>
      %44 = arith.mulf %41, %43 : vector<49x768xf32>
      %c0_27 = arith.constant 0 : index
      %c0_28 = arith.constant 0 : index
      %45 = vector.load %arg4[%c0_27, %c0_28] : memref<1x768xf32, #tpu.memory_space<vmem>>, vector<1x768xf32>
      %46 = vector.broadcast %45 : vector<1x768xf32> to vector<49x768xf32>
      %47 = arith.addf %44, %46 : vector<49x768xf32>
      %48 = arith.truncf %47 : vector<49x768xf32> to vector<49x768xbf16>
      %c0_29 = arith.constant 0 : index
      %c0_30 = arith.constant 0 : index
      %49 = vector.load %arg10[%c0_29, %c0_30] : memref<49x768xbf16, #tpu.memory_space<vmem>>, vector<49x768xbf16>
      tpu.vector_store %arg10[%c0_29, %c0_30], %48 {strides = array<i32>} : memref<49x768xbf16, #tpu.memory_space<vmem>>, vector<49x768xbf16>,
      %c0_31 = arith.constant 0 : index
      %c0_32 = arith.constant 0 : index
      %50 = vector.load %arg8[%c0_31, %c0_32] : memref<1x768xf32, #tpu.memory_space<vmem>>, vector<1x768xf32>
      %51 = vector.shape_cast %50 : vector<1x768xf32> to vector<1x768xf32>
      %52 = vector.broadcast %51 : vector<1x768xf32> to vector<49x768xf32>
      %c0_33 = arith.constant 0 : index
      %c0_34 = arith.constant 0 : index
      %53 = vector.load %arg9[%c0_33, %c0_34] : memref<49x768xf32, #tpu.memory_space<vmem>>, vector<49x768xf32>
      tpu.vector_store %arg9[%c0_33, %c0_34], %52 {strides = array<i32>} : memref<49x768xf32, #tpu.memory_space<vmem>>, vector<49x768xf32>,
    } else {
    }
    %c0 = arith.constant 0 : index
    %c0_1 = arith.constant 0 : index
    %3 = vector.load %arg10[%c0, %c0_1] : memref<49x768xbf16, #tpu.memory_space<vmem>>, vector<49x768xbf16>
    %c0_2 = arith.constant 0 : index
    %c0_3 = arith.constant 0 : index
    %4 = vector.load %arg5[%c0_2, %c0_3] : memref<768x512xbf16, #tpu.memory_space<vmem>>, vector<768x512xbf16>
    %cst = arith.constant dense<0.000000e+00> : vector<49x512xf32>
    %5 = tpu.matmul %3, %4, %cst {dimension_numbers = #tpu.dot_dimension_numbers<[1], [0], [0], [1], [0, 0, 1, 1], [], []>} : vector<49x768xbf16>, vector<768x512xbf16>, vector<49x512xf32> -> vector<49x512xf32>
    %c0_4 = arith.constant 0 : index
    %c0_5 = arith.constant 0 : index
    %6 = vector.load %arg6[%c0_4, %c0_5] : memref<1x512xf32, #tpu.memory_space<vmem>>, vector<1x512xf32>
    %7 = vector.broadcast %6 : vector<1x512xf32> to vector<49x512xf32>
    %8 = arith.addf %5, %7 : vector<49x512xf32>
    %cst_6 = arith.constant 5.000000e-01 : f32
    %9 = vector.broadcast %cst_6 : f32 to vector<49x512xf32>
    %10 = arith.mulf %9, %8 : vector<49x512xf32>
    %cst_7 = arith.constant 0.707106769 : f32
    %11 = vector.broadcast %cst_7 : f32 to vector<49x512xf32>
    %12 = arith.mulf %8, %11 : vector<49x512xf32>
    %13 = math.erf %12 : vector<49x512xf32>
    %cst_8 = arith.constant 1.000000e+00 : f32
    %14 = vector.broadcast %cst_8 : f32 to vector<49x512xf32>
    %15 = arith.addf %14, %13 : vector<49x512xf32>
    %16 = arith.mulf %10, %15 : vector<49x512xf32>
    %c0_9 = arith.constant 0 : index
    %c0_10 = arith.constant 0 : index
    %17 = vector.load %arg9[%c0_9, %c0_10] : memref<49x768xf32, #tpu.memory_space<vmem>>, vector<49x768xf32>
    %18 = arith.truncf %16 : vector<49x512xf32> to vector<49x512xbf16>
    %c0_11 = arith.constant 0 : index
    %c0_12 = arith.constant 0 : index
    %19 = vector.load %arg7[%c0_11, %c0_12] : memref<512x768xbf16, #tpu.memory_space<vmem>>, vector<512x768xbf16>
    %cst_13 = arith.constant dense<0.000000e+00> : vector<49x768xf32>
    %20 = tpu.matmul %18, %19, %cst_13 {dimension_numbers = #tpu.dot_dimension_numbers<[1], [0], [0], [1], [0, 0, 1, 1], [], []>} : vector<49x512xbf16>, vector<512x768xbf16>, vector<49x768xf32> -> vector<49x768xf32>
    %21 = arith.addf %17, %20 : vector<49x768xf32>
    %c0_14 = arith.constant 0 : index
    %c0_15 = arith.constant 0 : index
    %22 = vector.load %arg9[%c0_14, %c0_15] : memref<49x768xf32, #tpu.memory_space<vmem>>, vector<49x768xf32>
    tpu.vector_store %arg9[%c0_14, %c0_15], %21 {strides = array<i32>} : memref<49x768xf32, #tpu.memory_space<vmem>>, vector<49x768xf32>,
    return
  }
  func.func @transform_0(%arg0: i32) -> (i32, i32) {
    %c0_i32 = arith.constant 0 : i32
    %c0_i32_0 = arith.constant 0 : i32
    %c0_i32_1 = arith.constant 0 : i32
    return %c0_i32, %c0_i32_0 : i32, i32
  }
  func.func @transform_1(%arg0: i32) -> (i32, i32) {
    %c0_i32 = arith.constant 0 : i32
    %c0_i32_0 = arith.constant 0 : i32
    %c0_i32_1 = arith.constant 0 : i32
    return %c0_i32, %c0_i32_0 : i32, i32
  }
  func.func @transform_2(%arg0: i32) -> (i32, i32) {
    %c0_i32 = arith.constant 0 : i32
    %c0_i32_0 = arith.constant 0 : i32
    %c0_i32_1 = arith.constant 0 : i32
    return %c0_i32, %c0_i32_0 : i32, i32
  }
  func.func @transform_3(%arg0: i32) -> (i32, i32) {
    %c0_i32 = arith.constant 0 : i32
    %c0_i32_0 = arith.constant 0 : i32
    %c0_i32_1 = arith.constant 0 : i32
    return %c0_i32, %c0_i32_0 : i32, i32
  }
  func.func @transform_4(%arg0: i32) -> (i32, i32) {
    %c0_i32 = arith.constant 0 : i32
    %c0_i32_0 = arith.constant 0 : i32
    return %c0_i32, %arg0 : i32, i32
  }
  func.func @transform_5(%arg0: i32) -> (i32, i32) {
    %c0_i32 = arith.constant 0 : i32
    %c0_i32_0 = arith.constant 0 : i32
    return %c0_i32, %arg0 : i32, i32
  }
  func.func @transform_6(%arg0: i32) -> (i32, i32) {
    %c0_i32 = arith.constant 0 : i32
    %c0_i32_0 = arith.constant 0 : i32
    return %arg0, %c0_i32 : i32, i32
  }
  func.func @transform_7(%arg0: i32) -> (i32, i32) {
    %c0_i32 = arith.constant 0 : i32
    %c0_i32_0 = arith.constant 0 : i32
    %c0_i32_1 = arith.constant 0 : i32
    return %c0_i32, %c0_i32_0 : i32, i32
  }
  func.func @transform_8(%arg0: i32) -> (i32, i32) {
    %c0_i32 = arith.constant 0 : i32
    %c0_i32_0 = arith.constant 0 : i32
    %c0_i32_1 = arith.constant 0 : i32
    return %c0_i32, %c0_i32_0 : i32, i32
  }
}

</mosaic_0001>

<bundles_post_ra>
// kernel: tpu_custom_call.1
= control target key start
LH: loop header
LB: loop body
LE: loop exit
PB: predicated region body
PF: predicated region fallthrough
CT: control target
= control target key end

     0   :  { %s8325_s0 = inlined_call_operand.hbm [shape: f32[49,768], index: 0, kind: input, shape index: {}]   ;;  %s8326_s1 = inlined_call_operand.hbm [shape: f32[49,768], index: 1, kind: input, shape index: {}]   ;;  %s8327_s2 = inlined_call_operand.hbm [shape: f32[1,768], index: 2, kind: input, shape index: {}]   ;;  %s8328_s3 = inlined_call_operand.hbm [shape: f32[1,768], index: 3, kind: input, shape index: {}]   ;;  %s8329_s4 = inlined_call_operand.hbm [shape: bf16[768,3072], index: 4, kind: input, shape index: {}]   ;;  %s8330_s5 = inlined_call_operand.hbm [shape: f32[1,3072], index: 5, kind: input, shape index: {}]   ;;  %s8331_s6 = inlined_call_operand.hbm [shape: bf16[3072,768], index: 6, kind: input, shape index: {}]   ;;  %s8332_s7 = inlined_call_operand.hbm [shape: f32[1,768], index: 7, kind: input, shape index: {}]   ;;  %s8333_s8 = inlined_call_operand.hbm [shape: f32[49,768], index: 8, kind: output, shape index: {}]  }
   0x1   :  { %8355 = sst [smem:[#allocation32_spill]] %s8325_s0 }
   0x2   :  { %8356 = sst [smem:[#allocation33_spill]] %s8326_s1 }
   0x3   :  { %8357 = sst [smem:[#allocation34_spill]] %s8329_s4 }
   0x4   :  { %8358 = sst [smem:[#allocation35_spill]] %s8333_s8 }
   0x5   :  { %13 = vsyncpa [#allocation4], 0 }
   0x6   :  { %14 = vsyncpa [#allocation7], 0 }
   0x7   :  { %15 = vsyncpa [#allocation10], 0 }
   0x8   :  { %16 = vsyncpa [#allocation5], 0  ;;  %s6615_s27 = smov 0   ;;  %s6617_s28 = smov 0  }
   0x9   :  { %s6619_s29 = smov 0   ;;  %s6621_s30 = smov 0  }
   0xa LB: > { %8359 = sst [smem:[#allocation22_spill]] %s6546_s29  ;;  %s6634_s9 = sadd.s32 4294967295, %s6550_s30   ;;  %s6550_s30 = sphi %s6621_s30, %s8408_s30   ;;  %s6546_s29 = sphi %s6619_s29, %s8410_s29   ;;  %s6542_s28 = sphi %s6617_s28, %s8412_s28   ;;  %s6538_s27 = sphi %s6615_s27, %s8411_s27  }
   0xb   : > { %p126_p0 = scmp.ne.s32.totalorder %s6542_s28, %s6538_s27  ;;  %p8334_p1 = scmp.eq.s32.totalorder %s6634_s9, 0 }
   0xc   : > { %p4975_p2 = scmp.ge.s32.totalorder %s6550_s30, 1  ;;  %p231_p3 = scmp.lt.s32.totalorder %s6550_s30, 7 }
   0xd   : > { %p6643_p5 = por %p8334_p1, %p126_p0  ;;  %s6552_s12 = smov [#allocation3]  }
   0xe   : > { %p6647_p6 = pnand %p4975_p2, %p231_p3  ;;  %s243_s13 = sshll.u32 %s6552_s12, 4  ;;  %s244_s13 = int_to_ptr.vmem [resolvable:$true] %s243_s13 }
   0xf   : > { %s8360_s10 = scalar_select %p6643_p5, 1, 0 }
  0x10   : > { %s8361_s11 = scalar_select %p6647_p6, 1, 0 }
  0x11   : > { %p5488_p7 = pneg %p6647_p6  ;;  %s6553_s15 = smov [#allocation6]  }
  0x12   : > { %s256_s16 = sshll.u32 %s6553_s15, 4  ;;  %s6269_s18 = scalar_lea.vmem %s244_s13, 5376  ;;  %s257_s16 = int_to_ptr.vmem [resolvable:$true] %s256_s16 }
  0x13   : > { %p6655_p8 = pnand %p5488_p7, %p8334_p1  ;;  %p6270_p10 = scmp.ne.s32.totalorder %s244_s13, %s6269_s18 }
  0x14   : > { %p6277_p13 = scmp.lt.s32.totalorder %s244_s13, %s244_s13  ;;  %p6278_p0 = scmp.lt.s32.totalorder %s6269_s18, %s6269_s18 }
  0x15   : > { %s8362_s14 = scalar_select %p6655_p8, 1, 0 }
  0x16   : > { %p6661_p9 = pneg %p6655_p8  ;;  %p6279_p2 = por %p6278_p0, %p6277_p13 }
  0x18   : > { %s8363_s17 = scalar_select %p6661_p9, 1, 0 }
  0x19   : > { %p6272_p11 = pnand %p6270_p10, %p6661_p9 }
  0x1b   : > { %p6273_p12 = pneg %p6272_p11 }
  0x1d   : > { %p6280_p3 = pnand %p6279_p2, %p6273_p12 }
  0x1f   : > { %6283 = shalt.err (!%p6280_p3)
}
  0x20   : > { %s6554_s19 = smov 768   ;;  %s6555_s20 = smov 48  }
  0x21   : > { %s8364_s0 = sld [smem:[#allocation32_spill]]  ;;  %s6295_s23 = scalar_lea.vmem %s257_s16, 5376 }
  0x22   : > { %p6296_p7 = scmp.ne.s32.totalorder %s257_s16, %s6295_s23  ;;  %p6303_p11 = scmp.lt.s32.totalorder %s257_s16, %s257_s16 }
  0x23   : > { %p6304_p1 = scmp.lt.s32.totalorder %s6295_s23, %s6295_s23 }
  0x24   : > { %p6298_p4 = pnand %p6296_p7, %p6661_p9 }
  0x25   : > { %p6305_p5 = por %p6304_p1, %p6303_p11 }
  0x26   : > { %p6299_p10 = pneg %p6298_p4 }
  0x27   : > { %5491 = dma.hbm_to_vmem [thread:$0]  (!%p6655_p8), %s8364_s0, 5376, %s244_s13, [#allocation4], %s6554_s19, %s6554_s19, %s6555_s20  }
  0x28   : > { %p6306_p13 = pnand %p6305_p5, %p6299_p10 }
  0x2a   : > { %6309 = shalt.err (!%p6306_p13)
}
  0x2b   : > { %s8365_s1 = sld [smem:[#allocation33_spill]]  ;;  %s6680_s26 = sadd.s32 1, %s6550_s30  }
  0x2c   : > { %8366 = sst [smem:[#allocation23_spill]] %s6680_s26  ;;  %s113_s27 = sadd.s32 1, %s6546_s29 }
  0x2d   : > { %s110_s12 = ssub.s32 %s6550_s30, %s6680_s26  ;;  %p120_p1 = scmp.ne.s32.totalorder %s6546_s29, %s6542_s28 }
  0x2e   : > { %p111_p4 = scmp.eq.s32.totalorder %s110_s12, 0  ;;  %p121_p5 = scmp.eq.s32.totalorder %s6550_s30, 0 }
  0x2f   : > { %p5519_p12 = scmp.lt.s32.totalorder %s6550_s30, 6  ;;  %s303_s13 = sand.u32 1, %s6550_s30  }
  0x30   : > { %s6691_s15 = scalar_select %p111_p4, %s6546_s29, %s113_s27  }
  0x31   : > { %5494 = dma.hbm_to_vmem [thread:$0]  (!%p6655_p8), %s8365_s1, 5376, %s257_s16, [#allocation7], %s6554_s19, %s6554_s19, %s6555_s20  }
  0x32   : > { %8367 = sst [smem:[#allocation24_spill]] %s6691_s15  ;;  %p122_p0 = por %p121_p5, %p120_p1 }
  0x33   : > { %s8336_s18 = sand.u32 1, %s6546_s29   ;;  %s5431_s21 = sshll.u32 %s6550_s30, 8 }
  0x34   : > { %s6697_s22 = smul.u32 1536, %s8336_s18  ;;  %s8368_s4 = sld [smem:[#allocation34_spill]] }
  0x35   : > { %p6704_p2 = pnand %p5519_p12, %p122_p0  ;;  %s6711_s27 = scalar_lea.sflag [#allocation4], %s303_s13 }
  0x36   : > { %s307_s24 = scalar_lea.vmem [#allocation11], %s6697_s22 }
  0x37   : > { %s8369_s20 = scalar_select %p6704_p2, 1, 0 }
  0x38   : > { %s314_s25 = sshll.u32 %s307_s24, 4  ;;  %p6717_p7 = pneg %p6704_p2  ;;  %s6709_s25 = int_to_ptr.vmem [resolvable:$true] %s314_s25 }
  0x3a   : > { %s6702_s19 = scalar_lea.hbm %s8368_s4, %s5431_s21  ;;  %s6315_s18 = scalar_lea.hbm %s8368_s4, 147456 }
  0x3b   : > { %s6310_s12 = scalar_lea.hbm %s6702_s19, 24576  ;;  %p6316_p13 = scmp.lt.s32.totalorder %s6702_s19, %s8368_s4 }
  0x3c   : > { %p6311_p3 = scmp.ne.s32.totalorder %s6702_s19, %s6310_s12  ;;  %p6317_p1 = scmp.lt.s32.totalorder %s6315_s18, %s6310_s12 }
  0x3d   : > { %s8370_s21 = scalar_select %p6717_p7, 1, 0 }
  0x3e   : > { %p6313_p10 = pnand %p6717_p7, %p6311_p3  ;;  %p6318_p4 = por %p6317_p1, %p6316_p13 }
  0x40   : > { %p6314_p11 = pneg %p6313_p10 }
  0x42   : > { %p6319_p5 = pnand %p6318_p4, %p6314_p11 }
  0x44   : > { %6322 = shalt.err (!%p6319_p5)
}
  0x45   : > { %s6323_s13 = scalar_lea.vmem %s6709_s25, 24576  ;;  %s6556_s1 = smov [#allocation11]  }
  0x46   : > { %p6324_p12 = scmp.ne.s32.totalorder %s6709_s25, %s6323_s13  ;;  %s6328_s23 = sshll.u32 %s6556_s1, 4  ;;  %s6329_s23 = int_to_ptr.vmem [resolvable:$false] %s6328_s23 }
  0x47   : > { %s6330_s16 = scalar_lea.vmem %s6329_s23, 49152  ;;  %p6331_p10 = scmp.lt.s32.totalorder %s6709_s25, %s6329_s23 }
  0x48   : > { %p6326_p0 = pnand %p6324_p12, %p6717_p7  ;;  %p6332_p6 = scmp.lt.s32.totalorder %s6330_s16, %s6323_s13 }
  0x4a   : > { %p6327_p3 = pneg %p6326_p0  ;;  %p6333_p8 = por %p6332_p6, %p6331_p10 }
  0x4c   : > { %p6334_p9 = pnand %p6333_p8, %p6327_p3 }
  0x4e   : > { %6337 = shalt.err (!%p6334_p9)
}
  0x4f   : > { %s6557_s0 = smov 1536   ;;  %s6558_s18 = smov 256  }
  0x50   : > { %s6559_s12 = smov 16   ;;  %s8371_s1 = sand.u32 1, %s6546_s29  }
  0x51   : > { %5507 = dma.hbm_to_vmem [thread:$0]  (!%p6704_p2), %s6702_s19, 24576, %s6709_s25, %s6711_s27, %s6557_s0, %s6558_s18, %s6559_s12  }
  0x52   : > { %s4984_s24 = sshll.u32 %s8371_s1, 2  ;;  %s6560_s4 = smov [#allocation8]  }
  0x53   : > { %s270_s23 = sshll.u32 %s6560_s4, 4  ;;  %s5432_s13 = sshll.u32 %s6550_s30, 6  ;;  %s271_s23 = int_to_ptr.vmem [resolvable:$true] %s270_s23 }
  0x54   : > { %s6349_s16 = scalar_lea.vmem %s271_s23, 96  ;;  %p8372_p8 = scmp.ne.s32.totalorder %s8363_s17, 0 }
  0x55   : > { %p6350_p6 = scmp.ne.s32.totalorder %s271_s23, %s6349_s16  ;;  %p6357_p13 = scmp.lt.s32.totalorder %s271_s23, %s271_s23 }
  0x56   : > { %p6358_p1 = scmp.lt.s32.totalorder %s6349_s16, %s6349_s16 }
  0x57   : > { %p6352_p9 = pnand %p6350_p6, %p8372_p8 }
  0x58   : > { %p6359_p4 = por %p6358_p1, %p6357_p13 }
  0x59   : > { %p6353_p11 = pneg %p6352_p9 }
  0x5b   : > { %p6360_p5 = pnand %p6359_p4, %p6353_p11 }
  0x5d   : > { %6363 = shalt.err (!%p6360_p5)
}
  0x5e   : > { %p8373_p12 = scmp.ne.s32.totalorder %s8362_s14, 0  ;;  %s334_s0 = scalar_lea.hbm %s8330_s5, %s5432_s13 }
  0x5f   : > { %s328_s18 = scalar_lea.vmem [#allocation12], %s4984_s24  ;;  %s6364_s1 = scalar_lea.hbm %s334_s0, 64 }
  0x60   : > { %5497 = dma.hbm_to_vmem [thread:$0]  (!%p8373_p12), %s8327_s2, 96, %s271_s23, [#allocation7]  }
  0x61   : > { %s336_s12 = sshll.u32 %s328_s18, 4  ;;  %p6365_p0 = scmp.ne.s32.totalorder %s334_s0, %s6364_s1  ;;  %s337_s12 = int_to_ptr.vmem [resolvable:$true] %s336_s12 }
  0x62   : > { %s6369_s26 = scalar_lea.hbm %s8330_s5, 384  ;;  %p6370_p6 = scmp.lt.s32.totalorder %s334_s0, %s8330_s5 }
  0x63   : > { %p6367_p3 = pnand %p6365_p0, %p6717_p7  ;;  %p6371_p9 = scmp.lt.s32.totalorder %s6369_s26, %s6364_s1 }
  0x65   : > { %p6368_p10 = pneg %p6367_p3  ;;  %p6372_p11 = por %p6371_p9, %p6370_p6 }
  0x67   : > { %p6373_p13 = pnand %p6372_p11, %p6368_p10 }
  0x69   : > { %6376 = shalt.err (!%p6373_p13)
}
  0x6a   : > { %s6377_s24 = scalar_lea.vmem %s337_s12, 64  ;;  %s6561_s23 = smov [#allocation12]  }
  0x6b   : > { %p6378_p1 = scmp.ne.s32.totalorder %s337_s12, %s6377_s24  ;;  %s6382_s13 = sshll.u32 %s6561_s23, 4  ;;  %s6383_s13 = int_to_ptr.vmem [resolvable:$false] %s6382_s13 }
  0x6c   : > { %s6384_s19 = scalar_lea.vmem %s6383_s13, 128  ;;  %p6385_p0 = scmp.lt.s32.totalorder %s337_s12, %s6383_s13 }
  0x6d   : > { %p6380_p4 = pnand %p6378_p1, %p6717_p7  ;;  %p6386_p3 = scmp.lt.s32.totalorder %s6384_s19, %s6377_s24 }
  0x6f   : > { %p6381_p5 = pneg %p6380_p4  ;;  %p6387_p12 = por %p6386_p3, %p6385_p0 }
  0x71   : > { %p6388_p8 = pnand %p6387_p12, %p6381_p5 }
  0x73   : > { %6391 = shalt.err (!%p6388_p8)
}
  0x74   : > { %5510 = dma.hbm_to_vmem [thread:$0]  (!%p6704_p2), %s334_s0, 64, %s337_s12, %s6711_s27  }
  0x75   : > { %s6562_s8 = smov [#allocation9]   ;;  %s6563_s26 = smov [#allocation14]  }
  0x76   : > { %s281_s29 = sshll.u32 %s6562_s8, 4  ;;  %s292_s4 = sshll.u32 %s6563_s26, 4  ;;  %s282_s29 = int_to_ptr.vmem [resolvable:$true] %s281_s29  ;;  %s293_s4 = int_to_ptr.vmem [resolvable:$true] %s292_s4 }
  0x77   : > { %s6403_s25 = scalar_lea.vmem %s282_s29, 96  ;;  %p8374_p6 = scmp.ne.s32.totalorder %s8363_s17, 0 }
  0x78   : > { %p6404_p10 = scmp.ne.s32.totalorder %s282_s29, %s6403_s25  ;;  %p6411_p13 = scmp.lt.s32.totalorder %s282_s29, %s282_s29 }
  0x79   : > { %p6412_p1 = scmp.lt.s32.totalorder %s6403_s25, %s6403_s25 }
  0x7a   : > { %p6406_p9 = pnand %p6404_p10, %p8374_p6 }
  0x7b   : > { %p6413_p4 = por %p6412_p1, %p6411_p13 }
  0x7c   : > { %p6407_p11 = pneg %p6406_p9 }
  0x7e   : > { %p6414_p12 = pnand %p6413_p4, %p6407_p11 }
  0x80   : > { %6417 = shalt.err (!%p6414_p12)
}
  0x81   : > { %p8375_p8 = scmp.ne.s32.totalorder %s8362_s14, 0  ;;  %s6429_s0 = scalar_lea.vmem %s293_s4, 96 }
  0x82   : > { %p6430_p5 = scmp.ne.s32.totalorder %s293_s4, %s6429_s0  ;;  %p6437_p10 = scmp.lt.s32.totalorder %s293_s4, %s293_s4 }
  0x83   : > { %5500 = dma.hbm_to_vmem [thread:$0]  (!%p8375_p8), %s8328_s3, 96, %s282_s29, [#allocation10]  }
  0x84   : > { %p6432_p0 = pnand %p6430_p5, %p8374_p6  ;;  %p6438_p9 = scmp.lt.s32.totalorder %s6429_s0, %s6429_s0 }
  0x86   : > { %p6433_p3 = pneg %p6432_p0  ;;  %p6439_p2 = por %p6438_p9, %p6437_p10 }
  0x88   : > { %p6440_p7 = pnand %p6439_p2, %p6433_p3 }
  0x8a   : > { %6443 = shalt.err (!%p6440_p7)
}
  0x8b   : > { %5503 = dma.hbm_to_vmem [thread:$0]  (!%p8375_p8), %s8332_s7, 96, %s293_s4, [#allocation7]  }
  0x8c   : > { %s5456_s15 = smul.u32 24576, %s6550_s30  ;;  %s347_s24 = scalar_lea.vmem [#allocation13], %s6697_s22 }
  0x8d   : > { %s355_s23 = sshll.u32 %s347_s24, 4  ;;  %p8376_p7 = scmp.ne.s32.totalorder %s8370_s21, 0  ;;  %s6782_s23 = int_to_ptr.vmem [resolvable:$true] %s355_s23 }
  0x8e   : > { %s6787_s19 = scalar_lea.hbm %s8331_s6, %s5456_s15  ;;  %s6449_s30 = scalar_lea.hbm %s8331_s6, 147456 }
  0x8f   : > { %s6444_s14 = scalar_lea.hbm %s6787_s19, 24576  ;;  %p6450_p13 = scmp.lt.s32.totalorder %s6787_s19, %s8331_s6 }
  0x90   : > { %p6445_p2 = scmp.ne.s32.totalorder %s6787_s19, %s6444_s14  ;;  %p6451_p1 = scmp.lt.s32.totalorder %s6449_s30, %s6444_s14 }
  0x92   : > { %p6447_p6 = pnand %p6445_p2, %p8376_p7  ;;  %p6452_p4 = por %p6451_p1, %p6450_p13 }
  0x94   : > { %p6448_p11 = pneg %p6447_p6 }
  0x96   : > { %p6453_p12 = pnand %p6452_p4, %p6448_p11 }
  0x98   : > { %6456 = shalt.err (!%p6453_p12)
}
  0x99   : > { %s6457_s4 = scalar_lea.vmem %s6782_s23, 24576  ;;  %s6564_s25 = smov [#allocation13]  }
  0x9a   : > { %p6458_p8 = scmp.ne.s32.totalorder %s6782_s23, %s6457_s4  ;;  %s6462_s18 = sshll.u32 %s6564_s25, 4  ;;  %s6463_s18 = int_to_ptr.vmem [resolvable:$false] %s6462_s18 }
  0x9b   : > { %s6464_s1 = scalar_lea.vmem %s6463_s18, 49152  ;;  %p6465_p3 = scmp.lt.s32.totalorder %s6782_s23, %s6463_s18 }
  0x9c   : > { %p6460_p5 = pnand %p6458_p8, %p8376_p7  ;;  %p6466_p10 = scmp.lt.s32.totalorder %s6464_s1, %s6457_s4 }
  0x9e   : > { %p6461_p0 = pneg %p6460_p5  ;;  %p6467_p9 = por %p6466_p10, %p6465_p3 }
  0xa0   : > { %p6468_p2 = pnand %p6467_p9, %p6461_p0 }
  0xa2   : > { %6471 = shalt.err (!%p6468_p2)
}
  0xa3   : > { %s6565_s0 = smov 384   ;;  %s6566_s12 = smov 24  }
  0xa4   : > { %p8377_p6 = scmp.ne.s32.totalorder %s8369_s20, 0  ;;  %p8378_p7 = scmp.ne.s32.totalorder %s8361_s11, 0 }
  0xa5   : > { %p8379_p11 = scmp.eq.s32.totalorder (!%p8378_p7), %s6634_s9, 0 }
  0xa6   : > { %5513 = dma.hbm_to_vmem [thread:$0]  (!%p8377_p6), %s6787_s19, 24576, %s6782_s23, %s6711_s27, %s6565_s0, %s6565_s0, %s6566_s12  }
  0xa7   : > { %367 = sbr.rel (%p8378_p7) target bundleno = 1360 (0x550), region = 52 }
  0xac   : > { %6513 = dma.done.wait (%p8379_p11), [#allocation4], 5376   ;;  %p8380_p13 = pmov %p8379_p11 }
  0xad   : > { %p8381_p1 = pmov %p8379_p11 }
  0xae   : > { %6515 = vsyncadd (%p8380_p13), [#allocation4], 4294961920 }
  0xaf   : > { %6517 = dma.done.wait (%p8381_p1), [#allocation7], 5472   ;;  %p8382_p4 = pmov %p8381_p1 }
  0xb0   : > { %p8383_p12 = pmov %p8381_p1 }
  0xb1   : > { %6519 = vsyncadd (%p8382_p4), [#allocation7], 4294961824 }
  0xb2   : > { %6521 = dma.done.wait (%p8383_p12), [#allocation10], 96   ;;  %p8384_p8 = pmov %p8381_p1 }
  0xb3   : > { %s385_s11 = sand.u32 1, %s6634_s9   ;;  %s387_s20 = sand.u32 1, %s6542_s28  }
  0xb4   : > { %6523 = vsyncadd (%p8384_p8), [#allocation10], 4294967200  ;;  %s5457_s27 = smul.u32 1536, %s387_s20  ;;  %s386_s21 = scalar_lea.sflag [#allocation4], %s385_s11 }
  0xb5   : > { %p8385_p5 = scmp.ne.s32.totalorder %s8360_s10, 0 }
  0xb6   : > { %s6826_s16 = scalar_lea.vmem [#allocation11], %s5457_s27 }
  0xb7   : > { %6525 = dma.done.wait (%p8385_p5), %s386_s21, 49216  }
  0xb8   : > { %6527 = vsyncadd (%p8385_p5), %s386_s21, 4294918080  ;;  %s6832_s15 = sshll.u32 %s387_s20, 2  ;;  %s6835_s23 = scalar_lea.vmem [#allocation13], %s5457_s27 }
  0xb9   : > { %s398_s24 = scalar_lea.vmem [#allocation12], %s6832_s15  ;;  %p8386_p0 = pmov %p8381_p1 }
  0xbb   : > { %6529 = dma.done.wait (%p8386_p0), [#allocation7], 96   ;;  %p8387_p3 = pmov %p8386_p0 }
  0xbc   : > { %p8388_p10 = scmp.ne.s32.totalorder %s6634_s9, 0 }
  0xbd   : > { %6531 = vsyncadd (%p8387_p3), [#allocation7], 4294967200 }
  0xbe   : > { %455 = sbr.rel (%p8388_p10) target bundleno = 577 (0x241), region = 88 }
  0xc3   : > { %v462_v0 = vld [vmem:[#allocation3 + $0x30] sm:$0xff]  ;;  %v463_v1 = vld [vmem:[#allocation3 + $0x38] sm:$0xff]  ;;  %v464_v2 = vld [vmem:[#allocation3 + $0x40] sm:$0xff]  ;;  %vm624_vm0 = vcmask 1040384   ;;  %vm1147_vm1 = vsmask.f32 256 }
  0xc4   : > { %v465_v3 = vld [vmem:[#allocation3 + $0x48] sm:$0xff]  ;;  %v504_v4 = vld [vmem:[#allocation6 + $0x30] sm:$0xff]  ;;  %v506_v6 = vld [vmem:[#allocation6 + $0x40] sm:$0xff]  ;;  %vm1149_vm2 = vcmask 1044484   ;;  %vm1150_vm3 = vsmask.f32 4352 }
  0xc5   : > { %v505_v5 = vld [vmem:[#allocation6 + $0x38] sm:$0xff]  ;;  %v466_v7 = vld [vmem:[#allocation3 + $0x50] sm:$0xff]  ;;  %v507_v8 = vld [vmem:[#allocation6 + $0x48] sm:$0xff]  ;;  %v6843_v10 = vadd.f32 %v504_v4, %v462_v0  ;;  %v6847_v12 = vadd.f32 %v506_v6, %v464_v2 }
  0xc6   : > { %v508_v9 = vld [vmem:[#allocation6 + $0x50] sm:$0xff]  ;;  %v6845_v11 = vadd.f32 %v505_v5, %v463_v1  ;;  %v467_v13 = vld [vmem:[#allocation3 + $0x58] sm:$0xff]  ;;  %v457_v15 = vld [vmem:[#allocation3 + $0x8] sm:$0xff]  ;;  %v6849_v18 = vadd.f32 %v507_v8, %v465_v3 }
  0xc7   : > { %v456_v14 = vld [vmem:[#allocation3] sm:$0xff]  ;;  %v458_v16 = vld [vmem:[#allocation3 + $0x10] sm:$0xff]  ;;  %v509_v17 = vld [vmem:[#allocation6 + $0x58] sm:$0xff]  ;;  %v6853_v22 = vadd.f32 %v508_v9, %v466_v7 }
  0xc8   : > { %v589_v19 = vadd.f32 %v6845_v11, %v6843_v10  ;;  %v459_v20 = vld [vmem:[#allocation3 + $0x18] sm:$0xff]  ;;  %v460_v21 = vld [vmem:[#allocation3 + $0x20] sm:$0xff]  ;;  %v498_v23 = vld [vmem:[#allocation6] sm:$0xff]  ;;  %v6862_v36 = vadd.f32 %v509_v17, %v467_v13 }
  0xc9   : > { %v499_v24 = vld [vmem:[#allocation6 + $0x8] sm:$0xff]  ;;  %v500_v25 = vld [vmem:[#allocation6 + $0x10] sm:$0xff]  ;;  %v461_v27 = vld [vmem:[#allocation3 + $0x28] sm:$0xff]  ;;  %v6856_v30 = vadd.f32 %v498_v23, %v456_v14 }
  0xca   : > { %v590_v26 = vadd.f32 %v589_v19, %v6847_v12  ;;  %v501_v28 = vld [vmem:[#allocation6 + $0x18] sm:$0xff]  ;;  %v502_v29 = vld [vmem:[#allocation6 + $0x20] sm:$0xff]  ;;  %v6858_v31 = vadd.f32 %v499_v24, %v457_v15  ;;  %v6860_v32 = vadd.f32 %v500_v25, %v458_v16  ;;  %v503_v33 = vld [vmem:[#allocation6 + $0x28] sm:$0xff] }
  0xcb   : > { %v468_v34 = vld [vmem:[#allocation3 + $0x60] sm:$0xff]  ;;  %v469_v35 = vld [vmem:[#allocation3 + $0x68] sm:$0xff]  ;;  %v6865_v38 = vadd.f32 %v501_v28, %v459_v20  ;;  %v470_v40 = vld [vmem:[#allocation3 + $0x70] sm:$0xff]  ;;  %v6869_v43 = vadd.f32 %v502_v29, %v460_v21  ;;  %v6877_v54 = vadd.f32 %v503_v33, %v461_v27 }
  0xcc   : > { %v591_v37 = vadd.f32 %v590_v26, %v6849_v18  ;;  %v582_v39 = vadd.f32 %v6858_v31, %v6856_v30  ;;  %v471_v41 = vld [vmem:[#allocation3 + $0x78] sm:$0xff]  ;;  %v472_v42 = vld [vmem:[#allocation3 + $0x80] sm:$0xff]  ;;  %v510_v44 = vld [vmem:[#allocation6 + $0x60] sm:$0xff] }
  0xcd   : > { %v511_v45 = vld [vmem:[#allocation6 + $0x68] sm:$0xff]  ;;  %v512_v46 = vld [vmem:[#allocation6 + $0x70] sm:$0xff]  ;;  %v473_v49 = vld [vmem:[#allocation3 + $0x88] sm:$0xff]  ;;  %v6873_v52 = vadd.f32 %v510_v44, %v468_v34 }
  0xce   : > { %v592_v47 = vadd.f32 %v591_v37, %v6853_v22  ;;  %v583_v48 = vadd.f32 %v582_v39, %v6860_v32  ;;  %v513_v50 = vld [vmem:[#allocation6 + $0x78] sm:$0xff]  ;;  %v514_v51 = vld [vmem:[#allocation6 + $0x80] sm:$0xff]  ;;  %v6875_v53 = vadd.f32 %v511_v45, %v469_v35  ;;  %v515_v55 = vld [vmem:[#allocation6 + $0x88] sm:$0xff]  ;;  %v6879_v56 = vadd.f32 %v512_v46, %v470_v40 }
  0xcf   : > { %v474_v57 = vld [vmem:[#allocation3 + $0x90] sm:$0xff]  ;;  %v475_v58 = vld [vmem:[#allocation3 + $0x98] sm:$0xff]  ;;  %v6883_v61 = vadd.f32 %v513_v50, %v471_v41  ;;  %v476_v63 = vld [vmem:[#allocation3 + $0xa0] sm:$0xff]  ;;  %v6887_v2 = vadd.f32 %v514_v51, %v472_v42  ;;  %v6895_v16 = vadd.f32 %v515_v55, %v473_v49 }
  0xd0   : > { %v593_v59 = vadd.f32 %v592_v47, %v6862_v36  ;;  %v584_v60 = vadd.f32 %v583_v48, %v6865_v38  ;;  %v596_v62 = vadd.f32 %v6875_v53, %v6873_v52  ;;  %v477_v0 = vld [vmem:[#allocation3 + $0xa8] sm:$0xff]  ;;  %v478_v1 = vld [vmem:[#allocation3 + $0xb0] sm:$0xff]  ;;  %v516_v3 = vld [vmem:[#allocation6 + $0x90] sm:$0xff] }
  0xd1   : > { %v517_v4 = vld [vmem:[#allocation6 + $0x98] sm:$0xff]  ;;  %v518_v5 = vld [vmem:[#allocation6 + $0xa0] sm:$0xff]  ;;  %v479_v8 = vld [vmem:[#allocation3 + $0xb8] sm:$0xff]  ;;  %v6891_v14 = vadd.f32 %v516_v3, %v474_v57 }
  0xd2   : > { %594 = vadd.xlane.f32.xlu1 %v593_v59  ;;  %v585_v6 = vadd.f32 %v584_v60, %v6869_v43  ;;  %v597_v7 = vadd.f32 %v596_v62, %v6879_v56  ;;  %v519_v9 = vld [vmem:[#allocation6 + $0xa8] sm:$0xff]  ;;  %v520_v13 = vld [vmem:[#allocation6 + $0xb0] sm:$0xff]  ;;  %v6893_v15 = vadd.f32 %v517_v4, %v475_v58  ;;  %v521_v17 = vld [vmem:[#allocation6 + $0xb8] sm:$0xff]  ;;  %v6897_v19 = vadd.f32 %v518_v5, %v476_v63 }
  0xd3   : > { %v480_v20 = vld [vmem:[#allocation3 + $0xc0] sm:$0xff]  ;;  %v481_v21 = vld [vmem:[#allocation3 + $0xc8] sm:$0xff]  ;;  %v6901_v25 = vadd.f32 %v519_v9, %v477_v0  ;;  %v482_v27 = vld [vmem:[#allocation3 + $0xd0] sm:$0xff]  ;;  %v6905_v33 = vadd.f32 %v520_v13, %v478_v1  ;;  %v6913_v47 = vadd.f32 %v521_v17, %v479_v8 }
  0xd4   : > { %v586_v23 = vadd.f32 %v585_v6, %v6877_v54  ;;  %v598_v24 = vadd.f32 %v597_v7, %v6883_v61  ;;  %v603_v26 = vadd.f32 %v6893_v15, %v6891_v14  ;;  %v483_v28 = vld [vmem:[#allocation3 + $0xd8] sm:$0xff]  ;;  %v484_v29 = vld [vmem:[#allocation3 + $0xe0] sm:$0xff]  ;;  %v522_v34 = vld [vmem:[#allocation6 + $0xc0] sm:$0xff] }
  0xd5   : > { %v523_v35 = vld [vmem:[#allocation6 + $0xc8] sm:$0xff]  ;;  %v524_v37 = vld [vmem:[#allocation6 + $0xd0] sm:$0xff]  ;;  %v485_v41 = vld [vmem:[#allocation3 + $0xe8] sm:$0xff]  ;;  %v6909_v45 = vadd.f32 %v522_v34, %v480_v20 }
  0xd6   : > { %587 = vadd.xlane.f32.xlu0 %v586_v23  ;;  %v599_v39 = vadd.f32 %v598_v24, %v6887_v2  ;;  %v604_v40 = vadd.f32 %v603_v26, %v6897_v19  ;;  %v525_v42 = vld [vmem:[#allocation6 + $0xd8] sm:$0xff]  ;;  %v526_v44 = vld [vmem:[#allocation6 + $0xe0] sm:$0xff]  ;;  %v6911_v46 = vadd.f32 %v523_v35, %v481_v21  ;;  %v527_v48 = vld [vmem:[#allocation6 + $0xe8] sm:$0xff]  ;;  %v6915_v49 = vadd.f32 %v524_v37, %v482_v27 }
  0xd7   : > { %v492_v50 = vld [vmem:[#allocation3 + $0x120] sm:$0x1]  ;;  %v493_v51 = vld [vmem:[#allocation3 + $0x128] sm:$0x1]  ;;  %v6919_v58 = vadd.f32 %v525_v42, %v483_v28  ;;  %v494_v60 = vld [vmem:[#allocation3 + $0x130] sm:$0x1]  ;;  %v6923_v0 = vadd.f32 %v526_v44, %v484_v29  ;;  %v6931_v17 = vadd.f32 %v527_v48, %v485_v41 }
  0xd8   : > { %v600_v55 = vadd.f32 %v599_v39, %v6895_v16  ;;  %v605_v57 = vadd.f32 %v604_v40, %v6901_v25  ;;  %v610_v59 = vadd.f32 %v6911_v46, %v6909_v45  ;;  %v495_v62 = vld [vmem:[#allocation3 + $0x138] sm:$0x1]  ;;  %v496_v63 = vld [vmem:[#allocation3 + $0x140] sm:$0x1]  ;;  %v534_v1 = vld [vmem:[#allocation6 + $0x120] sm:$0x1] }
  0xd9   : > { %v535_v3 = vld [vmem:[#allocation6 + $0x128] sm:$0x1]  ;;  %v536_v4 = vld [vmem:[#allocation6 + $0x130] sm:$0x1]  ;;  %v537_v7 = vld [vmem:[#allocation6 + $0x138] sm:$0x1]  ;;  %v6927_v9 = vadd.f32 %v534_v1, %v492_v50 }
  0xda   : > { %601 = vadd.xlane.f32.xlu1 %v600_v55  ;;  %v606_v5 = vadd.f32 %v605_v57, %v6905_v33  ;;  %v611_v6 = vadd.f32 %v610_v59, %v6915_v49  ;;  %v538_v8 = vld [vmem:[#allocation6 + $0x140] sm:$0x1]  ;;  %v6929_v13 = vadd.f32 %v535_v3, %v493_v51  ;;  %v497_v20 = vld [vmem:[#allocation3 + $0x148] sm:$0x1]  ;;  %v539_v21 = vld [vmem:[#allocation6 + $0x148] sm:$0x1]  ;;  %v6933_v23 = vadd.f32 %v536_v4, %v494_v60 }
  0xdb   : > { %v6935_v24 = vadd.f32 %v537_v7, %v495_v62  ;;  %v6937_v26 = vadd.f32 %v538_v8, %v496_v63  ;;  %v625_v29 = vsel %vm624_vm0, %v6927_v9, 0.0  ;;  %v486_v35 = vld [vmem:[#allocation3 + $0xf0] sm:$0xff]  ;;  %v487_v37 = vld [vmem:[#allocation3 + $0xf8] sm:$0xff]  ;;  %v488_v39 = vld [vmem:[#allocation3 + $0x100] sm:$0xff]  ;;  %v6948_v48 = vadd.f32 %v539_v21, %v497_v20 }
  0xdc   : > { %v607_v27 = vadd.f32 %v606_v5, %v6913_v47  ;;  %v612_v28 = vadd.f32 %v611_v6, %v6919_v58  ;;  %v626_v34 = vsel %vm624_vm0, %v6929_v13, 0.0  ;;  %v628_v41 = vsel %vm624_vm0, %v6933_v23, 0.0  ;;  %v489_v42 = vld [vmem:[#allocation3 + $0x108] sm:$0xff]  ;;  %v528_v51 = vld [vmem:[#allocation6 + $0xf0] sm:$0xff]  ;;  %v530_v57 = vld [vmem:[#allocation6 + $0x100] sm:$0xff] }
  0xdd   : > { %v627_v40 = vadd.f32 %v626_v34, %v625_v29  ;;  %v630_v50 = vsel %vm624_vm0, %v6935_v24, 0.0  ;;  %v529_v55 = vld [vmem:[#allocation6 + $0xf8] sm:$0xff]  ;;  %v531_v60 = vld [vmem:[#allocation6 + $0x108] sm:$0xff]  ;;  %v6952_v62 = vadd.f32 %v528_v51, %v486_v35  ;;  %v6956_v1 = vadd.f32 %v530_v57, %v488_v39  ;;  %v490_v5 = vld [vmem:[#allocation3 + $0x110] sm:$0xff] }
  0xde   : > { %608 = vadd.xlane.f32.xlu0 %v607_v27  ;;  %v613_v44 = vadd.f32 %v612_v28, %v6923_v0  ;;  %v6954_v63 = vadd.f32 %v529_v55, %v487_v37  ;;  %v632_v4 = vsel %vm624_vm0, %v6937_v26, 0.0  ;;  %v532_v6 = vld [vmem:[#allocation6 + $0x110] sm:$0xff]  ;;  %v6961_v8 = vadd.f32 %v531_v60, %v489_v42  ;;  %v491_v27 = vld [vmem:[#allocation3 + $0x118] sm:$0xff]  ;;  %v533_v28 = vld [vmem:[#allocation6 + $0x118] sm:$0xff] }
  0xdf   : > { %v629_v59 = vadd.f32 %v628_v41, %v627_v40  ;;  %v634_v21 = vsel %vm624_vm0, %v6948_v48, 0.0  ;;  %v6967_v34 = vadd.f32 %v532_v6, %v490_v5  ;;  %v6970_v39 = vadd.f32 %v533_v28, %v491_v27  ;;  %v1162_v51 = vld [vmem:[#allocation14] sm:$0x3f]  ;;  %vm7340_vm4 = vmand %vm624_vm0, %vm1147_vm1 }
  0xe0   : > { %v614_v3 = vadd.f32 %v613_v44, %v6931_v17  ;;  %v617_v20 = vadd.f32 %v6954_v63, %v6952_v62  ;;  %v850_v44 = vlaneseq  ;;  %vm1151_vm5 = vmand %vm1149_vm2, %vm1150_vm3 }
  0xe1   : > { %v631_v7 = vadd.f32 %v630_v50, %v629_v59  ;;  %vm7360_vm6 = vmor %vm1151_vm5, %vm7340_vm4 }
  0xe2   : > { %615 = vadd.xlane.f32.xlu1 %v614_v3  ;;  %v618_v35 = vadd.f32 %v617_v20, %v6956_v1  ;;  %v851_v50 = vshrl.u32 %v850_v44, 7 }
  0xe3   : > { %v633_v29 = vadd.f32 %v632_v4, %v631_v7 }
  0xe4   : > { %v619_v40 = vadd.f32 %v618_v35, %v6961_v8  ;;  %v6975_v55 = vsub.s32 0, %v851_v50  ;;  %v6977_v57 = vsub.s32 1, %v851_v50  ;;  %v6979_v59 = vsub.s32 2, %v851_v50 }
  0xe5   : > { %v635_v37 = vadd.f32 %v634_v21, %v633_v29  ;;  %v6981_v60 = vsub.s32 3, %v851_v50  ;;  %v6983_v3 = vsub.s32 4, %v851_v50  ;;  %v6985_v4 = vsub.s32 5, %v851_v50 }
  0xe6   : > { %v620_v41 = vadd.f32 %v619_v40, %v6967_v34  ;;  %v1167_v5 = vrot.slane %v1162_v51, %v6975_v55  ;;  %v1171_v6 = vrot.slane %v1162_v51, %v6977_v57  ;;  %v1175_v7 = vrot.slane %v1162_v51, %v6979_v59 }
  0xe7   : > { %636 = vadd.xlane.f32.xlu0 %v635_v37  ;;  %v1179_v20 = vrot.slane %v1162_v51, %v6981_v60  ;;  %v1183_v21 = vrot.slane %v1162_v51, %v6983_v3  ;;  %v1187_v27 = vrot.slane %v1162_v51, %v6985_v4 }
  0xe8   : > { %v621_v42 = vadd.f32 %v620_v41, %v6970_v39  ;;  %1194 = vst [vmem:[#allocation15] sm:$0xff] %v1167_v5  ;;  %1195 = vst [vmem:[#allocation15 + $0x8] sm:$0xff] %v1171_v6 }
  0xe9   : > { %1196 = vst [vmem:[#allocation15 + $0x10] sm:$0xff] %v1175_v7  ;;  %1197 = vst [vmem:[#allocation15 + $0x18] sm:$0xff] %v1179_v20 }
  0xea   : > { %1200 = vst [vmem:[#allocation15 + $0x30] sm:$0xff] %v1167_v5  ;;  %1201 = vst [vmem:[#allocation15 + $0x38] sm:$0xff] %v1171_v6 }
  0xeb   : > { %622 = vadd.xlane.f32.xlu0 %v621_v42  ;;  %1202 = vst [vmem:[#allocation15 + $0x40] sm:$0xff] %v1175_v7  ;;  %1203 = vst [vmem:[#allocation15 + $0x48] sm:$0xff] %v1179_v20 }
  0xec   : > { %1206 = vst [vmem:[#allocation15 + $0x60] sm:$0xff] %v1167_v5  ;;  %1207 = vst [vmem:[#allocation15 + $0x68] sm:$0xff] %v1171_v6 }
  0xed   : > { %1208 = vst [vmem:[#allocation15 + $0x70] sm:$0xff] %v1175_v7  ;;  %1209 = vst [vmem:[#allocation15 + $0x78] sm:$0xff] %v1179_v20 }
  0xee   : > { %1212 = vst [vmem:[#allocation15 + $0x90] sm:$0xff] %v1167_v5  ;;  %1213 = vst [vmem:[#allocation15 + $0x98] sm:$0xff] %v1171_v6 }
  0xef   : > { %1214 = vst [vmem:[#allocation15 + $0xa0] sm:$0xff] %v1175_v7  ;;  %1215 = vst [vmem:[#allocation15 + $0xa8] sm:$0xff] %v1179_v20 }
  0xf0   : > { %1218 = vst [vmem:[#allocation15 + $0xc0] sm:$0xff] %v1167_v5  ;;  %1219 = vst [vmem:[#allocation15 + $0xc8] sm:$0xff] %v1171_v6 }
  0xf1   : > { %1220 = vst [vmem:[#allocation15 + $0xd0] sm:$0xff] %v1175_v7  ;;  %1221 = vst [vmem:[#allocation15 + $0xd8] sm:$0xff] %v1179_v20 }
  0xf2   : > { %1224 = vst [vmem:[#allocation15 + $0xf0] sm:$0xff] %v1167_v5  ;;  %1225 = vst [vmem:[#allocation15 + $0xf8] sm:$0xff] %v1171_v6 }
  0xf3   : > { %1226 = vst [vmem:[#allocation15 + $0x100] sm:$0xff] %v1175_v7  ;;  %1227 = vst [vmem:[#allocation15 + $0x108] sm:$0xff] %v1179_v20 }
  0xf4   : > { %1230 = vst [vmem:[#allocation15 + $0x120] sm:$0x1] %v1167_v5  ;;  %1231 = vst [vmem:[#allocation15 + $0x128] sm:$0x1] %v1171_v6 }
  0xf5   : > { %1232 = vst [vmem:[#allocation15 + $0x130] sm:$0x1] %v1175_v7  ;;  %1233 = vst [vmem:[#allocation15 + $0x138] sm:$0x1] %v1179_v20 }
  0xf6   : > { %1198 = vst [vmem:[#allocation15 + $0x20] sm:$0xff] %v1183_v21  ;;  %1199 = vst [vmem:[#allocation15 + $0x28] sm:$0xff] %v1187_v27 }
  0xf7   : > { %1204 = vst [vmem:[#allocation15 + $0x50] sm:$0xff] %v1183_v21  ;;  %1205 = vst [vmem:[#allocation15 + $0x58] sm:$0xff] %v1187_v27 }
  0xf8   : > { %1210 = vst [vmem:[#allocation15 + $0x80] sm:$0xff] %v1183_v21  ;;  %1211 = vst [vmem:[#allocation15 + $0x88] sm:$0xff] %v1187_v27 }
  0xf9   : > { %1216 = vst [vmem:[#allocation15 + $0xb0] sm:$0xff] %v1183_v21  ;;  %1217 = vst [vmem:[#allocation15 + $0xb8] sm:$0xff] %v1187_v27 }
  0xfa   : > { %1222 = vst [vmem:[#allocation15 + $0xe0] sm:$0xff] %v1183_v21  ;;  %1223 = vst [vmem:[#allocation15 + $0xe8] sm:$0xff] %v1187_v27 }
  0xfb   : > { %1228 = vst [vmem:[#allocation15 + $0x110] sm:$0xff] %v1183_v21  ;;  %1229 = vst [vmem:[#allocation15 + $0x118] sm:$0xff] %v1187_v27 }
  0xfc   : > { %1234 = vst [vmem:[#allocation15 + $0x140] sm:$0x1] %v1183_v21  ;;  %1235 = vst [vmem:[#allocation15 + $0x148] sm:$0x1] %v1187_v27 }
 0x15b   : > { %v595_v28 = vpop.xlane.xlu1 %594 }
 0x15c   : > { %v640_v29 = vmul.f32 0.0013020834, %v595_v28 }
 0x15e   : > { %v6994_v35 = vsub.f32 %v6843_v10, %v640_v29  ;;  %v6997_v37 = vsub.f32 %v6845_v11, %v640_v29  ;;  %v7000_v40 = vsub.f32 %v6847_v12, %v640_v29  ;;  %v7003_v42 = vsub.f32 %v6849_v18, %v640_v29 }
 0x15f   : > { %v588_v41 = vpop.xlane.xlu0 %587  ;;  %v7006_v44 = vsub.f32 %v6853_v22, %v640_v29  ;;  %v7015_v12 = vsub.f32 %v6862_v36, %v640_v29 }
 0x160   : > { %v639_v50 = vmul.f32 0.0013020834, %v588_v41  ;;  %v694_v51 = vmul.f32 %v6994_v35, %v6994_v35  ;;  %v695_v10 = vmul.f32 %v6997_v37, %v6997_v37  ;;  %v696_v11 = vmul.f32 %v7000_v40, %v7000_v40 }
 0x161   : > { %v697_v20 = vmul.f32 %v7003_v42, %v7003_v42  ;;  %v698_v21 = vmul.f32 %v7006_v44, %v7006_v44  ;;  %v699_v29 = vmul.f32 %v7015_v12, %v7015_v12 }
 0x162   : > { %v737_v5 = vadd.f32 %v695_v10, %v694_v51  ;;  %v7018_v18 = vsub.f32 %v6856_v30, %v639_v50  ;;  %v7021_v22 = vsub.f32 %v6858_v31, %v639_v50  ;;  %v7024_v6 = vsub.f32 %v6860_v32, %v639_v50 }
 0x163   : > { %v602_v7 = vpop.xlane.xlu1 %601  ;;  %v7031_v36 = vsub.f32 %v6865_v38, %v639_v50  ;;  %v7034_v27 = vsub.f32 %v6869_v43, %v639_v50  ;;  %v7043_v41 = vsub.f32 %v6877_v54, %v639_v50 }
 0x164   : > { %8389 = vst [vmem:[#allocation25_spill] sm:$0xff] %v7021_v22  ;;  %v641_v30 = vmul.f32 0.0013020834, %v602_v7  ;;  %v738_v28 = vadd.f32 %v737_v5, %v696_v11  ;;  %v688_v31 = vmul.f32 %v7018_v18, %v7018_v18  ;;  %v689_v32 = vmul.f32 %v7021_v22, %v7021_v22 }
 0x165   : > { %8390 = vst [vmem:[#allocation26_spill] sm:$0xff] %v7031_v36  ;;  %8391 = vst [vmem:[#allocation27_spill] sm:$0xff] %v7034_v27  ;;  %v690_v38 = vmul.f32 %v7024_v6, %v7024_v6  ;;  %v691_v43 = vmul.f32 %v7031_v36, %v7031_v36  ;;  %v692_v22 = vmul.f32 %v7034_v27, %v7034_v27 }
 0x166   : > { %v739_v51 = vadd.f32 %v738_v28, %v697_v20  ;;  %v730_v10 = vadd.f32 %v689_v32, %v688_v31  ;;  %v7050_v11 = vsub.f32 %v6873_v52, %v641_v30  ;;  %v7053_v5 = vsub.f32 %v6875_v53, %v641_v30 }
 0x167   : > { %v609_v7 = vpop.xlane.xlu0 %608  ;;  %v7058_v54 = vsub.f32 %v6879_v56, %v641_v30  ;;  %v7061_v50 = vsub.f32 %v6883_v61, %v641_v30  ;;  %v7064_v36 = vsub.f32 %v6887_v2, %v641_v30  ;;  %v693_v31 = vmul.f32 %v7043_v41, %v7043_v41 }
 0x168   : > { %v642_v20 = vmul.f32 0.0013020834, %v609_v7  ;;  %v740_v28 = vadd.f32 %v739_v51, %v698_v21  ;;  %v731_v52 = vadd.f32 %v730_v10, %v690_v38  ;;  %v700_v53 = vmul.f32 %v7050_v11, %v7050_v11 }
 0x169   : > { %8392 = vst [vmem:[#allocation28_spill] sm:$0xff] %v7058_v54  ;;  %v7071_v32 = vsub.f32 %v6895_v16, %v641_v30  ;;  %v701_v56 = vmul.f32 %v7053_v5, %v7053_v5  ;;  %v702_v61 = vmul.f32 %v7058_v54, %v7058_v54  ;;  %v703_v21 = vmul.f32 %v7061_v50, %v7061_v50 }
 0x16a   : > { %v741_v2 = vadd.f32 %v740_v28, %v699_v29  ;;  %v732_v27 = vadd.f32 %v731_v52, %v691_v43  ;;  %v7080_v38 = vsub.f32 %v6891_v14, %v642_v20  ;;  %v7083_v7 = vsub.f32 %v6893_v15, %v642_v20 }
 0x16b   : > { %v616_v51 = vpop.xlane.xlu1 %615  ;;  %v744_v10 = vadd.f32 %v701_v56, %v700_v53  ;;  %v7086_v16 = vsub.f32 %v6897_v19, %v642_v20  ;;  %v7089_v30 = vsub.f32 %v6901_v25, %v642_v20  ;;  %v704_v43 = vmul.f32 %v7064_v36, %v7064_v36 }
 0x16c   : > { %v643_v54 = vmul.f32 0.0013020834, %v616_v51  ;;  %742 = vadd.xlane.f32.xlu1 %v741_v2  ;;  %v733_v29 = vadd.f32 %v732_v27, %v692_v22  ;;  %v7094_v14 = vsub.f32 %v6905_v33, %v642_v20  ;;  %v705_v28 = vmul.f32 %v7071_v32, %v7071_v32 }
 0x16d   : > { %v745_v15 = vadd.f32 %v744_v10, %v702_v61  ;;  %v706_v19 = vmul.f32 %v7080_v38, %v7080_v38  ;;  %v707_v25 = vmul.f32 %v7083_v7, %v7083_v7  ;;  %v7103_v53 = vsub.f32 %v6913_v47, %v642_v20 }
 0x16e   : > { %v734_v52 = vadd.f32 %v733_v29, %v693_v31  ;;  %v708_v22 = vmul.f32 %v7086_v16, %v7086_v16  ;;  %v709_v33 = vmul.f32 %v7089_v30, %v7089_v30  ;;  %v7110_v61 = vsub.f32 %v6909_v45, %v643_v54 }
 0x16f   : > { %v746_v27 = vadd.f32 %v745_v15, %v703_v21  ;;  %v751_v56 = vadd.f32 %v707_v25, %v706_v19  ;;  %v7113_v2 = vsub.f32 %v6911_v46, %v643_v54  ;;  %v710_v47 = vmul.f32 %v7094_v14, %v7094_v14 }
 0x170   : > { %v637_v51 = vpop.xlane.xlu0 %636  ;;  %735 = vadd.xlane.f32.xlu0 %v734_v52  ;;  %v7118_v20 = vsub.f32 %v6915_v49, %v643_v54  ;;  %v7121_v31 = vsub.f32 %v6919_v58, %v643_v54  ;;  %v7124_v21 = vsub.f32 %v6923_v0, %v643_v54  ;;  %v712_v46 = vmul.f32 %v7110_v61, %v7110_v61 }
 0x171   : > { %v645_v10 = vmul.f32 0.0013020834, %v637_v51  ;;  %v747_v45 = vadd.f32 %v746_v27, %v704_v43  ;;  %v752_v29 = vadd.f32 %v751_v56, %v708_v22  ;;  %v711_v15 = vmul.f32 %v7103_v53, %v7103_v53 }
 0x172   : > { %v7131_v19 = vsub.f32 %v6931_v17, %v643_v54  ;;  %v713_v49 = vmul.f32 %v7113_v2, %v7113_v2  ;;  %v714_v58 = vmul.f32 %v7118_v20, %v7118_v20  ;;  %v715_v43 = vmul.f32 %v7121_v31, %v7121_v31 }
 0x173   : > { %v748_v0 = vadd.f32 %v747_v45, %v705_v28  ;;  %v753_v25 = vadd.f32 %v752_v29, %v709_v33  ;;  %v7140_v52 = vsub.f32 %v6927_v9, %v645_v10  ;;  %v7143_v56 = vsub.f32 %v6929_v13, %v645_v10 }
 0x174   : > { %v623_v22 = vpop.xlane.xlu0 %622  ;;  %v758_v27 = vadd.f32 %v713_v49, %v712_v46  ;;  %v7146_v17 = vsub.f32 %v6933_v23, %v645_v10  ;;  %v7149_v54 = vsub.f32 %v6935_v24, %v645_v10  ;;  %v716_v33 = vmul.f32 %v7124_v21, %v7124_v21 }
 0x175   : > { %v644_v51 = vmul.f32 0.0013020834, %v623_v22  ;;  %749 = vadd.xlane.f32.xlu0 %v748_v0  ;;  %v754_v28 = vadd.f32 %v753_v25, %v710_v47  ;;  %v7154_v9 = vsub.f32 %v6937_v26, %v645_v10  ;;  %v724_v13 = vmul.f32 %v7140_v52, %v7140_v52 }
 0x176   : > { %v759_v45 = vadd.f32 %v758_v27, %v714_v58  ;;  %v725_v23 = vmul.f32 %v7143_v56, %v7143_v56  ;;  %v726_v24 = vmul.f32 %v7146_v17, %v7146_v17  ;;  %v7163_v46 = vsub.f32 %v6948_v48, %v645_v10 }
 0x177   : > { %v755_v29 = vadd.f32 %v754_v28, %v711_v15  ;;  %v727_v47 = vmul.f32 %v7149_v54, %v7149_v54  ;;  %v772_v26 = vsel %vm624_vm0, %v724_v13, 0.0  ;;  %v717_v0 = vmul.f32 %v7131_v19, %v7131_v19 }
 0x178   : > { %v760_v49 = vadd.f32 %v759_v45, %v715_v43  ;;  %v773_v58 = vsel %vm624_vm0, %v725_v23, 0.0  ;;  %v728_v25 = vmul.f32 %v7154_v9, %v7154_v9  ;;  %v775_v15 = vsel %vm624_vm0, %v726_v24, 0.0 }
 0x179   : > { %756 = vadd.xlane.f32.xlu1 %v755_v29  ;;  %v774_v22 = vadd.f32 %v773_v58, %v772_v26  ;;  %v7175_v10 = vsub.f32 %v6952_v62, %v644_v51  ;;  %v7178_v43 = vsub.f32 %v6954_v63, %v644_v51  ;;  %v7181_v27 = vsub.f32 %v6956_v1, %v644_v51 }
 0x17a   : > { %v761_v48 = vadd.f32 %v760_v49, %v716_v33  ;;  %v729_v28 = vmul.f32 %v7163_v46, %v7163_v46  ;;  %v777_v13 = vsel %vm624_vm0, %v727_v47, 0.0  ;;  %v7187_v23 = vsub.f32 %v6961_v8, %v644_v51 }
 0x17b   : > { %v776_v45 = vadd.f32 %v775_v15, %v774_v22  ;;  %v718_v62 = vmul.f32 %v7175_v10, %v7175_v10  ;;  %v719_v63 = vmul.f32 %v7178_v43, %v7178_v43  ;;  %v720_v1 = vmul.f32 %v7181_v27, %v7181_v27 }
 0x17c   : > { %8393 = vst [vmem:[#allocation29_spill] sm:$0xff] %v7187_v23  ;;  %v762_v24 = vadd.f32 %v761_v48, %v717_v0  ;;  %v779_v29 = vsel %vm624_vm0, %v728_v25, 0.0  ;;  %v7197_v49 = vsub.f32 %v6967_v34, %v644_v51  ;;  %v781_v26 = vsel %vm624_vm0, %v729_v28, 0.0 }
 0x17d   : > { %v778_v33 = vadd.f32 %v777_v13, %v776_v45  ;;  %v765_v47 = vadd.f32 %v719_v63, %v718_v62  ;;  %v7201_v58 = vsub.f32 %v6970_v39, %v644_v51  ;;  %v721_v0 = vmul.f32 %v7187_v23, %v7187_v23 }
 0x17e   : > { %763 = vadd.xlane.f32.xlu0 %v762_v24  ;;  %8394 = vst [vmem:[#allocation30_spill] sm:$0xff] %v7197_v49  ;;  %v722_v48 = vmul.f32 %v7197_v49, %v7197_v49 }
 0x17f   : > { %v780_v8 = vadd.f32 %v779_v29, %v778_v33  ;;  %8395 = vst [vmem:[#allocation31_spill] sm:$0xff] %v7201_v58  ;;  %v766_v22 = vadd.f32 %v765_v47, %v720_v1  ;;  %v723_v34 = vmul.f32 %v7201_v58, %v7201_v58  ;;  %v848_v29 = vld [vmem:[#allocation8] sm:$0x3f] }
 0x181   : > { %v782_v15 = vadd.f32 %v781_v26, %v780_v8  ;;  %v767_v45 = vadd.f32 %v766_v22, %v721_v0  ;;  %v922_v26 = vld [vmem:[#allocation9] sm:$0x3f]  ;;  %v7210_v22 = vrot.slane %v848_v29, %v6975_v55 }
 0x183   : > { %783 = vadd.xlane.f32.xlu1 %v782_v15  ;;  %v768_v25 = vadd.f32 %v767_v45, %v722_v48  ;;  %v7213_v15 = vrot.slane %v848_v29, %v6977_v57  ;;  %v7216_v48 = vrot.slane %v848_v29, %v6979_v59  ;;  %v7219_v45 = vrot.slane %v848_v29, %v6981_v60 }
 0x185   : > { %v769_v13 = vadd.f32 %v768_v25, %v723_v34  ;;  %v7222_v25 = vrot.slane %v848_v29, %v6983_v3 }
 0x187   : > { %770 = vadd.xlane.f32.xlu1 %v769_v13  ;;  %v7225_v13 = vrot.slane %v848_v29, %v6985_v4 }
 0x1f5   : > { %v743_v28 = vpop.xlane.xlu1 %742 }
 0x1f6   : > { %v786_v24 = vmul.f32 0.0013020834, %v743_v28  ;;  %v7228_v28 = vrot.slane %v922_v26, %v6975_v55 }
 0x1f8   : > { %v793_v39 = vadd.f32 1e-05, %v786_v24  ;;  %v7231_v24 = vrot.slane %v922_v26, %v6977_v57 }
 0x1f9   : > { %v736_v51 = vpop.xlane.xlu0 %735 }
 0x1fa   : > { %5574 = vrsqrt.f32 %v793_v39  ;;  %v785_v62 = vmul.f32 0.0013020834, %v736_v51  ;;  %v7234_v51 = vrot.slane %v922_v26, %v6979_v59 }
 0x1fc   : > { %v792_v63 = vadd.f32 1e-05, %v785_v62  ;;  %v7237_v62 = vrot.slane %v922_v26, %v6981_v60 }
 0x1fe   : > { %5576 = vrsqrt.f32 %v792_v63  ;;  %v750_v1 = vpop.xlane.xlu0 %749  ;;  %v7240_v63 = vrot.slane %v922_v26, %v6983_v3 }
 0x1ff   : > { %v787_v33 = vmul.f32 0.0013020834, %v750_v1 }
 0x201   : > { %v794_v47 = vadd.f32 1e-05, %v787_v33 }
 0x202   : > { %v757_v8 = vpop.xlane.xlu1 %756 }
 0x203   : > { %v788_v0 = vmul.f32 0.0013020834, %v757_v8  ;;  %5578 = vrsqrt.f32 %v794_v47  ;;  %v7247_v47 = vrot.slane %v922_v26, %v6985_v4 }
 0x205   : > { %v795_v34 = vadd.f32 1e-05, %v788_v0 }
 0x207   : > { %v5575_v39 = vpop.eup %5574  ;;  %5580 = vrsqrt.f32 %v795_v34  ;;  %v764_v1 = vpop.xlane.xlu0 %763 }
 0x208   : > { %v812_v33 = vmul.f32 %v5575_v39, %v6994_v35  ;;  %v813_v55 = vmul.f32 %v5575_v39, %v6997_v37  ;;  %v814_v29 = vmul.f32 %v5575_v39, %v7000_v40  ;;  %v815_v57 = vmul.f32 %v5575_v39, %v7003_v42 }
 0x209   : > { %v816_v59 = vmul.f32 %v5575_v39, %v7006_v44  ;;  %v817_v60 = vmul.f32 %v5575_v39, %v7015_v12  ;;  %v789_v8 = vmul.f32 0.0013020834, %v764_v1 }
 0x20a   : > { %v886_v3 = vmul.f32 %v7210_v22, %v812_v33  ;;  %v887_v0 = vmul.f32 %v7213_v15, %v813_v55  ;;  %v888_v35 = vmul.f32 %v7216_v48, %v814_v29  ;;  %v889_v37 = vmul.f32 %v7219_v45, %v815_v57  ;;  %v8396_v29 = vld [vmem:[#allocation25_spill] sm:$0xff] }
 0x20b   : > { %v5577_v34 = vpop.eup %5576  ;;  %v890_v40 = vmul.f32 %v7222_v25, %v816_v59  ;;  %v891_v42 = vmul.f32 %v7225_v13, %v817_v60  ;;  %v796_v4 = vadd.f32 1e-05, %v789_v8  ;;  %v8397_v8 = vld [vmem:[#allocation26_spill] sm:$0xff] }
 0x20c   : > { %v960_v26 = vadd.f32 %v7228_v28, %v886_v3  ;;  %v961_v44 = vadd.f32 %v7231_v24, %v887_v0  ;;  %v962_v12 = vadd.f32 %v7234_v51, %v888_v35  ;;  %v963_v39 = vadd.f32 %v7237_v62, %v889_v37  ;;  %v8398_v0 = vld [vmem:[#allocation27_spill] sm:$0xff] }
 0x20d   : > { %v964_v1 = vadd.f32 %v7240_v63, %v890_v40  ;;  %v965_v33 = vadd.f32 %v7247_v47, %v891_v42  ;;  %v806_v55 = vmul.f32 %v5577_v34, %v7018_v18  ;;  %v807_v57 = vmul.f32 %v5577_v34, %v8396_v29 }
 0x20e   : > { %v5436_v59 = vpack.c.bf16 %v961_v44, %v960_v26  ;;  %v5437_v58 = vpack.c.bf16 %v963_v39, %v962_v12  ;;  %v808_v60 = vmul.f32 %v5577_v34, %v7024_v6  ;;  %v809_v3 = vmul.f32 %v5577_v34, %v8397_v8 }
 0x20f   : > { %v5438_v49 = vpack.c.bf16 %v965_v33, %v964_v1  ;;  %v810_v23 = vmul.f32 %v5577_v34, %v8398_v0  ;;  %v811_v35 = vmul.f32 %v5577_v34, %v7043_v41  ;;  %v880_v37 = vmul.f32 %v7210_v22, %v806_v55 }
 0x210   : > { %v5579_v40 = vpop.eup %5578  ;;  %1131 = vst [vmem:[#allocation2 + $0x18] sm:$0xff] %v5436_v59  ;;  %1132 = vst [vmem:[#allocation2 + $0x30] sm:$0xff] %v5437_v58  ;;  %v881_v18 = vmul.f32 %v7213_v15, %v807_v57  ;;  %v882_v42 = vmul.f32 %v7216_v48, %v808_v60  ;;  %v883_v26 = vmul.f32 %v7219_v45, %v809_v3  ;;  %5582 = vrsqrt.f32 %v796_v4  ;;  %v8399_v4 = vld [vmem:[#allocation28_spill] sm:$0xff] }
 0x211   : > { %1133 = vst [vmem:[#allocation2 + $0x68] sm:$0xff] %v5438_v49  ;;  %v884_v6 = vmul.f32 %v7222_v25, %v810_v23  ;;  %v885_v44 = vmul.f32 %v7225_v13, %v811_v35  ;;  %v954_v12 = vadd.f32 %v7228_v28, %v880_v37  ;;  %v818_v41 = vmul.f32 %v5579_v40, %v7050_v11 }
 0x212   : > { %v955_v34 = vadd.f32 %v7231_v24, %v881_v18  ;;  %v956_v58 = vadd.f32 %v7234_v51, %v882_v42  ;;  %v957_v39 = vadd.f32 %v7237_v62, %v883_v26  ;;  %v819_v1 = vmul.f32 %v5579_v40, %v7053_v5 }
 0x213   : > { %v958_v33 = vadd.f32 %v7240_v63, %v884_v6  ;;  %v959_v49 = vadd.f32 %v7247_v47, %v885_v44  ;;  %v820_v23 = vmul.f32 %v5579_v40, %v8399_v4  ;;  %v821_v55 = vmul.f32 %v5579_v40, %v7061_v50 }
 0x214   : > { %v5581_v29 = vpop.eup %5580  ;;  %v5433_v57 = vpack.c.bf16 %v955_v34, %v954_v12  ;;  %v5434_v59 = vpack.c.bf16 %v957_v39, %v956_v58  ;;  %v822_v11 = vmul.f32 %v5579_v40, %v7064_v36  ;;  %v823_v60 = vmul.f32 %v5579_v40, %v7071_v32 }
 0x215   : > { %v5435_v8 = vpack.c.bf16 %v959_v49, %v958_v33  ;;  %v824_v3 = vmul.f32 %v5581_v29, %v7080_v38  ;;  %v825_v5 = vmul.f32 %v5581_v29, %v7083_v7  ;;  %v826_v0 = vmul.f32 %v5581_v29, %v7086_v16 }
 0x216   : > { %1128 = vst [vmem:[#allocation2] sm:$0xff] %v5433_v57  ;;  %1129 = vst [vmem:[#allocation2 + $0x38] sm:$0xff] %v5434_v59  ;;  %v827_v35 = vmul.f32 %v5581_v29, %v7089_v30  ;;  %v828_v50 = vmul.f32 %v5581_v29, %v7094_v14  ;;  %v829_v37 = vmul.f32 %v5581_v29, %v7103_v53  ;;  %v784_v53 = vpop.xlane.xlu1 %783 }
 0x217   : > { %v892_v18 = vmul.f32 %v7210_v22, %v818_v41  ;;  %1130 = vst [vmem:[#allocation2 + $0x50] sm:$0xff] %v5435_v8  ;;  %v898_v36 = vmul.f32 %v7210_v22, %v824_v3  ;;  %v899_v32 = vmul.f32 %v7213_v15, %v825_v5  ;;  %v900_v38 = vmul.f32 %v7216_v48, %v826_v0 }
 0x218   : > { %v893_v7 = vmul.f32 %v7213_v15, %v819_v1  ;;  %v901_v16 = vmul.f32 %v7219_v45, %v827_v35  ;;  %v902_v40 = vmul.f32 %v7222_v25, %v828_v50  ;;  %v903_v30 = vmul.f32 %v7225_v13, %v829_v37 }
 0x219   : > { %v894_v14 = vmul.f32 %v7216_v48, %v820_v23  ;;  %v972_v42 = vadd.f32 %v7228_v28, %v898_v36  ;;  %v973_v26 = vadd.f32 %v7231_v24, %v899_v32  ;;  %v974_v6 = vadd.f32 %v7234_v51, %v900_v38 }
 0x21a   : > { %v895_v44 = vmul.f32 %v7219_v45, %v821_v55  ;;  %v975_v12 = vadd.f32 %v7237_v62, %v901_v16  ;;  %v976_v41 = vadd.f32 %v7240_v63, %v902_v40  ;;  %v977_v34 = vadd.f32 %v7247_v47, %v903_v30  ;;  %v771_v50 = vpop.xlane.xlu1 %770 }
 0x21b   : > { %v896_v58 = vmul.f32 %v7222_v25, %v822_v11  ;;  %v5442_v39 = vpack.c.bf16 %v973_v26, %v972_v42  ;;  %v897_v1 = vmul.f32 %v7225_v13, %v823_v60  ;;  %v966_v33 = vadd.f32 %v7228_v28, %v892_v18 }
 0x21c   : > { %v967_v49 = vadd.f32 %v7231_v24, %v893_v7  ;;  %v5443_v4 = vpack.c.bf16 %v975_v12, %v974_v6  ;;  %v5444_v23 = vpack.c.bf16 %v977_v34, %v976_v41  ;;  %v968_v29 = vadd.f32 %v7234_v51, %v894_v14 }
 0x21d   : > { %v969_v55 = vadd.f32 %v7237_v62, %v895_v44  ;;  %v5583_v57 = vpop.eup %5582  ;;  %1137 = vst [vmem:[#allocation2 + $0x88] sm:$0xff] %v5442_v39  ;;  %v970_v59 = vadd.f32 %v7240_v63, %v896_v58  ;;  %v971_v8 = vadd.f32 %v7247_v47, %v897_v1  ;;  %v791_v3 = vmul.f32 0.0013020834, %v784_v53 }
 0x21e   : > { %v5439_v11 = vpack.c.bf16 %v967_v49, %v966_v33  ;;  %1138 = vst [vmem:[#allocation2 + $0x28] sm:$0xff] %v5443_v4  ;;  %1139 = vst [vmem:[#allocation2 + $0x40] sm:$0xff] %v5444_v23  ;;  %v830_v5 = vmul.f32 %v5583_v57, %v7110_v61  ;;  %v831_v0 = vmul.f32 %v5583_v57, %v7113_v2 }
 0x21f   : > { %v5440_v60 = vpack.c.bf16 %v969_v55, %v968_v29  ;;  %v832_v35 = vmul.f32 %v5583_v57, %v7118_v20  ;;  %v5441_v37 = vpack.c.bf16 %v971_v8, %v970_v59  ;;  %v833_v18 = vmul.f32 %v5583_v57, %v7121_v31 }
 0x220   : > { %1134 = vst [vmem:[#allocation2 + $0x78] sm:$0xff] %v5439_v11  ;;  %v834_v36 = vmul.f32 %v5583_v57, %v7124_v21  ;;  %v835_v32 = vmul.f32 %v5583_v57, %v7131_v19  ;;  %v904_v38 = vmul.f32 %v7210_v22, %v830_v5  ;;  %v905_v7 = vmul.f32 %v7213_v15, %v831_v0  ;;  %v1156_v5 = vld [vmem:[#allocation2 + $0x10] sm:$0x11] }
 0x221   : > { %1135 = vst [vmem:[#allocation2 + $0x80] sm:$0xff] %v5440_v60  ;;  %v906_v61 = vmul.f32 %v7216_v48, %v832_v35  ;;  %v798_v16 = vadd.f32 1e-05, %v791_v3  ;;  %1136 = vst [vmem:[#allocation2 + $0x8] sm:$0xff] %v5441_v37  ;;  %v907_v2 = vmul.f32 %v7219_v45, %v833_v18  ;;  %v790_v31 = vmul.f32 0.0013020834, %v771_v50 }
 0x222   : > { %v908_v20 = vmul.f32 %v7222_v25, %v834_v36  ;;  %v909_v40 = vmul.f32 %v7225_v13, %v835_v32  ;;  %v978_v21 = vadd.f32 %v7228_v28, %v904_v38  ;;  %v979_v19 = vadd.f32 %v7231_v24, %v905_v7  ;;  %v1153_v60 = vld [vmem:[#allocation2 + $0x70] sm:$0x11]  ;;  %v1159_v37 = vld [vmem:[#allocation2 + $0xa0] sm:$0x11] }
 0x223   : > { %v980_v30 = vadd.f32 %v7234_v51, %v906_v61  ;;  %5584 = vrsqrt.f32 %v798_v16  ;;  %v981_v14 = vadd.f32 %v7237_v62, %v907_v2  ;;  %v797_v26 = vadd.f32 1e-05, %v790_v31  ;;  %v8404_v35 = vld [vmem:[#allocation29_spill] sm:$0xff]  ;;  %v8405_v32 = vld [vmem:[#allocation30_spill] sm:$0xff]  ;;  %v8406_v7 = vld [vmem:[#allocation31_spill] sm:$0xff] }
 0x224   : > { %v982_v53 = vadd.f32 %v7240_v63, %v908_v20  ;;  %v983_v42 = vadd.f32 %v7247_v47, %v909_v40  ;;  %v5445_v6 = vpack.c.bf16 %v979_v19, %v978_v21 }
 0x225   : > { %v5446_v44 = vpack.c.bf16 %v981_v14, %v980_v30  ;;  %5586 = vrsqrt.f32 %v797_v26 }
 0x226   : > { %v5447_v12 = vpack.c.bf16 %v983_v42, %v982_v53  ;;  %1140 = vst [vmem:[#allocation2 + $0x60] sm:$0xff] %v5445_v6 }
 0x227   : > { %1141 = vst [vmem:[#allocation2 + $0x90] sm:$0xff] %v5446_v44 }
 0x228   : > { %1142 = vst [vmem:[#allocation2 + $0x98] sm:$0xff] %v5447_v12 }
 0x230   : > { %v5585_v41 = vpop.eup %5584 }
 0x231   : > { %v842_v34 = vmul.f32 %v5585_v41, %v7140_v52  ;;  %v843_v58 = vmul.f32 %v5585_v41, %v7143_v56  ;;  %v844_v39 = vmul.f32 %v5585_v41, %v7146_v17  ;;  %v845_v1 = vmul.f32 %v5585_v41, %v7149_v54 }
 0x232   : > { %v846_v49 = vmul.f32 %v5585_v41, %v7154_v9  ;;  %v847_v4 = vmul.f32 %v5585_v41, %v7163_v46  ;;  %v5587_v23 = vpop.eup %5586 }
 0x233   : > { %v916_v29 = vmul.f32 %v7210_v22, %v842_v34  ;;  %v917_v52 = vmul.f32 %v7213_v15, %v843_v58  ;;  %v918_v56 = vmul.f32 %v7216_v48, %v844_v39  ;;  %v919_v17 = vmul.f32 %v7219_v45, %v845_v1 }
 0x234   : > { %v920_v54 = vmul.f32 %v7222_v25, %v846_v49  ;;  %v921_v55 = vmul.f32 %v7225_v13, %v847_v4  ;;  %v836_v57 = vmul.f32 %v5587_v23, %v7175_v10  ;;  %v837_v9 = vmul.f32 %v5587_v23, %v7178_v43 }
 0x235   : > { %v990_v46 = vadd.f32 %v7228_v28, %v916_v29  ;;  %v991_v59 = vadd.f32 %v7231_v24, %v917_v52  ;;  %v992_v8 = vadd.f32 %v7234_v51, %v918_v56  ;;  %v993_v11 = vadd.f32 %v7237_v62, %v919_v17 }
 0x236   : > { %v994_v10 = vadd.f32 %v7240_v63, %v920_v54  ;;  %v995_v43 = vadd.f32 %v7247_v47, %v921_v55  ;;  %v838_v0 = vmul.f32 %v5587_v23, %v7181_v27  ;;  %v839_v50 = vmul.f32 %v5587_v23, %v8404_v35 }
 0x237   : > { %v5451_v18 = vpack.c.bf16 %v991_v59, %v990_v46  ;;  %v5452_v36 = vpack.c.bf16 %v993_v11, %v992_v8  ;;  %v840_v38 = vmul.f32 %v5587_v23, %v8405_v32  ;;  %v841_v61 = vmul.f32 %v5587_v23, %v8406_v7 }
 0x238   : > { %v5453_v16 = vpack.c.bf16 %v995_v43, %v994_v10  ;;  %v910_v2 = vmul.f32 %v7210_v22, %v836_v57  ;;  %v911_v20 = vmul.f32 %v7213_v15, %v837_v9  ;;  %v912_v40 = vmul.f32 %v7216_v48, %v838_v0 }
 0x239   : > { %v1154_v31 = vsel %vm7360_vm6, %v5451_v18, %v1153_v60  ;;  %v1157_v27 = vsel %vm7360_vm6, %v5452_v36, %v1156_v5  ;;  %v913_v21 = vmul.f32 %v7219_v45, %v839_v50  ;;  %v914_v19 = vmul.f32 %v7222_v25, %v840_v38 }
 0x23a   : > { %1155 = vst [vmem:[#allocation2 + $0x70] sm:$0x11] %v1154_v31  ;;  %1158 = vst [vmem:[#allocation2 + $0x10] sm:$0x11] %v1157_v27  ;;  %v1160_v30 = vsel %vm7360_vm6, %v5453_v16, %v1159_v37  ;;  %v915_v22 = vmul.f32 %v7225_v13, %v841_v61  ;;  %v984_v15 = vadd.f32 %v7228_v28, %v910_v2 }
 0x23b   : > { %v985_v48 = vadd.f32 %v7231_v24, %v911_v20  ;;  %1161 = vst [vmem:[#allocation2 + $0xa0] sm:$0x11] %v1160_v30  ;;  %v986_v14 = vadd.f32 %v7234_v51, %v912_v40  ;;  %v987_v53 = vadd.f32 %v7237_v62, %v913_v21  ;;  %v988_v45 = vadd.f32 %v7240_v63, %v914_v19 }
 0x23c   : > { %v989_v25 = vadd.f32 %v7247_v47, %v915_v22 }
 0x23d   : > { %v5448_v42 = vpack.c.bf16 %v985_v48, %v984_v15  ;;  %v5449_v26 = vpack.c.bf16 %v987_v53, %v986_v14 }
 0x23e   : > { %v5450_v6 = vpack.c.bf16 %v989_v25, %v988_v45 }
 0x23f   : > { %1143 = vst [vmem:[#allocation2 + $0x58] sm:$0xff] %v5448_v42  ;;  %1144 = vst [vmem:[#allocation2 + $0x20] sm:$0xff] %v5449_v26 }
 0x240   : > { %1145 = vst [vmem:[#allocation2 + $0x48] sm:$0xff] %v5450_v6 }
 0x241 PF: > { %v5588_v13 = vld [vmem:[%s6826_s16 + $0xe4] ss:$16 sps:$4 sm:$0xff]   ;;  %v5592_v24 = vld [vmem:[%s6826_s16 + $0xe0] ss:$16 sps:$4 sm:$0xff]   ;;  %s6567_s10 = smov [#allocation15]   ;;  %p5525_p9 = scmp.eq.s32.totalorder %s6634_s9, 5 }
 0x242   : > { %v5590_v28 = vld [vmem:[%s6826_s16 + $0x2e4] ss:$16 sps:$4 sm:$0xff]   ;;  %2542 = vmatprep.subr.bf16.mxu0 %v5588_v13  ;;  %v5593_v51 = vld [vmem:[%s6826_s16 + $0x2e0] ss:$16 sps:$4 sm:$0xff]   ;;  %s4834_s17 = sshll.u32 %s6567_s10, 4  ;;  %s4835_s17 = int_to_ptr.vmem [resolvable:$true] %s4834_s17 }
 0x243   : > { %2613 = vmatprep.subr.bf16.mxu1 %v5590_v28  ;;  %v5594_v62 = vld [vmem:[%s6826_s16 + $0xc4] ss:$16 sps:$4 sm:$0xff]   ;;  %2543 = vmatpush1.bf16.msra.mxu0 %v5592_v24  ;;  %v5598_v47 = vld [vmem:[%s6826_s16 + $0xc0] ss:$16 sps:$4 sm:$0xff]   ;;  %s6472_s13 = scalar_lea.vmem %s4835_s17, 5376  ;;  %p6479_p11 = scmp.lt.s32.totalorder %s4835_s17, %s4835_s17 }
 0x244   : > { %2614 = vmatpush1.bf16.msra.mxu1 %v5593_v51  ;;  %v5596_v63 = vld [vmem:[%s6826_s16 + $0x2c4] ss:$16 sps:$4 sm:$0xff]   ;;  %2544 = vmatprep.subr.bf16.mxu0 %v5594_v62  ;;  %v5599_v44 = vld [vmem:[%s6826_s16 + $0x2c0] ss:$16 sps:$4 sm:$0xff]   ;;  %v5695_v51 = vld [vmem:[%s6826_s16 + $0xec] ss:$16 sps:$4 sm:$0xff]   ;;  %p6473_p2 = scmp.ne.s32.totalorder %s4835_s17, %s6472_s13  ;;  %p6480_p13 = scmp.lt.s32.totalorder %s6472_s13, %s6472_s13 }
 0x245   : > { %2615 = vmatprep.subr.bf16.mxu1 %v5596_v63  ;;  %v5600_v12 = vld [vmem:[%s6826_s16 + $0xa4] ss:$16 sps:$4 sm:$0xff]   ;;  %v5604_v34 = vld [vmem:[%s6826_s16 + $0xa0] ss:$16 sps:$4 sm:$0xff]  }
 0x246   : > { %v5602_v41 = vld [vmem:[%s6826_s16 + $0x2a4] ss:$16 sps:$4 sm:$0xff]   ;;  %v5605_v58 = vld [vmem:[%s6826_s16 + $0x2a0] ss:$16 sps:$4 sm:$0xff]   ;;  %p6474_p6 = pnand %p6473_p2, %p5525_p9  ;;  %p6481_p1 = por %p6480_p13, %p6479_p11 }
 0x247   : > { %2545 = vmatpush1.bf16.msra.mxu0 %v5598_v47  ;;  %v5606_v39 = vld [vmem:[%s6826_s16 + $0x84] ss:$16 sps:$4 sm:$0xff]   ;;  %v5610_v33 = vld [vmem:[%s6826_s16 + $0x80] ss:$16 sps:$4 sm:$0xff]  }
 0x248   : > { %2616 = vmatpush1.bf16.msra.mxu1 %v5599_v44  ;;  %2546 = vmatprep.subr.bf16.mxu0 %v5600_v12  ;;  %v5608_v1 = vld [vmem:[%s6826_s16 + $0x284] ss:$16 sps:$4 sm:$0xff]   ;;  %v5611_v49 = vld [vmem:[%s6826_s16 + $0x280] ss:$16 sps:$4 sm:$0xff]   ;;  %v5693_v44 = vld [vmem:[%s6826_s16 + $0xe8] ss:$16 sps:$4 sm:$0xff]   ;;  %p6475_p7 = pneg %p6474_p6 }
 0x249   : > { %2617 = vmatprep.subr.bf16.mxu1 %v5602_v41  ;;  %v5612_v4 = vld [vmem:[%s6826_s16 + $0x64] ss:$16 sps:$4 sm:$0xff]   ;;  %v5616_v29 = vld [vmem:[%s6826_s16 + $0x60] ss:$16 sps:$4 sm:$0xff]   ;;  %v5701_v41 = vld [vmem:[%s6826_s16 + $0xcc] ss:$16 sps:$4 sm:$0xff]  }
 0x24a   : > { %v5614_v23 = vld [vmem:[%s6826_s16 + $0x264] ss:$16 sps:$4 sm:$0xff]   ;;  %v5617_v52 = vld [vmem:[%s6826_s16 + $0x260] ss:$16 sps:$4 sm:$0xff]   ;;  %p6482_p4 = pnand %p6481_p1, %p6475_p7 }
 0x24b   : > { %2547 = vmatpush1.bf16.msra.mxu0 %v5604_v34  ;;  %v5618_v56 = vld [vmem:[%s6826_s16 + $0x44] ss:$16 sps:$4 sm:$0xff]   ;;  %v5622_v54 = vld [vmem:[%s6826_s16 + $0x40] ss:$16 sps:$4 sm:$0xff]  }
 0x24c   : > { %2618 = vmatpush1.bf16.msra.mxu1 %v5605_v58  ;;  %2548 = vmatprep.subr.bf16.mxu0 %v5606_v39  ;;  %v5620_v17 = vld [vmem:[%s6826_s16 + $0x244] ss:$16 sps:$4 sm:$0xff]   ;;  %v5623_v55 = vld [vmem:[%s6826_s16 + $0x240] ss:$16 sps:$4 sm:$0xff]   ;;  %v5699_v58 = vld [vmem:[%s6826_s16 + $0xc8] ss:$16 sps:$4 sm:$0xff]  }
 0x24d   : > { %2619 = vmatprep.subr.bf16.mxu1 %v5608_v1  ;;  %v5624_v57 = vld [vmem:[%s6826_s16 + $0x24] ss:$16 sps:$4 sm:$0xff]   ;;  %v5628_v46 = vld [vmem:[%s6826_s16 + $0x20] ss:$16 sps:$4 sm:$0xff]   ;;  %v5707_v1 = vld [vmem:[%s6826_s16 + $0xac] ss:$16 sps:$4 sm:$0xff]  }
 0x24e   : > { %v5626_v9 = vld [vmem:[%s6826_s16 + $0x224] ss:$16 sps:$4 sm:$0xff]   ;;  %v5629_v59 = vld [vmem:[%s6826_s16 + $0x220] ss:$16 sps:$4 sm:$0xff]  }
 0x24f   : > { %2549 = vmatpush1.bf16.msra.mxu0 %v5610_v33  ;;  %v5630_v8 = vld [vmem:[%s6826_s16 + $0x4] ss:$16 sps:$4 sm:$0xff]   ;;  %v5634_v3 = vld [vmem:[%s6826_s16] ss:$16 sps:$4 sm:$0xff]  }
 0x250   : > { %2620 = vmatpush1.bf16.msra.mxu1 %v5611_v49  ;;  %2550 = vmatprep.subr.bf16.mxu0 %v5612_v4  ;;  %v5632_v11 = vld [vmem:[%s6826_s16 + $0x204] ss:$16 sps:$4 sm:$0xff]   ;;  %v5635_v60 = vld [vmem:[%s6826_s16 + $0x200] ss:$16 sps:$4 sm:$0xff]   ;;  %v7472_v49 = vld [vmem:[#allocation2 + $0x7c] ss:$16 sps:$4 sm:$0xff]  }
 0x251   : > { %2621 = vmatprep.subr.bf16.mxu1 %v5614_v23  ;;  %v5636_v5 = vld [vmem:[%s6826_s16 + $0x1e4] ss:$16 sps:$4 sm:$0xff]   ;;  %v5640_v43 = vld [vmem:[%s6826_s16 + $0x1e0] ss:$16 sps:$4 sm:$0xff]  }
 0x252   : > { %v5638_v10 = vld [vmem:[%s6826_s16 + $0x3e4] ss:$16 sps:$4 sm:$0xff]   ;;  %v5641_v0 = vld [vmem:[%s6826_s16 + $0x3e0] ss:$16 sps:$4 sm:$0xff]  }
 0x253   : > { %2551 = vmatpush1.bf16.msra.mxu0 %v5616_v29  ;;  %v5642_v35 = vld [vmem:[%s6826_s16 + $0x1c4] ss:$16 sps:$4 sm:$0xff]   ;;  %v5646_v37 = vld [vmem:[%s6826_s16 + $0x1c0] ss:$16 sps:$4 sm:$0xff]   ;;  %v5705_v29 = vld [vmem:[%s6826_s16 + $0xa8] ss:$16 sps:$4 sm:$0xff]  }
 0x254   : > { %2622 = vmatpush1.bf16.msra.mxu1 %v5617_v52  ;;  %2552 = vmatprep.subr.bf16.mxu0 %v5618_v56  ;;  %v5644_v50 = vld [vmem:[%s6826_s16 + $0x3c4] ss:$16 sps:$4 sm:$0xff]   ;;  %v5647_v18 = vld [vmem:[%s6826_s16 + $0x3c0] ss:$16 sps:$4 sm:$0xff]   ;;  %v5713_v56 = vld [vmem:[%s6826_s16 + $0x8c] ss:$16 sps:$4 sm:$0xff]  }
 0x255   : > { %2623 = vmatprep.subr.bf16.mxu1 %v5620_v17  ;;  %v5648_v36 = vld [vmem:[%s6826_s16 + $0x1a4] ss:$16 sps:$4 sm:$0xff]   ;;  %v5652_v38 = vld [vmem:[%s6826_s16 + $0x1a0] ss:$16 sps:$4 sm:$0xff]  }
 0x256   : > { %v5650_v32 = vld [vmem:[%s6826_s16 + $0x3a4] ss:$16 sps:$4 sm:$0xff]   ;;  %v5653_v7 = vld [vmem:[%s6826_s16 + $0x3a0] ss:$16 sps:$4 sm:$0xff]  }
 0x257   : > { %2553 = vmatpush1.bf16.msra.mxu0 %v5622_v54  ;;  %v5654_v61 = vld [vmem:[%s6826_s16 + $0x184] ss:$16 sps:$4 sm:$0xff]   ;;  %v5658_v2 = vld [vmem:[%s6826_s16 + $0x180] ss:$16 sps:$4 sm:$0xff]  }
 0x258   : > { %2624 = vmatpush1.bf16.msra.mxu1 %v5623_v55  ;;  %2554 = vmatprep.subr.bf16.mxu0 %v5624_v57  ;;  %v5656_v16 = vld [vmem:[%s6826_s16 + $0x384] ss:$16 sps:$4 sm:$0xff]   ;;  %v5659_v20 = vld [vmem:[%s6826_s16 + $0x380] ss:$16 sps:$4 sm:$0xff]   ;;  %v5711_v55 = vld [vmem:[%s6826_s16 + $0x88] ss:$16 sps:$4 sm:$0xff]  }
 0x259   : > { %2625 = vmatprep.subr.bf16.mxu1 %v5626_v9  ;;  %v5660_v40 = vld [vmem:[%s6826_s16 + $0x164] ss:$16 sps:$4 sm:$0xff]   ;;  %v7437_v31 = vld [vmem:[#allocation2 + $0x4] ss:$24 sps:$4 sm:$0xff]   ;;  %v5719_v9 = vld [vmem:[%s6826_s16 + $0x6c] ss:$16 sps:$4 sm:$0xff]  }
 0x25a   : > { %v5662_v27 = vld [vmem:[%s6826_s16 + $0x364] ss:$16 sps:$4 sm:$0xff]   ;;  %v7440_v21 = vld [vmem:[#allocation2 + $0x3c] ss:$-8 sps:$4 sm:$0xff]   ;;  %2574 = vmatprep.mubr.bf16.mxu0 %v7437_v31  ;;  %v5747_v23 = vld [vmem:[#allocation2 + $0x84] ss:$-88 sps:$4 sm:$0xff]  }
 0x25b   : > { %2555 = vmatpush1.bf16.msra.mxu0 %v5628_v46  ;;  %v5664_v19 = vld [vmem:[%s6826_s16 + $0x160] ss:$16 sps:$4 sm:$0xff]   ;;  %2645 = vmatprep.mubr.bf16.mxu1 %v7440_v21  ;;  %v5666_v22 = vld [vmem:[%s6826_s16 + $0x144] ss:$16 sps:$4 sm:$0xff]  }
 0x25c   : > { %2626 = vmatpush1.bf16.msra.mxu1 %v5629_v59  ;;  %2556 = vmatprep.subr.bf16.mxu0 %v5630_v8  ;;  %v5665_v30 = vld [vmem:[%s6826_s16 + $0x360] ss:$16 sps:$4 sm:$0xff]   ;;  %v5668_v15 = vld [vmem:[%s6826_s16 + $0x344] ss:$16 sps:$4 sm:$0xff]  }
 0x25d   : > { %2627 = vmatprep.subr.bf16.mxu1 %v5632_v11  ;;  %v5670_v48 = vld [vmem:[%s6826_s16 + $0x140] ss:$16 sps:$4 sm:$0xff]   ;;  %v5672_v53 = vld [vmem:[%s6826_s16 + $0x124] ss:$16 sps:$4 sm:$0xff]  }
 0x25e   : > { %v5671_v14 = vld [vmem:[%s6826_s16 + $0x340] ss:$16 sps:$4 sm:$0xff]   ;;  %v5674_v45 = vld [vmem:[%s6826_s16 + $0x324] ss:$16 sps:$4 sm:$0xff]  }
 0x25f   : > { %2557 = vmatpush1.bf16.msra.mxu0 %v5634_v3  ;;  %v5676_v25 = vld [vmem:[%s6826_s16 + $0x120] ss:$16 sps:$4 sm:$0xff]   ;;  %v5678_v26 = vld [vmem:[%s6826_s16 + $0x104] ss:$16 sps:$4 sm:$0xff]   ;;  %v5717_v3 = vld [vmem:[%s6826_s16 + $0x68] ss:$16 sps:$4 sm:$0xff]  }
 0x260   : > { %2628 = vmatpush1.bf16.msra.mxu1 %v5635_v60  ;;  %2558 = vmatprep.subr.bf16.mxu0 %v5636_v5  ;;  %v5677_v42 = vld [vmem:[%s6826_s16 + $0x320] ss:$16 sps:$4 sm:$0xff]   ;;  %v5680_v6 = vld [vmem:[%s6826_s16 + $0x304] ss:$16 sps:$4 sm:$0xff]   ;;  %v5725_v5 = vld [vmem:[%s6826_s16 + $0x4c] ss:$16 sps:$4 sm:$0xff]  }
 0x261   : > { %2629 = vmatprep.subr.bf16.mxu1 %v5638_v10  ;;  %v5682_v13 = vld [vmem:[%s6826_s16 + $0x100] ss:$16 sps:$4 sm:$0xff]   ;;  %v5692_v24 = vld [vmem:[%s6826_s16 + $0x4e4] ss:$16 sps:$4 sm:$0xff]   ;;  %v5773_v10 = vld [vmem:[#allocation2 + $0x90] ss:$-112 sps:$4 sm:$0xff]  }
 0x262   : > { %v5683_v28 = vld [vmem:[%s6826_s16 + $0x300] ss:$16 sps:$4 sm:$0xff]   ;;  %v7460_v62 = vld [vmem:[#allocation2] ss:$24 sps:$4 sm:$0xff]  }
 0x263   : > { %2559 = vmatpush2.bf16.msra.mxu0 %v5640_v43  ;;  %v5687_v63 = vld [vmem:[#allocation2 + $0x38] ss:$-8 sps:$4 sm:$0xff]   ;;  %v5690_v47 = vld [vmem:[%s6826_s16 + $0x4e0] ss:$16 sps:$4 sm:$0xff]   ;;  %v5755_v17 = vld [vmem:[#allocation2 + $0x80] ss:$-88 sps:$4 sm:$0xff]  }
 0x264   : > { %2630 = vmatpush2.bf16.msra.mxu1 %v5641_v0  ;;  %2560 = vmatprep.subr.bf16.mxu0 %v5642_v35  ;;  %v5698_v12 = vld [vmem:[%s6826_s16 + $0x4c4] ss:$16 sps:$4 sm:$0xff]   ;;  %v5696_v34 = vld [vmem:[%s6826_s16 + $0x4c0] ss:$16 sps:$4 sm:$0xff]   ;;  %v5723_v0 = vld [vmem:[%s6826_s16 + $0x48] ss:$16 sps:$4 sm:$0xff]  }
 0x265   : > { %2631 = vmatprep.subr.bf16.mxu1 %v5644_v50  ;;  %v5704_v39 = vld [vmem:[%s6826_s16 + $0x4a4] ss:$16 sps:$4 sm:$0xff]   ;;  %v5702_v33 = vld [vmem:[%s6826_s16 + $0x4a0] ss:$16 sps:$4 sm:$0xff]   ;;  %v5731_v50 = vld [vmem:[%s6826_s16 + $0x2c] ss:$16 sps:$4 sm:$0xff]  }
 0x266   : > { %v7474_v4 = vld [vmem:[#allocation2 + $0x78] ss:$16 sps:$4 sm:$0xff]   ;;  %v5708_v54 = vld [vmem:[%s6826_s16 + $0x480] ss:$16 sps:$4 sm:$0xff]  }
 0x267   : > { %2561 = vmatpush2.bf16.msra.mxu0 %v5646_v37  ;;  %v5710_v52 = vld [vmem:[%s6826_s16 + $0x484] ss:$16 sps:$4 sm:$0xff]   ;;  %v5714_v46 = vld [vmem:[%s6826_s16 + $0x460] ss:$16 sps:$4 sm:$0xff]  }
 0x268   : > { %2632 = vmatpush2.bf16.msra.mxu1 %v5647_v18  ;;  %2562 = vmatprep.subr.bf16.mxu0 %v5648_v36  ;;  %v5716_v57 = vld [vmem:[%s6826_s16 + $0x464] ss:$16 sps:$4 sm:$0xff]   ;;  %v7486_v59 = vld [vmem:[#allocation2 + $0x64] ss:$-8 sps:$4 sm:$0xff]   ;;  %v1254_v37 = vld [vmem:[#allocation2 + $0x70] sm:$0x11] }
 0x269   : > { %2633 = vmatprep.subr.bf16.mxu1 %v5650_v32  ;;  %v7488_v8 = vld [vmem:[#allocation2 + $0x60] ss:$-8 sps:$4 sm:$0xff]   ;;  %v5765_v11 = vld [vmem:[#allocation2 + $0x94] ss:$-112 sps:$4 sm:$0xff]   ;;  %v7499_v36 = vcombine.high %v1254_v37, %v1254_v37 }
 0x26a   : > { %v5722_v60 = vld [vmem:[%s6826_s16 + $0x444] ss:$16 sps:$4 sm:$0xff]   ;;  %v5720_v43 = vld [vmem:[%s6826_s16 + $0x440] ss:$16 sps:$4 sm:$0xff]  }
 0x26b   : > { %2563 = vmatpush2.bf16.msra.mxu0 %v5652_v38  ;;  %v5728_v35 = vld [vmem:[%s6826_s16 + $0x424] ss:$16 sps:$4 sm:$0xff]   ;;  %v1255_v18 = vld [vmem:[#allocation2 + $0x10] sm:$0x11]  ;;  %v7503_v38 = vcombine.low %v1254_v37, %v1254_v37  ;;  %v5823_v37 = vld [vmem:[%s6826_s16 + $0x4a8] ss:$16 sps:$4 sm:$0xff]  }
 0x26c   : > { %2634 = vmatpush2.bf16.msra.mxu1 %v5653_v7  ;;  %2564 = vmatprep.subr.bf16.mxu0 %v5654_v61  ;;  %v7501_v32 = vcombine.high %v1255_v18, %v1255_v18  ;;  %v5726_v7 = vld [vmem:[%s6826_s16 + $0x420] ss:$16 sps:$4 sm:$0xff]   ;;  %v5729_v61 = vld [vmem:[%s6826_s16 + $0x28] ss:$16 sps:$4 sm:$0xff]  }
 0x26d   : > { %2635 = vmatprep.subr.bf16.mxu1 %v5656_v16  ;;  %v5734_v16 = vld [vmem:[%s6826_s16 + $0x404] ss:$16 sps:$4 sm:$0xff]  }
 0x26f   : > { %2565 = vmatpush2.bf16.msra.mxu0 %v5658_v2  ;;  %v5737_v2 = vld [vmem:[%s6826_s16 + $0xc] ss:$16 sps:$4 sm:$0xff]  }
 0x270   : > { %2636 = vmatpush2.bf16.msra.mxu1 %v5659_v20  ;;  %2566 = vmatprep.subr.bf16.mxu0 %v5660_v40  ;;  %v7511_v20 = vcombine.low %v1255_v18, %v1255_v18  ;;  %v5732_v40 = vld [vmem:[%s6826_s16 + $0x400] ss:$16 sps:$4 sm:$0xff]   ;;  %v5828_v18 = vld [vmem:[%s6826_s16 + $0x28c] ss:$16 sps:$4 sm:$0xff]  }
 0x271   : > { %2637 = vmatprep.subr.bf16.mxu1 %v5662_v27  ;;  %v5735_v27 = vld [vmem:[%s6826_s16 + $0x8] ss:$16 sps:$4 sm:$0xff]  }
 0x273   : > { %2567 = vmatpush2.bf16.msra.mxu0 %v5664_v19  ;;  %v5740_v19 = vld [vmem:[%s6826_s16 + $0x5e4] ss:$16 sps:$4 sm:$0xff]  }
 0x274   : > { %2638 = vmatpush2.bf16.msra.mxu1 %v5665_v30  ;;  %2568 = vmatprep.subr.bf16.mxu0 %v5666_v22  ;;  %v5743_v30 = vld [vmem:[%s6826_s16 + $0x1ec] ss:$16 sps:$4 sm:$0xff]   ;;  %v7519_v22 = vld [vmem:[#allocation2 + $0x54] ss:$24 sps:$4 sm:$0xff]  }
 0x275   : > { %2639 = vmatprep.subr.bf16.mxu1 %v5668_v15  ;;  %v5738_v15 = vld [vmem:[%s6826_s16 + $0x5e0] ss:$16 sps:$4 sm:$0xff]  }
 0x277   : > { %2569 = vmatpush2.bf16.msra.mxu0 %v5670_v48  ;;  %v5741_v48 = vld [vmem:[%s6826_s16 + $0x1e8] ss:$16 sps:$4 sm:$0xff]  }
 0x278   : > { %2640 = vmatpush2.bf16.msra.mxu1 %v5671_v14  ;;  %2570 = vmatprep.subr.bf16.mxu0 %v5672_v53  ;;  %v5751_v14 = vld [vmem:[%s6826_s16 + $0x5c4] ss:$16 sps:$4 sm:$0xff]   ;;  %v5754_v53 = vld [vmem:[%s6826_s16 + $0x1cc] ss:$16 sps:$4 sm:$0xff]  }
 0x279   : > { %2641 = vmatprep.subr.bf16.mxu1 %v5674_v45  ;;  %v5749_v45 = vld [vmem:[%s6826_s16 + $0x5c0] ss:$16 sps:$4 sm:$0xff]  }
 0x27b   : > { %2571 = vmatpush2.bf16.msra.mxu0 %v5676_v25  ;;  %v5758_v25 = vld [vmem:[%s6826_s16 + $0x5a4] ss:$16 sps:$4 sm:$0xff]  }
 0x27c   : > { %2642 = vmatpush2.bf16.msra.mxu1 %v5677_v42  ;;  %2572 = vmatprep.subr.bf16.mxu0 %v5678_v26  ;;  %v5761_v42 = vld [vmem:[%s6826_s16 + $0x1ac] ss:$16 sps:$4 sm:$0xff]   ;;  %v5756_v26 = vld [vmem:[%s6826_s16 + $0x5a0] ss:$16 sps:$4 sm:$0xff]  }
 0x27d   : > { %2643 = vmatprep.subr.bf16.mxu1 %v5680_v6  ;;  %v5759_v6 = vld [vmem:[%s6826_s16 + $0x1a8] ss:$16 sps:$4 sm:$0xff]  }
 0x27f   : > { %2573 = vmatpush2.bf16.msra.mxu0 %v5682_v13  ;;  %v5769_v13 = vld [vmem:[%s6826_s16 + $0x584] ss:$16 sps:$4 sm:$0xff]  }
 0x280   : > { %2644 = vmatpush2.bf16.msra.mxu1 %v5683_v28  ;;  %2684 = vmatprep.subr.bf16.mxu0 %v5692_v24  ;;  %v5772_v28 = vld [vmem:[%s6826_s16 + $0x18c] ss:$16 sps:$4 sm:$0xff]   ;;  %v5767_v24 = vld [vmem:[%s6826_s16 + $0x580] ss:$16 sps:$4 sm:$0xff]  }
 0x281   : > { %2755 = vmatprep.subr.bf16.mxu1 %v5695_v51  ;;  %v5770_v51 = vld [vmem:[%s6826_s16 + $0x188] ss:$16 sps:$4 sm:$0xff]  }
 0x282   : > { %2575 = vmatmul.mubr.bf16.vlgmr.msra.gmra.mxu0 %v7460_v62 }
 0x283   : > { %2646 = vmatmul.mubr.bf16.vlgmr.msra.gmra.mxu1 %v5687_v63  ;;  %2685 = vmatpush1.bf16.msra.mxu0 %v5690_v47  ;;  %v5776_v63 = vld [vmem:[%s6826_s16 + $0x564] ss:$16 sps:$4 sm:$0xff]   ;;  %v5779_v47 = vld [vmem:[%s6826_s16 + $0x16c] ss:$16 sps:$4 sm:$0xff]  }
 0x284   : > { %2756 = vmatpush1.bf16.msra.mxu1 %v5693_v44  ;;  %2686 = vmatprep.subr.bf16.mxu0 %v5698_v12  ;;  %v5774_v44 = vld [vmem:[%s6826_s16 + $0x560] ss:$16 sps:$4 sm:$0xff]   ;;  %v5777_v12 = vld [vmem:[%s6826_s16 + $0x168] ss:$16 sps:$4 sm:$0xff]  }
 0x285   : > { %2757 = vmatprep.subr.bf16.mxu1 %v5701_v41  ;;  %2584 = vmatprep.mubr.bf16.mxu0 %v7472_v49  ;;  %v5785_v41 = vld [vmem:[%s6826_s16 + $0x544] ss:$16 sps:$4 sm:$0xff]  }
 0x286   : > { %2655 = vmatprep.mubr.bf16.mxu1 %v5747_v23  ;;  %v5790_v23 = vld [vmem:[%s6826_s16 + $0x520] ss:$16 sps:$4 sm:$0xff]  }
 0x287   : > { %2687 = vmatpush1.bf16.msra.mxu0 %v5696_v34  ;;  %v5788_v34 = vld [vmem:[%s6826_s16 + $0x14c] ss:$16 sps:$4 sm:$0xff]  }
 0x288   : > { %2758 = vmatpush1.bf16.msra.mxu1 %v5699_v58  ;;  %2688 = vmatprep.subr.bf16.mxu0 %v5704_v39  ;;  %v5783_v58 = vld [vmem:[%s6826_s16 + $0x540] ss:$16 sps:$4 sm:$0xff]   ;;  %v5786_v39 = vld [vmem:[%s6826_s16 + $0x148] ss:$16 sps:$4 sm:$0xff]  }
 0x289   : > { %2759 = vmatprep.subr.bf16.mxu1 %v5707_v1  ;;  %v5792_v1 = vld [vmem:[%s6826_s16 + $0x524] ss:$16 sps:$4 sm:$0xff]  }
 0x28a   : > { %2585 = vmatmul.mubr.bf16.gmra.mxu0 %v7474_v4 }
 0x28b   : > { %2689 = vmatpush1.bf16.msra.mxu0 %v5702_v33  ;;  %2656 = vmatmul.mubr.bf16.gmra.mxu1 %v5755_v17  ;;  %v5795_v33 = vld [vmem:[%s6826_s16 + $0x12c] ss:$16 sps:$4 sm:$0xff]   ;;  %v5796_v17 = vld [vmem:[%s6826_s16 + $0x500] ss:$16 sps:$4 sm:$0xff]  }
 0x28c   : > { %2760 = vmatpush1.bf16.msra.mxu1 %v5705_v29  ;;  %2690 = vmatprep.subr.bf16.mxu0 %v5710_v52  ;;  %v5793_v29 = vld [vmem:[%s6826_s16 + $0x128] ss:$16 sps:$4 sm:$0xff]   ;;  %v5798_v52 = vld [vmem:[%s6826_s16 + $0x504] ss:$16 sps:$4 sm:$0xff]  }
 0x28d   : > { %2761 = vmatprep.subr.bf16.mxu1 %v5713_v56  ;;  %2594 = vmatprep.mubr.bf16.mxu0 %v7486_v59  ;;  %v5801_v56 = vld [vmem:[%s6826_s16 + $0x10c] ss:$16 sps:$4 sm:$0xff]  }
 0x28e   : > { %2665 = vmatprep.mubr.bf16.mxu1 %v5765_v11  ;;  %v5808_v11 = vld [vmem:[%s6826_s16 + $0x4e8] ss:$16 sps:$4 sm:$0xff]  }
 0x28f   : > { %2691 = vmatpush1.bf16.msra.mxu0 %v5708_v54  ;;  %v5799_v54 = vld [vmem:[%s6826_s16 + $0x108] ss:$16 sps:$4 sm:$0xff]  }
 0x290   : > { %2762 = vmatpush1.bf16.msra.mxu1 %v5711_v55  ;;  %2692 = vmatprep.subr.bf16.mxu0 %v5716_v57  ;;  %v5807_v55 = vld [vmem:[%s6826_s16 + $0x2ec] ss:$16 sps:$4 sm:$0xff]  }
 0x291   : > { %2763 = vmatprep.subr.bf16.mxu1 %v5719_v9  ;;  %v5810_v57 = vld [vmem:[%s6826_s16 + $0x4ec] ss:$16 sps:$4 sm:$0xff]  }
 0x292   : > { %2595 = vmatmul.mubr.bf16.gmra.mxu0 %v7488_v8  ;;  %v7555_v9 = vld [vmem:[#allocation2 + $0x50] ss:$24 sps:$4 sm:$0xff]  }
 0x293   : > { %2693 = vmatpush1.bf16.msra.mxu0 %v5714_v46  ;;  %2666 = vmatmul.mubr.bf16.gmra.mxu1 %v5773_v10  ;;  %v5805_v46 = vld [vmem:[%s6826_s16 + $0x2e8] ss:$16 sps:$4 sm:$0xff]  }
 0x294   : > { %2764 = vmatpush1.bf16.msra.mxu1 %v5717_v3  ;;  %2694 = vmatprep.subr.bf16.mxu0 %v5722_v60  ;;  %v5813_v3 = vld [vmem:[%s6826_s16 + $0x2cc] ss:$16 sps:$4 sm:$0xff]   ;;  %v5811_v10 = vld [vmem:[%s6826_s16 + $0x2c8] ss:$16 sps:$4 sm:$0xff]  }
 0x295   : > { %2765 = vmatprep.subr.bf16.mxu1 %v5725_v5  ;;  %2604 = vmatprep.mubr.bf16.mxu0 %v7499_v36  ;;  %v5816_v60 = vld [vmem:[%s6826_s16 + $0x4cc] ss:$16 sps:$4 sm:$0xff]   ;;  %v7561_v5 = vld [vmem:[#allocation2 + $0xc] ss:$56 sps:$4 sm:$0xff]  }
 0x296   : > { %2675 = vmatprep.mubr.bf16.mxu1 %v7501_v32 }
 0x297   : > { %2695 = vmatpush1.bf16.msra.mxu0 %v5720_v43  ;;  %v5814_v43 = vld [vmem:[%s6826_s16 + $0x4c8] ss:$16 sps:$4 sm:$0xff]  }
 0x298   : > { %2766 = vmatpush1.bf16.msra.mxu1 %v5723_v0  ;;  %2696 = vmatprep.subr.bf16.mxu0 %v5728_v35  ;;  %v5822_v0 = vld [vmem:[%s6826_s16 + $0x2ac] ss:$16 sps:$4 sm:$0xff]  }
 0x299   : > { %2767 = vmatprep.subr.bf16.mxu1 %v5731_v50  ;;  %v5825_v35 = vld [vmem:[%s6826_s16 + $0x4ac] ss:$16 sps:$4 sm:$0xff]  }
 0x29a   : > { %2605 = vmatmul.mubr.bf16.gmra.mxu0 %v7503_v38  ;;  %v7571_v50 = vld [vmem:[#allocation2 + $0x8] ss:$56 sps:$4 sm:$0xff]  }
 0x29b   : > { %2697 = vmatpush1.bf16.msra.mxu0 %v5726_v7  ;;  %2676 = vmatmul.mubr.bf16.gmra.mxu1 %v7511_v20  ;;  %v5831_v7 = vld [vmem:[%s6826_s16 + $0x48c] ss:$16 sps:$4 sm:$0xff]  }
 0x29c   : > { %2768 = vmatpush1.bf16.msra.mxu1 %v5729_v61  ;;  %2698 = vmatprep.subr.bf16.mxu0 %v5734_v16  ;;  %v7577_v61 = vld [vmem:[#allocation2 + $0x9c] ss:$-80 sps:$4 sm:$0xff]  }
 0x29d   : > { %2769 = vmatprep.subr.bf16.mxu1 %v5737_v2  ;;  %2787 = vmatprep.mubr.bf16.mxu1 %v7437_v31  ;;  %v5752_v31 = vld [vmem:[%s6826_s16 + $0x1c8] ss:$16 sps:$4 sm:$0xff]   ;;  %v5837_v2 = vld [vmem:[%s6826_s16 + $0x26c] ss:$16 sps:$4 sm:$0xff]  }
 0x29e   : > { %2716 = vmatprep.mubr.bf16.mxu0 %v7519_v22  ;;  %v5829_v16 = vld [vmem:[%s6826_s16 + $0x488] ss:$16 sps:$4 sm:$0xff]  }
 0x29f   : > { %2699 = vmatpush1.bf16.msra.mxu0 %v5732_v40  ;;  %v5840_v40 = vld [vmem:[%s6826_s16 + $0x46c] ss:$16 sps:$4 sm:$0xff]  }
 0x2a0   : > { %2770 = vmatpush1.bf16.msra.mxu1 %v5735_v27  ;;  %2700 = vmatprep.subr.bf16.mxu0 %v5740_v19  ;;  %v7586_v27 = vld [vmem:[#allocation2 + $0x98] ss:$-80 sps:$4 sm:$0xff]   ;;  %v5835_v19 = vld [vmem:[%s6826_s16 + $0x268] ss:$16 sps:$4 sm:$0xff]  }
 0x2a1   : > { %2771 = vmatprep.subr.bf16.mxu1 %v5743_v30  ;;  %v5838_v30 = vld [vmem:[%s6826_s16 + $0x468] ss:$16 sps:$4 sm:$0xff]  }
 0x2a3   : > { %2701 = vmatpush2.bf16.msra.mxu0 %v5738_v15  ;;  %v5843_v15 = vld [vmem:[%s6826_s16 + $0x24c] ss:$16 sps:$4 sm:$0xff]  }
 0x2a4   : > { %2772 = vmatpush2.bf16.msra.mxu1 %v5741_v48  ;;  %2702 = vmatprep.subr.bf16.mxu0 %v5751_v14  ;;  %v5846_v48 = vld [vmem:[%s6826_s16 + $0x44c] ss:$16 sps:$4 sm:$0xff]   ;;  %v5841_v14 = vld [vmem:[%s6826_s16 + $0x248] ss:$16 sps:$4 sm:$0xff]  }
 0x2a5   : > { %2773 = vmatprep.subr.bf16.mxu1 %v5754_v53  ;;  %v5844_v53 = vld [vmem:[%s6826_s16 + $0x448] ss:$16 sps:$4 sm:$0xff]  }
 0x2a7   : > { %2703 = vmatpush2.bf16.msra.mxu0 %v5749_v45 }
 0x2a8   : > { %2774 = vmatpush2.bf16.msra.mxu1 %v5752_v31  ;;  %2704 = vmatprep.subr.bf16.mxu0 %v5758_v25  ;;  %v5854_v31 = vld [vmem:[%s6826_s16 + $0x42c] ss:$16 sps:$4 sm:$0xff]   ;;  %v5849_v25 = vld [vmem:[%s6826_s16 + $0x228] ss:$16 sps:$4 sm:$0xff]  }
 0x2a9   : > { %2775 = vmatprep.subr.bf16.mxu1 %v5761_v42  ;;  %v5852_v42 = vld [vmem:[%s6826_s16 + $0x428] ss:$16 sps:$4 sm:$0xff]  }
 0x2ab   : > { %2705 = vmatpush2.bf16.msra.mxu0 %v5756_v26 }
 0x2ac   : > { %2776 = vmatpush2.bf16.msra.mxu1 %v5759_v6  ;;  %2706 = vmatprep.subr.bf16.mxu0 %v5769_v13  ;;  %v5860_v6 = vld [vmem:[%s6826_s16 + $0x40c] ss:$16 sps:$4 sm:$0xff]   ;;  %v5855_v13 = vld [vmem:[%s6826_s16 + $0x208] ss:$16 sps:$4 sm:$0xff]  }
 0x2ad   : > { %2777 = vmatprep.subr.bf16.mxu1 %v5772_v28  ;;  %v5858_v28 = vld [vmem:[%s6826_s16 + $0x408] ss:$16 sps:$4 sm:$0xff]  }
 0x2af   : > { %2707 = vmatpush2.bf16.msra.mxu0 %v5767_v24  ;;  %v5866_v24 = vld [vmem:[%s6826_s16 + $0x5ec] ss:$16 sps:$4 sm:$0xff]  }
 0x2b0   : > { %2778 = vmatpush2.bf16.msra.mxu1 %v5770_v51  ;;  %2708 = vmatprep.subr.bf16.mxu0 %v5776_v63  ;;  %v5861_v51 = vld [vmem:[%s6826_s16 + $0x3e8] ss:$16 sps:$4 sm:$0xff]  }
 0x2b1   : > { %2779 = vmatprep.subr.bf16.mxu1 %v5779_v47  ;;  %v5864_v63 = vld [vmem:[%s6826_s16 + $0x5e8] ss:$16 sps:$4 sm:$0xff]   ;;  %v5872_v47 = vld [vmem:[%s6826_s16 + $0x5cc] ss:$16 sps:$4 sm:$0xff]  }
 0x2b3   : > { %2709 = vmatpush2.bf16.msra.mxu0 %v5774_v44  ;;  %v5867_v44 = vld [vmem:[%s6826_s16 + $0x3c8] ss:$16 sps:$4 sm:$0xff]  }
 0x2b4   : > { %2780 = vmatpush2.bf16.msra.mxu1 %v5777_v12  ;;  %2710 = vmatprep.subr.bf16.mxu0 %v5785_v41  ;;  %v5870_v12 = vld [vmem:[%s6826_s16 + $0x5c8] ss:$16 sps:$4 sm:$0xff]  }
 0x2b5   : > { %2781 = vmatprep.subr.bf16.mxu1 %v5788_v34  ;;  %v5873_v41 = vld [vmem:[%s6826_s16 + $0x3a8] ss:$16 sps:$4 sm:$0xff]  }
 0x2b6   : > { %v5876_v34 = vld [vmem:[%s6826_s16 + $0x5a8] ss:$16 sps:$4 sm:$0xff]  }
 0x2b7   : > { %2711 = vmatpush2.bf16.msra.mxu0 %v5783_v58  ;;  %v5881_v58 = vld [vmem:[%s6826_s16 + $0x38c] ss:$16 sps:$4 sm:$0xff]  }
 0x2b8   : > { %2782 = vmatpush2.bf16.msra.mxu1 %v5786_v39  ;;  %2712 = vmatprep.subr.bf16.mxu0 %v5792_v1  ;;  %v5884_v39 = vld [vmem:[%s6826_s16 + $0x58c] ss:$16 sps:$4 sm:$0xff]   ;;  %v5879_v1 = vld [vmem:[%s6826_s16 + $0x388] ss:$16 sps:$4 sm:$0xff]  }
 0x2b9   : > { %2783 = vmatprep.subr.bf16.mxu1 %v5795_v33  ;;  %v5882_v33 = vld [vmem:[%s6826_s16 + $0x588] ss:$16 sps:$4 sm:$0xff]  }
 0x2bb   : > { %2713 = vmatpush2.bf16.msra.mxu0 %v5790_v23  ;;  %v5887_v23 = vld [vmem:[%s6826_s16 + $0x36c] ss:$16 sps:$4 sm:$0xff]  }
 0x2bc   : > { %2784 = vmatpush2.bf16.msra.mxu1 %v5793_v29  ;;  %2714 = vmatprep.subr.bf16.mxu0 %v5798_v52  ;;  %v5890_v29 = vld [vmem:[%s6826_s16 + $0x56c] ss:$16 sps:$4 sm:$0xff]   ;;  %v5885_v52 = vld [vmem:[%s6826_s16 + $0x368] ss:$16 sps:$4 sm:$0xff]  }
 0x2bd   : > { %2785 = vmatprep.subr.bf16.mxu1 %v5801_v56  ;;  %v5888_v56 = vld [vmem:[%s6826_s16 + $0x568] ss:$16 sps:$4 sm:$0xff]  }
 0x2bf   : > { %2715 = vmatpush2.bf16.msra.mxu0 %v5796_v17  ;;  %v5893_v17 = vld [vmem:[%s6826_s16 + $0x34c] ss:$16 sps:$4 sm:$0xff]  }
 0x2c0   : > { %2786 = vmatpush2.bf16.msra.mxu1 %v5799_v54  ;;  %2826 = vmatprep.subr.bf16.mxu0 %v5807_v55  ;;  %v5896_v54 = vld [vmem:[%s6826_s16 + $0x54c] ss:$16 sps:$4 sm:$0xff]   ;;  %v5891_v55 = vld [vmem:[%s6826_s16 + $0x348] ss:$16 sps:$4 sm:$0xff]  }
 0x2c1   : > { %2897 = vmatprep.subr.bf16.mxu1 %v5810_v57  ;;  %v5894_v57 = vld [vmem:[%s6826_s16 + $0x548] ss:$16 sps:$4 sm:$0xff]  }
 0x2c2   : > { %2717 = vmatmul.mubr.bf16.vlgmr.msra.gmra.mxu0 %v7555_v9 }
 0x2c3   : > { %2788 = vmatmul.mubr.bf16.vlgmr.msra.gmra.mxu1 %v7460_v62  ;;  %2827 = vmatpush1.bf16.msra.mxu0 %v5805_v46  ;;  %v5820_v62 = vld [vmem:[%s6826_s16 + $0x2a8] ss:$16 sps:$4 sm:$0xff]   ;;  %v5899_v46 = vld [vmem:[%s6826_s16 + $0x32c] ss:$16 sps:$4 sm:$0xff]  }
 0x2c4   : > { %2898 = vmatpush1.bf16.msra.mxu1 %v5808_v11  ;;  %2828 = vmatprep.subr.bf16.mxu0 %v5813_v3  ;;  %v5902_v11 = vld [vmem:[%s6826_s16 + $0x52c] ss:$16 sps:$4 sm:$0xff]   ;;  %v5897_v3 = vld [vmem:[%s6826_s16 + $0x328] ss:$16 sps:$4 sm:$0xff]  }
 0x2c5   : > { %2899 = vmatprep.subr.bf16.mxu1 %v5816_v60  ;;  %2726 = vmatprep.mubr.bf16.mxu0 %v7561_v5  ;;  %v5900_v60 = vld [vmem:[%s6826_s16 + $0x528] ss:$16 sps:$4 sm:$0xff]  }
 0x2c6   : > { %2797 = vmatprep.mubr.bf16.mxu1 %v7472_v49  ;;  %v5826_v49 = vld [vmem:[%s6826_s16 + $0x288] ss:$16 sps:$4 sm:$0xff]  }
 0x2c7   : > { %2829 = vmatpush1.bf16.msra.mxu0 %v5811_v10  ;;  %v5905_v10 = vld [vmem:[%s6826_s16 + $0x30c] ss:$16 sps:$4 sm:$0xff]  }
 0x2c8   : > { %2900 = vmatpush1.bf16.msra.mxu1 %v5814_v43  ;;  %2830 = vmatprep.subr.bf16.mxu0 %v5822_v0  ;;  %v5908_v43 = vld [vmem:[%s6826_s16 + $0x50c] ss:$16 sps:$4 sm:$0xff]   ;;  %v5903_v0 = vld [vmem:[%s6826_s16 + $0x308] ss:$16 sps:$4 sm:$0xff]  }
 0x2c9   : > { %2901 = vmatprep.subr.bf16.mxu1 %v5825_v35  ;;  %v5906_v35 = vld [vmem:[%s6826_s16 + $0x508] ss:$16 sps:$4 sm:$0xff]  }
 0x2ca   : > { %2727 = vmatmul.mubr.bf16.gmra.mxu0 %v7571_v50 }
 0x2cb   : > { %2798 = vmatmul.mubr.bf16.gmra.mxu1 %v7474_v4  ;;  %2831 = vmatpush1.bf16.msra.mxu0 %v5820_v62  ;;  %v1256_v4 = vld [vmem:[#allocation2 + $0xa0] sm:$0x11]  ;;  %v5911_v62 = vld [vmem:[%s6835_s23 + $0x154] ss:$24 sps:$4 sm:$0xff]  }
 0x2cc   : > { %2902 = vmatpush1.bf16.msra.mxu1 %v5823_v37  ;;  %2832 = vmatprep.subr.bf16.mxu0 %v5828_v18  ;;  %v7595_v45 = vcombine.high %v1256_v4, %v1256_v4  ;;  %v7605_v26 = vcombine.low %v1256_v4, %v1256_v4  ;;  %v5909_v37 = vld [vmem:[%s6835_s23 + $0x150] ss:$24 sps:$4 sm:$0xff]   ;;  %v5914_v18 = vld [vmem:[%s6835_s23 + $0x124] ss:$24 sps:$4 sm:$0xff]   ;;  %v5923_v4 = vld [vmem:[%s6835_s23 + $0x94] ss:$24 sps:$4 sm:$0xff]  }
 0x2cd   : > { %2903 = vmatprep.subr.bf16.mxu1 %v5831_v7  ;;  %2736 = vmatprep.mubr.bf16.mxu0 %v7577_v61  ;;  %v6253_v7 = vld [vmem:[#allocation2 + $0x38] ss:$-8 sps:$4 sm:$0xff]  }
 0x2ce   : > { %2807 = vmatprep.mubr.bf16.mxu1 %v7486_v59  ;;  %v5851_v59 = vld [vmem:[%s6826_s16 + $0x22c] ss:$16 sps:$4 sm:$0xff]  }
 0x2cf   : > { %2833 = vmatpush1.bf16.msra.mxu0 %v5826_v49  ;;  %v6254_v49 = vld [vmem:[#allocation2 + $0x84] ss:$-88 sps:$4 sm:$0xff]  }
 0x2d0   : > { %2904 = vmatpush1.bf16.msra.mxu1 %v5829_v16  ;;  %2834 = vmatprep.subr.bf16.mxu0 %v5837_v2  ;;  %v5912_v16 = vld [vmem:[%s6835_s23 + $0x120] ss:$24 sps:$4 sm:$0xff]   ;;  %v5917_v2 = vld [vmem:[%s6835_s23 + $0xf4] ss:$24 sps:$4 sm:$0xff]  }
 0x2d1   : > { %2905 = vmatprep.subr.bf16.mxu1 %v5840_v40  ;;  %v5915_v40 = vld [vmem:[%s6835_s23 + $0xf0] ss:$24 sps:$4 sm:$0xff]  }
 0x2d2   : > { %2737 = vmatmul.mubr.bf16.gmra.mxu0 %v7586_v27 }
 0x2d3   : > { %2808 = vmatmul.mubr.bf16.gmra.mxu1 %v7488_v8  ;;  %2835 = vmatpush1.bf16.msra.mxu0 %v5835_v19  ;;  %v5857_v8 = vld [vmem:[%s6826_s16 + $0x20c] ss:$16 sps:$4 sm:$0xff]  }
 0x2d4   : > { %2906 = vmatpush1.bf16.msra.mxu1 %v5838_v30  ;;  %2836 = vmatprep.subr.bf16.mxu0 %v5843_v15  ;;  %v5920_v19 = vld [vmem:[%s6835_s23 + $0xc4] ss:$24 sps:$4 sm:$0xff]   ;;  %v5921_v15 = vld [vmem:[%s6835_s23 + $0x90] ss:$24 sps:$4 sm:$0xff]  }
 0x2d5   : > { %2907 = vmatprep.subr.bf16.mxu1 %v5846_v48  ;;  %2746 = vmatprep.mubr.bf16.mxu0 %v7595_v45  ;;  %v6255_v30 = vld [vmem:[#allocation2 + $0x80] ss:$-88 sps:$4 sm:$0xff]  }
 0x2d6   : > { %2817 = vmatprep.mubr.bf16.mxu1 %v7499_v36  ;;  %v5863_v36 = vld [vmem:[%s6826_s16 + $0x3ec] ss:$16 sps:$4 sm:$0xff]  }
 0x2d7   : > { %2837 = vmatpush1.bf16.msra.mxu0 %v5841_v14  ;;  %v5926_v48 = vld [vmem:[%s6835_s23 + $0x64] ss:$24 sps:$4 sm:$0xff]  }
 0x2d8   : > { %2908 = vmatpush1.bf16.msra.mxu1 %v5844_v53  ;;  %2838 = vmatprep.subr.bf16.mxu0 %v5851_v59  ;;  %v6257_v14 = vld [vmem:[#allocation2 + $0x90] ss:$-112 sps:$4 sm:$0xff]   ;;  %v5927_v53 = vld [vmem:[%s6835_s23 + $0x30] ss:$24 sps:$4 sm:$0xff]  }
 0x2d9   : > { %2909 = vmatprep.subr.bf16.mxu1 %v5854_v31  ;;  %v5932_v59 = vld [vmem:[%s6835_s23 + $0x4] ss:$24 sps:$4 sm:$0xff]  }
 0x2da   : > { %2747 = vmatmul.mubr.bf16.gmra.mxu0 %v7605_v26  ;;  %v5938_v31 = vld [vmem:[%s6835_s23 + $0x2a4] ss:$24 sps:$4 sm:$0xff]  }
 0x2db   : > { %2818 = vmatmul.mubr.bf16.gmra.mxu1 %v7503_v38  ;;  %2839 = vmatpush1.bf16.msra.mxu0 %v5849_v25  ;;  %v5869_v38 = vld [vmem:[%s6826_s16 + $0x3cc] ss:$16 sps:$4 sm:$0xff]  }
 0x2dc   : > { %2910 = vmatpush1.bf16.msra.mxu1 %v5852_v42  ;;  %2840 = vmatprep.subr.bf16.mxu0 %v5857_v8  ;;  %v5962_v25 = vld [vmem:[%s6835_s23 + $0x454] ss:$24 sps:$4 sm:$0xff]   ;;  %v5960_v42 = vld [vmem:[%s6835_s23 + $0x450] ss:$24 sps:$4 sm:$0xff]   ;;  %v5968_v8 = vld [vmem:[%s6835_s23 + $0x424] ss:$24 sps:$4 sm:$0xff]  }
 0x2dd   : > { %2911 = vmatprep.subr.bf16.mxu1 %v5860_v6  ;;  %2858 = vmatprep.mubr.bf16.mxu0 %v7440_v21  ;;  %v5875_v21 = vld [vmem:[%s6826_s16 + $0x3ac] ss:$16 sps:$4 sm:$0xff]   ;;  %v5966_v6 = vld [vmem:[%s6835_s23 + $0x420] ss:$24 sps:$4 sm:$0xff]  }
 0x2de   : > { %2929 = vmatprep.mubr.bf16.mxu1 %v7519_v22  ;;  %v5878_v22 = vld [vmem:[%s6826_s16 + $0x5ac] ss:$16 sps:$4 sm:$0xff]  }
 0x2df   : > { %2841 = vmatpush1.bf16.msra.mxu0 %v5855_v13  ;;  %v5939_v13 = vld [vmem:[%s6835_s23 + $0x270] ss:$24 sps:$4 sm:$0xff]  }
 0x2e0   : > { %2912 = vmatpush1.bf16.msra.mxu1 %v5858_v28  ;;  %2842 = vmatprep.subr.bf16.mxu0 %v5863_v36  ;;  %v5944_v28 = vld [vmem:[%s6835_s23 + $0x244] ss:$24 sps:$4 sm:$0xff]   ;;  %v5974_v36 = vld [vmem:[%s6835_s23 + $0x3f4] ss:$24 sps:$4 sm:$0xff]  }
 0x2e1   : > { %2913 = vmatprep.subr.bf16.mxu1 %v5866_v24  ;;  %v5972_v24 = vld [vmem:[%s6835_s23 + $0x3f0] ss:$24 sps:$4 sm:$0xff]  }
 0x2e3   : > { %2843 = vmatpush2.bf16.msra.mxu0 %v5861_v51  ;;  %v5942_v51 = vld [vmem:[%s6835_s23 + $0x240] ss:$24 sps:$4 sm:$0xff]  }
 0x2e4   : > { %2914 = vmatpush2.bf16.msra.mxu1 %v5864_v63  ;;  %2844 = vmatprep.subr.bf16.mxu0 %v5869_v38  ;;  %v5947_v63 = vld [vmem:[%s6835_s23 + $0x214] ss:$24 sps:$4 sm:$0xff]   ;;  %v5980_v38 = vld [vmem:[%s6835_s23 + $0x3c4] ss:$24 sps:$4 sm:$0xff]  }
 0x2e5   : > { %2915 = vmatprep.subr.bf16.mxu1 %v5872_v47  ;;  %v5978_v47 = vld [vmem:[%s6835_s23 + $0x3c0] ss:$24 sps:$4 sm:$0xff]  }
 0x2e7   : > { %2845 = vmatpush2.bf16.msra.mxu0 %v5867_v44  ;;  %v5945_v44 = vld [vmem:[%s6835_s23 + $0x210] ss:$24 sps:$4 sm:$0xff]  }
 0x2e8   : > { %2916 = vmatpush2.bf16.msra.mxu1 %v5870_v12  ;;  %2846 = vmatprep.subr.bf16.mxu0 %v5875_v21  ;;  %v5950_v12 = vld [vmem:[%s6835_s23 + $0x1e4] ss:$24 sps:$4 sm:$0xff]   ;;  %v1451_v21 = vlaneseq }
 0x2e9   : > { %2917 = vmatprep.subr.bf16.mxu1 %v5878_v22  ;;  %v5986_v22 = vld [vmem:[%s6835_s23 + $0x394] ss:$24 sps:$4 sm:$0xff]  }
 0x2eb   : > { %2847 = vmatpush2.bf16.msra.mxu0 %v5873_v41  ;;  %v5948_v41 = vld [vmem:[%s6835_s23 + $0x1e0] ss:$24 sps:$4 sm:$0xff]  }
 0x2ec   : > { %2918 = vmatpush2.bf16.msra.mxu1 %v5876_v34  ;;  %2848 = vmatprep.subr.bf16.mxu0 %v5881_v58  ;;  %v5984_v34 = vld [vmem:[%s6835_s23 + $0x390] ss:$24 sps:$4 sm:$0xff]   ;;  %v5953_v58 = vld [vmem:[%s6835_s23 + $0x1b4] ss:$24 sps:$4 sm:$0xff]  }
 0x2ed   : > { %2919 = vmatprep.subr.bf16.mxu1 %v5884_v39  ;;  %v7695_v39 = vshrl.u32 %v1451_v21, 7 }
 0x2ef   : > { %2849 = vmatpush2.bf16.msra.mxu0 %v5879_v1  ;;  %v5992_v1 = vld [vmem:[%s6835_s23 + $0x364] ss:$24 sps:$4 sm:$0xff]  }
 0x2f0   : > { %2920 = vmatpush2.bf16.msra.mxu1 %v5882_v33  ;;  %2850 = vmatprep.subr.bf16.mxu0 %v5887_v23  ;;  %v5951_v33 = vld [vmem:[%s6835_s23 + $0x1b0] ss:$24 sps:$4 sm:$0xff]   ;;  %v5990_v23 = vld [vmem:[%s6835_s23 + $0x360] ss:$24 sps:$4 sm:$0xff]  }
 0x2f1   : > { %2921 = vmatprep.subr.bf16.mxu1 %v5890_v29  ;;  %v5956_v29 = vld [vmem:[%s6835_s23 + $0x184] ss:$24 sps:$4 sm:$0xff]  }
 0x2f3   : > { %2851 = vmatpush2.bf16.msra.mxu0 %v5885_v52  ;;  %v1453_v52 = vsub.s32 0, %v7695_v39 }
 0x2f4   : > { %2922 = vmatpush2.bf16.msra.mxu1 %v5888_v56  ;;  %2852 = vmatprep.subr.bf16.mxu0 %v5893_v17  ;;  %v5998_v56 = vld [vmem:[%s6835_s23 + $0x334] ss:$24 sps:$4 sm:$0xff]   ;;  %v7705_v17 = vld [vmem:[%s398_s24] sm:$0xf] }
 0x2f5   : > { %2923 = vmatprep.subr.bf16.mxu1 %v5896_v54  ;;  %v5954_v54 = vld [vmem:[%s6835_s23 + $0x180] ss:$24 sps:$4 sm:$0xff]  }
 0x2f7   : > { %2853 = vmatpush2.bf16.msra.mxu0 %v5891_v55  ;;  %v5996_v55 = vld [vmem:[%s6835_s23 + $0x330] ss:$24 sps:$4 sm:$0xff]  }
 0x2f8   : > { %2924 = vmatpush2.bf16.msra.mxu1 %v5894_v57  ;;  %2854 = vmatprep.subr.bf16.mxu0 %v5899_v46  ;;  %v5959_v57 = vld [vmem:[%s6835_s23 + $0x15c] ss:$24 sps:$4 sm:$0xff]   ;;  %v7711_v46 = vrot.slane %v7705_v17, %v1453_v52 }
 0x2f9   : > { %2925 = vmatprep.subr.bf16.mxu1 %v5902_v11  ;;  %v6004_v11 = vld [vmem:[%s6835_s23 + $0x304] ss:$24 sps:$4 sm:$0xff]  }
 0x2fb   : > { %2855 = vmatpush2.bf16.msra.mxu0 %v5897_v3  ;;  %v6002_v3 = vld [vmem:[%s6835_s23 + $0x300] ss:$24 sps:$4 sm:$0xff]  }
 0x2fc   : > { %2926 = vmatpush2.bf16.msra.mxu1 %v5900_v60  ;;  %2856 = vmatprep.subr.bf16.mxu0 %v5905_v10 }
 0x2fd   : > { %2927 = vmatprep.subr.bf16.mxu1 %v5908_v43 }
 0x2ff   : > { %2857 = vmatpush2.bf16.msra.mxu0 %v5903_v0  ;;  %v6010_v0 = vld [vmem:[%s6835_s23 + $0x5d4] ss:$24 sps:$4 sm:$0xff]  }
 0x300   : > { %2928 = vmatpush2.bf16.msra.mxu1 %v5906_v35  ;;  %4318 = vmatprep.subr.bf16.mxu0 %v5911_v62 }
 0x301   : > { %4389 = vmatprep.subr.bf16.mxu1 %v5962_v25 }
 0x302   : > { %2859 = vmatmul.mubr.bf16.vlgmr.msra.gmra.mxu0 %v6253_v7 }
 0x303   : > { %2930 = vmatmul.mubr.bf16.vlgmr.msra.gmra.mxu1 %v7555_v9  ;;  %2868 = vmatprep.mubr.bf16.mxu0 %v6254_v49  ;;  %v6256_v9 = vld [vmem:[#allocation2 + $0x94] ss:$-112 sps:$4 sm:$0xff]  }
 0x304   : > { %2939 = vmatprep.mubr.bf16.mxu1 %v7561_v5  ;;  %4319 = vmatpush1.bf16.msra.mxu0 %v5909_v37  ;;  %v5918_v5 = vld [vmem:[%s6835_s23 + $0xc0] ss:$24 sps:$4 sm:$0xff]   ;;  %v6008_v37 = vld [vmem:[%s6835_s23 + $0x5d0] ss:$24 sps:$4 sm:$0xff]  }
 0x305   : > { %4320 = vmatprep.subr.bf16.mxu0 %v5914_v18  ;;  %4390 = vmatpush1.bf16.msra.mxu1 %v5960_v42 }
 0x306   : > { %4391 = vmatprep.subr.bf16.mxu1 %v5968_v8 }
 0x308   : > { %4321 = vmatpush1.bf16.msra.mxu0 %v5912_v16  ;;  %v6016_v16 = vld [vmem:[%s6835_s23 + $0x5a4] ss:$24 sps:$4 sm:$0xff]  }
 0x309   : > { %4322 = vmatprep.subr.bf16.mxu0 %v5917_v2  ;;  %4392 = vmatpush1.bf16.msra.mxu1 %v5966_v6  ;;  %v6032_v6 = vld [vmem:[%s6835_s23 + $0x510] ss:$24 sps:$4 sm:$0xff]  }
 0x30a   : > { %2869 = vmatmul.mubr.bf16.gmra.mxu0 %v6255_v30  ;;  %4393 = vmatprep.subr.bf16.mxu1 %v5974_v36 }
 0x30b   : > { %2940 = vmatmul.mubr.bf16.gmra.mxu1 %v7571_v50  ;;  %2878 = vmatprep.mubr.bf16.mxu0 %v6256_v9  ;;  %v5924_v50 = vld [vmem:[%s6835_s23 + $0x60] ss:$24 sps:$4 sm:$0xff]  }
 0x30c   : > { %2949 = vmatprep.mubr.bf16.mxu1 %v7577_v61  ;;  %4323 = vmatpush1.bf16.msra.mxu0 %v5915_v40  ;;  %v5929_v61 = vld [vmem:[%s6835_s23 + $0x34] ss:$24 sps:$4 sm:$0xff]   ;;  %v6014_v40 = vld [vmem:[%s6835_s23 + $0x5a0] ss:$24 sps:$4 sm:$0xff]  }
 0x30d   : > { %4324 = vmatprep.subr.bf16.mxu0 %v5920_v19  ;;  %4394 = vmatpush1.bf16.msra.mxu1 %v5972_v24 }
 0x30e   : > { %4395 = vmatprep.subr.bf16.mxu1 %v5980_v38 }
 0x310   : > { %4325 = vmatpush1.bf16.msra.mxu0 %v5918_v5  ;;  %v6022_v5 = vld [vmem:[%s6835_s23 + $0x574] ss:$24 sps:$4 sm:$0xff]  }
 0x311   : > { %4326 = vmatprep.subr.bf16.mxu0 %v5923_v4  ;;  %4396 = vmatpush1.bf16.msra.mxu1 %v5978_v47 }
 0x312   : > { %2879 = vmatmul.mubr.bf16.gmra.mxu0 %v6257_v14  ;;  %4397 = vmatprep.subr.bf16.mxu1 %v5986_v22 }
 0x313   : > { %2950 = vmatmul.mubr.bf16.gmra.mxu1 %v7586_v27  ;;  %2888 = vmatprep.mubr.bf16.mxu0 %v7501_v32  ;;  %v5930_v32 = vld [vmem:[%s6835_s23] ss:$24 sps:$4 sm:$0xff]   ;;  %v5935_v27 = vld [vmem:[%s6835_s23 + $0x2d4] ss:$24 sps:$4 sm:$0xff]  }
 0x314   : > { %2959 = vmatprep.mubr.bf16.mxu1 %v7595_v45  ;;  %4327 = vmatpush1.bf16.msra.mxu0 %v5921_v15  ;;  %v5933_v45 = vld [vmem:[%s6835_s23 + $0x2d0] ss:$24 sps:$4 sm:$0xff]  }
 0x315   : > { %4328 = vmatprep.subr.bf16.mxu0 %v5926_v48  ;;  %4398 = vmatpush1.bf16.msra.mxu1 %v5984_v34  ;;  %v6020_v15 = vld [vmem:[%s6835_s23 + $0x570] ss:$24 sps:$4 sm:$0xff]   ;;  %v6046_v34 = vld [vmem:[%s6835_s23 + $0x4b4] ss:$24 sps:$4 sm:$0xff]  }
 0x316   : > { %4399 = vmatprep.subr.bf16.mxu1 %v5992_v1  ;;  %v6044_v1 = vld [vmem:[%s6835_s23 + $0x4b0] ss:$24 sps:$4 sm:$0xff]  }
 0x318   : > { %4329 = vmatpush1.bf16.msra.mxu0 %v5924_v50 }
 0x319   : > { %4330 = vmatprep.subr.bf16.mxu0 %v5929_v61  ;;  %4400 = vmatpush1.bf16.msra.mxu1 %v5990_v23  ;;  %v1457_v61 = vsub.s32 1, %v7695_v39 }
 0x31a   : > { %2889 = vmatmul.mubr.bf16.gmra.mxu0 %v7511_v20  ;;  %v5936_v20 = vld [vmem:[%s6835_s23 + $0x2a0] ss:$24 sps:$4 sm:$0xff]   ;;  %4401 = vmatprep.subr.bf16.mxu1 %v5998_v56  ;;  %v6052_v56 = vld [vmem:[%s6835_s23 + $0x484] ss:$24 sps:$4 sm:$0xff]  }
 0x31b   : > { %2960 = vmatmul.mubr.bf16.gmra.mxu1 %v7605_v26  ;;  %v5941_v26 = vld [vmem:[%s6835_s23 + $0x274] ss:$24 sps:$4 sm:$0xff]   ;;  %v7753_v25 = vrot.slane %v7705_v17, %v1457_v61 }
 0x31c   : > { %4331 = vmatpush1.bf16.msra.mxu0 %v5927_v53 }
 0x31d   : > { %4332 = vmatprep.subr.bf16.mxu0 %v5932_v59  ;;  %4402 = vmatpush1.bf16.msra.mxu1 %v5996_v55  ;;  %v6028_v59 = vld [vmem:[%s6835_s23 + $0x544] ss:$24 sps:$4 sm:$0xff]   ;;  %v6050_v55 = vld [vmem:[%s6835_s23 + $0x480] ss:$24 sps:$4 sm:$0xff]  }
 0x31e   : > { %4403 = vmatprep.subr.bf16.mxu1 %v6004_v11 }
 0x320   : > { %4333 = vmatpush1.bf16.msra.mxu0 %v5930_v32 }
 0x321   : > { %4334 = vmatprep.subr.bf16.mxu0 %v5935_v27  ;;  %4404 = vmatpush1.bf16.msra.mxu1 %v6002_v3  ;;  %v6026_v27 = vld [vmem:[%s6835_s23 + $0x540] ss:$24 sps:$4 sm:$0xff]   ;;  %v6058_v3 = vld [vmem:[%s6835_s23 + $0x45c] ss:$24 sps:$4 sm:$0xff]  }
 0x322   : > { %4405 = vmatprep.subr.bf16.mxu1 %v6010_v0 }
 0x324   : > { %4335 = vmatpush2.bf16.msra.mxu0 %v5933_v45 }
 0x325   : > { %4336 = vmatprep.subr.bf16.mxu0 %v5938_v31  ;;  %4406 = vmatpush2.bf16.msra.mxu1 %v6008_v37 }
 0x326   : > { %4407 = vmatprep.subr.bf16.mxu1 %v6016_v16 }
 0x328   : > { %4337 = vmatpush2.bf16.msra.mxu0 %v5936_v20 }
 0x329   : > { %4338 = vmatprep.subr.bf16.mxu0 %v5941_v26  ;;  %4408 = vmatpush2.bf16.msra.mxu1 %v6014_v40  ;;  %v6034_v26 = vld [vmem:[%s6835_s23 + $0x514] ss:$24 sps:$4 sm:$0xff]  }
 0x32a   : > { %4409 = vmatprep.subr.bf16.mxu1 %v6022_v5 }
 0x32c   : > { %4339 = vmatpush2.bf16.msra.mxu0 %v5939_v13 }
 0x32d   : > { %4340 = vmatprep.subr.bf16.mxu0 %v5944_v28  ;;  %4410 = vmatpush2.bf16.msra.mxu1 %v6020_v15 }
 0x32e   : > { %4411 = vmatprep.subr.bf16.mxu1 %v6028_v59 }
 0x330   : > { %4341 = vmatpush2.bf16.msra.mxu0 %v5942_v51 }
 0x331   : > { %4342 = vmatprep.subr.bf16.mxu0 %v5947_v63  ;;  %4412 = vmatpush2.bf16.msra.mxu1 %v6026_v27  ;;  %v6040_v63 = vld [vmem:[%s6835_s23 + $0x4e4] ss:$24 sps:$4 sm:$0xff]  }
 0x332   : > { %4413 = vmatprep.subr.bf16.mxu1 %v6034_v26 }
 0x334   : > { %4343 = vmatpush2.bf16.msra.mxu0 %v5945_v44  ;;  %v6038_v44 = vld [vmem:[%s6835_s23 + $0x4e0] ss:$24 sps:$4 sm:$0xff]  }
 0x335   : > { %4344 = vmatprep.subr.bf16.mxu0 %v5950_v12  ;;  %4414 = vmatpush2.bf16.msra.mxu1 %v6032_v6 }
 0x336   : > { %4415 = vmatprep.subr.bf16.mxu1 %v6040_v63 }
 0x338   : > { %4345 = vmatpush2.bf16.msra.mxu0 %v5948_v41 }
 0x339   : > { %4346 = vmatprep.subr.bf16.mxu0 %v5953_v58  ;;  %4416 = vmatpush2.bf16.msra.mxu1 %v6038_v44 }
 0x33a   : > { %4417 = vmatprep.subr.bf16.mxu1 %v6046_v34 }
 0x33c   : > { %4347 = vmatpush2.bf16.msra.mxu0 %v5951_v33 }
 0x33d   : > { %4348 = vmatprep.subr.bf16.mxu0 %v5956_v29  ;;  %4418 = vmatpush2.bf16.msra.mxu1 %v6044_v1 }
 0x33e   : > { %4419 = vmatprep.subr.bf16.mxu1 %v6052_v56 }
 0x340   : > { %4349 = vmatpush2.bf16.msra.mxu0 %v5954_v54 }
 0x341   : > { %4460 = vmatprep.subr.bf16.mxu0 %v5959_v57  ;;  %4420 = vmatpush2.bf16.msra.mxu1 %v6050_v55 }
 0x342   : > { %v2576_v60 = vpop.f32.mrf.mxu0  ;;  %4531 = vmatprep.subr.bf16.mxu1 %v6058_v3 }
 0x343   : > { %v2647_v10 = vpop.f32.mrf.mxu1  ;;  %v2577_v43 = vadd.f32 %v2576_v60, %v7711_v46  ;;  %v1461_v60 = vsub.s32 2, %v7695_v39 }
 0x344   : > { %v7717_v35 = vpop.f32.mrf.mxu0 }
 0x345   : > { %v7719_v62 = vpop.f32.mrf.mxu1  ;;  %v7722_v18 = vadd.f32 %v2647_v10, %v2577_v43  ;;  %v1465_v10 = vsub.s32 3, %v7695_v39  ;;  %v2579_v43 = vadd.f32 %v7717_v35, %v7753_v25  ;;  %v7792_v0 = vrot.slane %v7705_v17, %v1461_v60 }
 0x346   : > { %v7724_v7 = vpop.f32.mrf.mxu0 }
 0x347   : > { %v7726_v49 = vpop.f32.mrf.mxu1  ;;  %v2581_v37 = vadd.f32 %v7724_v7, %v7711_v46  ;;  %v7797_v16 = vrot.slane %v7705_v17, %v1465_v10 }
 0x348   : > { %v7729_v2 = vpop.f32.mrf.mxu0 }
 0x349   : > { %v7732_v30 = vpop.f32.mrf.mxu1  ;;  %v2583_v5 = vadd.f32 %v7729_v2, %v7753_v25  ;;  %v2652_v7 = vadd.f32 %v7726_v49, %v2581_v37 }
 0x34a   : > { %v2586_v19 = vpop.f32.mrf.mxu0 }
 0x34b   : > { %v2587_v9 = vadd.f32 %v2586_v19, %v7711_v46  ;;  %v2657_v48 = vpop.f32.mrf.mxu1  ;;  %v2654_v27 = vadd.f32 %v7732_v30, %v2583_v5 }
 0x34c   : > { %v7736_v4 = vpop.f32.mrf.mxu0 }
 0x34d   : > { %v7739_v14 = vadd.f32 %v2657_v48, %v2587_v9  ;;  %v7744_v53 = vpop.f32.mrf.mxu1  ;;  %v2650_v9 = vadd.f32 %v7719_v62, %v2579_v43  ;;  %v2589_v62 = vadd.f32 %v7736_v4, %v7753_v25 }
 0x34e   : > { %v7741_v50 = vpop.f32.mrf.mxu0 }
 0x34f   : > { %v7750_v45 = vpop.f32.mrf.mxu1  ;;  %v2591_v6 = vadd.f32 %v7741_v50, %v7711_v46 }
 0x350   : > { %v7747_v32 = vpop.f32.mrf.mxu0 }
 0x351   : > { %v7756_v20 = vpop.f32.mrf.mxu1  ;;  %v2593_v44 = vadd.f32 %v7747_v32, %v7753_v25  ;;  %v2662_v1 = vadd.f32 %v7750_v45, %v2591_v6 }
 0x352   : > { %v2596_v31 = vpop.f32.mrf.mxu0 }
 0x353   : > { %v2597_v42 = vadd.f32 %v2596_v31, %v7711_v46  ;;  %v2667_v28 = vpop.f32.mrf.mxu1 }
 0x354   : > { %v2598_v8 = vpop.f32.mrf.mxu0 }
 0x355   : > { %v2599_v13 = vadd.f32 %v2598_v8, %v7753_v25  ;;  %v7761_v36 = vadd.f32 %v2667_v28, %v2597_v42  ;;  %v2669_v51 = vpop.f32.mrf.mxu1  ;;  %v2660_v28 = vadd.f32 %v7744_v53, %v2589_v62 }
 0x356   : > { %v7763_v24 = vpop.f32.mrf.mxu0 }
 0x357   : > { %v7766_v38 = vadd.f32 %v2669_v51, %v2599_v13  ;;  %v7771_v12 = vpop.f32.mrf.mxu1  ;;  %v2601_v60 = vadd.f32 %v7763_v24, %v7711_v46 }
 0x358   : > { %v7768_v47 = vpop.f32.mrf.mxu0 }
 0x359   : > { %v7774_v41 = vpop.f32.mrf.mxu1 }
 0x35a   : > { %v2606_v21 = vpop.f32.mrf.mxu0 }
 0x35b   : > { %v2607_v22 = vadd.f32 %v2606_v21, %v7711_v46  ;;  %v2677_v33 = vpop.f32.mrf.mxu1 }
 0x35c   : > { %v7777_v58 = vpop.f32.mrf.mxu0 }
 0x35d   : > { %v7780_v23 = vadd.f32 %v2677_v33, %v2607_v22  ;;  %v7782_v52 = vpop.f32.mrf.mxu1  ;;  %v2609_v46 = vadd.f32 %v7777_v58, %v7753_v25 }
 0x35e   : > { %v2610_v29 = vpop.f32.mrf.mxu0 }
 0x35f   : > { %v2681_v57 = vpop.f32.mrf.mxu1 }
 0x360   : > { %v2611_v54 = vpop.f32.mrf.mxu0 }
 0x361   : > { %v2682_v11 = vpop.f32.mrf.mxu1 }
 0x382   : > { %v2718_v40 = vpop.f32.mrf.mxu0 }
 0x383   : > { %v2789_v19 = vpop.f32.mrf.mxu1  ;;  %v7803_v39 = vadd.f32 %v2718_v40, %v7722_v18 }
 0x384   : > { %v7806_v35 = vadd.f32 %v2789_v19, %v7792_v0  ;;  %v2720_v15 = vpop.f32.mrf.mxu0  ;;  %v2603_v19 = vadd.f32 %v7768_v47, %v7753_v25 }
 0x385   : > { %v2791_v48 = vpop.f32.mrf.mxu1  ;;  %v7809_v61 = vadd.f32 %v2720_v15, %v2650_v9  ;;  %v2996_v2 = vmul.f32 0.70710677, %v7803_v39 }
 0x386   : > { %v7812_v17 = vadd.f32 %v2791_v48, %v7797_v16  ;;  %v2722_v59 = vpop.f32.mrf.mxu0  ;;  %v2674_v58 = vadd.f32 %v7774_v41, %v2603_v19 }
 0x387   : > { %v2793_v18 = vpop.f32.mrf.mxu1  ;;  %v2997_v31 = vmul.f32 0.70710677, %v7809_v61  ;;  %v7819_v42 = vadd.f32 %v2722_v59, %v2652_v7  ;;  %v2672_v7 = vadd.f32 %v7771_v12, %v2601_v60  ;;  %v2680_v12 = vadd.f32 %v7782_v52, %v2609_v46 }
 0x388   : > { %v7822_v49 = vadd.f32 %v2793_v18, %v7792_v0  ;;  %v2724_v26 = vpop.f32.mrf.mxu0 }
 0x389   : > { %v2795_v8 = vpop.f32.mrf.mxu1  ;;  %6197 = verf.f32 %v2997_v31  ;;  %v3000_v4 = vmul.f32 0.70710677, %v7819_v42  ;;  %v7827_v13 = vadd.f32 %v2724_v26, %v2654_v27  ;;  %v2969_v26 = vmul.f32 0.5, %v7809_v61 }
 0x38a   : > { %6199 = verf.f32 %v2996_v2  ;;  %v7831_v30 = vadd.f32 %v2795_v8, %v7797_v16  ;;  %v2728_v51 = vpop.f32.mrf.mxu0 }
 0x38b   : > { %v2799_v63 = vpop.f32.mrf.mxu1  ;;  %6201 = verf.f32 %v3000_v4  ;;  %v3001_v21 = vmul.f32 0.70710677, %v7827_v13  ;;  %v7837_v50 = vadd.f32 %v2728_v51, %v7739_v14  ;;  %v2664_v14 = vadd.f32 %v7756_v20, %v2593_v44 }
 0x38c   : > { %v2730_v22 = vpop.f32.mrf.mxu0  ;;  %v7840_v34 = vadd.f32 %v2799_v63, %v7792_v0  ;;  %v2972_v51 = vmul.f32 0.5, %v7819_v42  ;;  %v2968_v42 = vmul.f32 0.5, %v7803_v39 }
 0x38d   : > { %v2801_v53 = vpop.f32.mrf.mxu1  ;;  %6203 = verf.f32 %v3001_v21  ;;  %v7843_v33 = vadd.f32 %v2730_v22, %v2660_v28  ;;  %v3004_v29 = vmul.f32 0.70710677, %v7837_v50 }
 0x38e   : > { %v2732_v56 = vpop.f32.mrf.mxu0  ;;  %v7847_v32 = vadd.f32 %v2801_v53, %v7797_v16 }
 0x38f   : > { %v2803_v54 = vpop.f32.mrf.mxu1  ;;  %v3005_v55 = vmul.f32 0.70710677, %v7843_v33  ;;  %v7851_v57 = vadd.f32 %v2732_v56, %v2662_v1  ;;  %v2973_v1 = vmul.f32 0.5, %v7827_v13 }
 0x390   : > { %v2734_v11 = vpop.f32.mrf.mxu0  ;;  %v7854_v3 = vadd.f32 %v2803_v54, %v7792_v0 }
 0x391   : > { %v2805_v45 = vpop.f32.mrf.mxu1  ;;  %6205 = verf.f32 %v3005_v55  ;;  %v3008_v10 = vmul.f32 0.70710677, %v7851_v57  ;;  %v7859_v43 = vadd.f32 %v2734_v11, %v2664_v14 }
 0x392   : > { %6207 = verf.f32 %v3004_v29  ;;  %v2738_v37 = vpop.f32.mrf.mxu0  ;;  %v7862_v20 = vadd.f32 %v2805_v45, %v7797_v16 }
 0x393   : > { %v2809_v40 = vpop.f32.mrf.mxu1  ;;  %6209 = verf.f32 %v3008_v10  ;;  %v3009_v9 = vmul.f32 0.70710677, %v7859_v43  ;;  %v7868_v5 = vadd.f32 %v2738_v37, %v7761_v36 }
 0x394   : > { %v2740_v24 = vpop.f32.mrf.mxu0  ;;  %v7873_v15 = vadd.f32 %v2809_v40, %v7792_v0 }
 0x395   : > { %v2811_v48 = vpop.f32.mrf.mxu1  ;;  %6211 = verf.f32 %v3009_v9  ;;  %v3012_v62 = vmul.f32 0.70710677, %v7868_v5  ;;  %v7878_v2 = vadd.f32 %v2740_v24, %v7766_v38  ;;  %v5957_v24 = vld [vmem:[%s6835_s23 + $0x158] ss:$24 sps:$4 sm:$0xff]  }
 0x396   : > { %v6198_v47 = vpop.eup %6197  ;;  %v2742_v59 = vpop.f32.mrf.mxu0  ;;  %v7881_v36 = vadd.f32 %v2811_v48, %v7797_v16 }
 0x397   : > { %v2813_v18 = vpop.f32.mrf.mxu1  ;;  %v6200_v25 = vpop.eup %6199  ;;  %6213 = verf.f32 %v3012_v62  ;;  %v7884_v27 = vadd.f32 %v2742_v59, %v2672_v7  ;;  %v3013_v8 = vmul.f32 0.70710677, %v7878_v2  ;;  %v3053_v28 = vadd.f32 1.0, %v6198_v47  ;;  %v5965_v62 = vld [vmem:[%s6835_s23 + $0x12c] ss:$24 sps:$4 sm:$0xff]  }
 0x398   : > { %v6202_v31 = vpop.eup %6201  ;;  %v2744_v38 = vpop.f32.mrf.mxu0  ;;  %v7890_v6 = vadd.f32 %v2813_v18, %v7792_v0  ;;  %v3052_v21 = vadd.f32 1.0, %v6200_v25 }
 0x399   : > { %v2815_v4 = vpop.f32.mrf.mxu1  ;;  %v3056_v63 = vadd.f32 1.0, %v6202_v31  ;;  %v3016_v41 = vmul.f32 0.70710677, %v7884_v27  ;;  %6215 = verf.f32 %v3013_v8  ;;  %v7894_v22 = vadd.f32 %v2744_v38, %v2674_v58 }
 0x39a   : > { %v6204_v44 = vpop.eup %6203  ;;  %v2748_v52 = vpop.f32.mrf.mxu0  ;;  %v7897_v61 = vadd.f32 %v2815_v4, %v7797_v16  ;;  %v3081_v60 = vmul.f32 %v3053_v28, %v2969_v26  ;;  %v3080_v37 = vmul.f32 %v3052_v21, %v2968_v42  ;;  %v2977_v26 = vmul.f32 0.5, %v7843_v33  ;;  %v5963_v4 = vld [vmem:[%s6835_s23 + $0x128] ss:$24 sps:$4 sm:$0xff]   ;;  %v5977_v42 = vld [vmem:[%s6835_s23 + $0xcc] ss:$24 sps:$4 sm:$0xff]  }
 0x39b   : > { %v2819_v53 = vpop.f32.mrf.mxu1  ;;  %v3057_v29 = vadd.f32 1.0, %v6204_v44  ;;  %6217 = verf.f32 %v3016_v41  ;;  %v7901_v56 = vadd.f32 %v2748_v52, %v7780_v23  ;;  %v3084_v54 = vmul.f32 %v3056_v63, %v2972_v51  ;;  %v5971_v41 = vld [vmem:[%s6835_s23 + $0xfc] ss:$24 sps:$4 sm:$0xff]  }
 0x39c   : > { %v3017_v14 = vmul.f32 0.70710677, %v7894_v22  ;;  %v2750_v55 = vpop.f32.mrf.mxu0  ;;  %v7906_v11 = vadd.f32 %v2819_v53, %v7792_v0  ;;  %v2981_v8 = vmul.f32 0.5, %v7859_v43  ;;  %v2976_v51 = vmul.f32 0.5, %v7837_v50  ;;  %v5969_v43 = vld [vmem:[%s6835_s23 + $0xf8] ss:$24 sps:$4 sm:$0xff]  }
 0x39d   : > { %v7908_v45 = vpop.f32.mrf.mxu1  ;;  %v3085_v13 = vmul.f32 %v3057_v29, %v2973_v1  ;;  %v3020_v23 = vmul.f32 0.70710677, %v7901_v56  ;;  %v7911_v40 = vadd.f32 %v2750_v55, %v2680_v12  ;;  %v7916_v48 = vpack.c.bf16 %v3084_v54, %v3080_v37  ;;  %v5975_v37 = vld [vmem:[%s6835_s23 + $0xc8] ss:$24 sps:$4 sm:$0xff]  }
 0x39e   : > { %v6206_v10 = vpop.eup %6205  ;;  %6219 = verf.f32 %v3017_v14  ;;  %v2752_v39 = vpop.f32.mrf.mxu0  ;;  %v2980_v12 = vmul.f32 0.5, %v7851_v57  ;;  %v2984_v50 = vmul.f32 0.5, %v7868_v5  ;;  %v2988_v54 = vmul.f32 0.5, %v7884_v27  ;;  %v5983_v27 = vld [vmem:[%s6835_s23 + $0x9c] ss:$24 sps:$4 sm:$0xff]  }
 0x39f   : > { %v2823_v19 = vpop.f32.mrf.mxu1  ;;  %v6208_v9 = vpop.eup %6207  ;;  %v7913_v46 = vpack.c.bf16 %v3085_v13, %v3081_v60  ;;  %v3021_v7 = vmul.f32 0.70710677, %v7911_v40  ;;  %v3061_v18 = vadd.f32 1.0, %v6206_v10  ;;  %6221 = verf.f32 %v3020_v23 }
 0x3a0   : > { %v6210_v0 = vpop.eup %6209  ;;  %v2753_v47 = vpop.f32.mrf.mxu0  ;;  %v3060_v31 = vadd.f32 1.0, %v6208_v9  ;;  %v2985_v23 = vmul.f32 0.5, %v7878_v2  ;;  %v2989_v39 = vmul.f32 0.5, %v7894_v22  ;;  %v5981_v2 = vld [vmem:[%s6835_s23 + $0x98] ss:$24 sps:$4 sm:$0xff]  }
 0x3a1   : > { %v2824_v59 = vpop.f32.mrf.mxu1  ;;  %v3064_v25 = vadd.f32 1.0, %v6210_v0  ;;  %4350 = vmatprep.mubr.bf16.mxu0 %v7913_v46  ;;  %6223 = verf.f32 %v3021_v7  ;;  %v3089_v44 = vmul.f32 %v3061_v18, %v2977_v26 }
 0x3a2   : > { %v6212_v58 = vpop.eup %6211  ;;  %4351 = vmatmul.mubr.bf16.vlgmr.msra.gmra.mxu0 %v7916_v48  ;;  %v3088_v21 = vmul.f32 %v3060_v31, %v2976_v51  ;;  %v5989_v59 = vld [vmem:[%s6835_s23 + $0x6c] ss:$24 sps:$4 sm:$0xff]   ;;  %v6005_v51 = vld [vmem:[%s6835_s23 + $0x2d8] ss:$24 sps:$4 sm:$0xff]  }
 0x3a3   : > { %v3065_v38 = vadd.f32 1.0, %v6212_v58  ;;  %4461 = vmatpush1.bf16.msra.mxu0 %v5957_v24  ;;  %v3092_v63 = vmul.f32 %v3064_v25, %v2980_v12  ;;  %v2992_v58 = vmul.f32 0.5, %v7901_v56  ;;  %v5995_v12 = vld [vmem:[%s6835_s23 + $0x3c] ss:$24 sps:$4 sm:$0xff]   ;;  %v6001_v56 = vld [vmem:[%s6835_s23 + $0xc] ss:$24 sps:$4 sm:$0xff]  }
 0x3a4   : > { %v6214_v28 = vpop.eup %6213  ;;  %4462 = vmatprep.subr.bf16.mxu0 %v5965_v62  ;;  %v2993_v62 = vmul.f32 0.5, %v7911_v40  ;;  %v5987_v40 = vld [vmem:[%s6835_s23 + $0x68] ss:$24 sps:$4 sm:$0xff]  }
 0x3a5   : > { %v3093_v57 = vmul.f32 %v3065_v38, %v2981_v8  ;;  %v3068_v53 = vadd.f32 1.0, %v6214_v28  ;;  %v7931_v29 = vpack.c.bf16 %v3092_v63, %v3088_v21  ;;  %v5993_v8 = vld [vmem:[%s6835_s23 + $0x38] ss:$24 sps:$4 sm:$0xff]   ;;  %v6007_v28 = vld [vmem:[%s6835_s23 + $0x2dc] ss:$24 sps:$4 sm:$0xff]  }
 0x3a6   : > { %v6216_v52 = vpop.eup %6215  ;;  %v6013_v63 = vld [vmem:[%s6835_s23 + $0x2ac] ss:$24 sps:$4 sm:$0xff]  }
 0x3a7   : > { %4463 = vmatpush1.bf16.msra.mxu0 %v5963_v4  ;;  %v7928_v33 = vpack.c.bf16 %v3093_v57, %v3089_v44  ;;  %v3069_v55 = vadd.f32 1.0, %v6216_v52  ;;  %v3096_v13 = vmul.f32 %v3068_v53, %v2984_v50  ;;  %v5999_v4 = vld [vmem:[%s6835_s23 + $0x8] ss:$24 sps:$4 sm:$0xff]  }
 0x3a8   : > { %v6218_v1 = vpop.eup %6217  ;;  %4464 = vmatprep.subr.bf16.mxu0 %v5971_v41  ;;  %v6011_v53 = vld [vmem:[%s6835_s23 + $0x2a8] ss:$24 sps:$4 sm:$0xff]  }
 0x3a9   : > { %v3072_v14 = vadd.f32 1.0, %v6218_v1  ;;  %4360 = vmatprep.mubr.bf16.mxu0 %v7928_v33  ;;  %v3097_v24 = vmul.f32 %v3069_v55, %v2985_v23  ;;  %v6025_v23 = vld [vmem:[%s6835_s23 + $0x24c] ss:$24 sps:$4 sm:$0xff]  }
 0x3aa   : > { %4361 = vmatmul.mubr.bf16.gmra.mxu0 %v7931_v29 }
 0x3ab   : > { %v6220_v60 = vpop.eup %6219  ;;  %v3100_v10 = vmul.f32 %v3072_v14, %v2988_v54  ;;  %4465 = vmatpush1.bf16.msra.mxu0 %v5969_v43 }
 0x3ac   : > { %v3073_v5 = vadd.f32 1.0, %v6220_v60  ;;  %4466 = vmatprep.subr.bf16.mxu0 %v5977_v42  ;;  %v6222_v9 = vpop.eup %6221  ;;  %v6019_v42 = vld [vmem:[%s6835_s23 + $0x27c] ss:$24 sps:$4 sm:$0xff]  }
 0x3ad   : > { %v7942_v19 = vpack.c.bf16 %v3100_v10, %v3096_v13  ;;  %v3076_v18 = vadd.f32 1.0, %v6222_v9  ;;  %v6017_v10 = vld [vmem:[%s6835_s23 + $0x278] ss:$24 sps:$4 sm:$0xff]  }
 0x3ae   : > { %v3101_v0 = vmul.f32 %v3073_v5, %v2989_v39  ;;  %v6224_v7 = vpop.eup %6223 }
 0x3af   : > { %4467 = vmatpush1.bf16.msra.mxu0 %v5975_v37  ;;  %v3077_v22 = vadd.f32 1.0, %v6224_v7  ;;  %v3104_v26 = vmul.f32 %v3076_v18, %v2992_v58  ;;  %v6023_v7 = vld [vmem:[%s6835_s23 + $0x248] ss:$24 sps:$4 sm:$0xff]  }
 0x3b0   : > { %v7945_v47 = vpack.c.bf16 %v3101_v0, %v3097_v24  ;;  %4468 = vmatprep.subr.bf16.mxu0 %v5983_v27 }
 0x3b1   : > { %v3105_v25 = vmul.f32 %v3077_v22, %v2993_v62  ;;  %v7958_v38 = vpack.c.bf16 %v3104_v26, %v3104_v26  ;;  %v6029_v26 = vld [vmem:[%s6835_s23 + $0x218] ss:$24 sps:$4 sm:$0xff]  }
 0x3b2   : > { %4370 = vmatprep.mubr.bf16.mxu0 %v7945_v47 }
 0x3b3   : > { %4371 = vmatmul.mubr.bf16.gmra.mxu0 %v7942_v19  ;;  %v7952_v31 = vpack.c.bf16 %v3105_v25, %v3105_v25 }
 0x3b4   : > { %4469 = vmatpush1.bf16.msra.mxu0 %v5981_v2 }
 0x3b5   : > { %4470 = vmatprep.subr.bf16.mxu0 %v5989_v59  ;;  %4380 = vmatprep.mubr.bf16.mxu0 %v7952_v31 }
 0x3b8   : > { %4471 = vmatpush1.bf16.msra.mxu0 %v5987_v40 }
 0x3b9   : > { %4472 = vmatprep.subr.bf16.mxu0 %v5995_v12 }
 0x3bb   : > { %4381 = vmatmul.mubr.bf16.gmra.mxu0 %v7958_v38 }
 0x3bc   : > { %4473 = vmatpush1.bf16.msra.mxu0 %v5993_v8  ;;  %4492 = vmatprep.mubr.bf16.mxu0 %v7913_v46 }
 0x3bd   : > { %4474 = vmatprep.subr.bf16.mxu0 %v6001_v56 }
 0x3c0   : > { %4475 = vmatpush1.bf16.msra.mxu0 %v5999_v4  ;;  %v6037_v4 = vld [vmem:[%s6835_s23 + $0x1ec] ss:$24 sps:$4 sm:$0xff]  }
 0x3c1   : > { %4476 = vmatprep.subr.bf16.mxu0 %v6007_v28 }
 0x3c2   : > { %v2860_v41 = vpop.f32.mrf.mxu0 }
 0x3c3   : > { %v2931_v44 = vpop.f32.mrf.mxu1  ;;  %v2861_v57 = vadd.f32 %v2860_v41, %v7806_v35 }
 0x3c4   : > { %4477 = vmatpush2.bf16.msra.mxu0 %v6005_v51  ;;  %v2862_v21 = vpop.f32.mrf.mxu0 }
 0x3c5   : > { %v2933_v52 = vpop.f32.mrf.mxu1  ;;  %v7969_v43 = vadd.f32 %v2931_v44, %v2861_v57  ;;  %v2863_v1 = vadd.f32 %v2862_v21, %v7812_v17  ;;  %4478 = vmatprep.subr.bf16.mxu0 %v6013_v63  ;;  %v6035_v21 = vld [vmem:[%s6835_s23 + $0x1e8] ss:$24 sps:$4 sm:$0xff]  }
 0x3c6   : > { %v2864_v50 = vpop.f32.mrf.mxu0 }
 0x3c7   : > { %v2935_v54 = vpop.f32.mrf.mxu1  ;;  %v2998_v14 = vmul.f32 0.70710677, %v7969_v43  ;;  %v7974_v55 = vadd.f32 %v2933_v52, %v2863_v1  ;;  %v2865_v35 = vadd.f32 %v2864_v50, %v7822_v49 }
 0x3c8   : > { %4479 = vmatpush2.bf16.msra.mxu0 %v6011_v53  ;;  %v2866_v60 = vpop.f32.mrf.mxu0 }
 0x3c9   : > { %v2937_v13 = vpop.f32.mrf.mxu1  ;;  %6225 = verf.f32 %v2998_v14  ;;  %v2999_v37 = vmul.f32 0.70710677, %v7974_v55  ;;  %v7979_v17 = vadd.f32 %v2935_v54, %v2865_v35  ;;  %4480 = vmatprep.subr.bf16.mxu0 %v6019_v42  ;;  %v2867_v39 = vadd.f32 %v2866_v60, %v7831_v30  ;;  %v6031_v30 = vld [vmem:[%s6835_s23 + $0x21c] ss:$24 sps:$4 sm:$0xff]  }
 0x3ca   : > { %v2870_v5 = vpop.f32.mrf.mxu0  ;;  %v6043_v42 = vld [vmem:[%s6835_s23 + $0x1bc] ss:$24 sps:$4 sm:$0xff]  }
 0x3cb   : > { %v2941_v27 = vpop.f32.mrf.mxu1  ;;  %v3002_v9 = vmul.f32 0.70710677, %v7979_v17  ;;  %v2871_v49 = vadd.f32 %v2870_v5, %v7840_v34  ;;  %6227 = verf.f32 %v2999_v37  ;;  %v7985_v24 = vadd.f32 %v2937_v13, %v2867_v39 }
 0x3cc   : > { %4481 = vmatpush2.bf16.msra.mxu0 %v6017_v10  ;;  %v2872_v0 = vpop.f32.mrf.mxu0  ;;  %v6041_v10 = vld [vmem:[%s6835_s23 + $0x1b8] ss:$24 sps:$4 sm:$0xff]  }
 0x3cd   : > { %v2943_v62 = vpop.f32.mrf.mxu1  ;;  %6229 = verf.f32 %v3002_v9  ;;  %v2873_v2 = vadd.f32 %v2872_v0, %v7847_v32  ;;  %v7989_v22 = vadd.f32 %v2941_v27, %v2871_v49  ;;  %4482 = vmatprep.subr.bf16.mxu0 %v6025_v23  ;;  %v3003_v59 = vmul.f32 0.70710677, %v7985_v24  ;;  %v6049_v27 = vld [vmem:[%s6835_s23 + $0x18c] ss:$24 sps:$4 sm:$0xff]  }
 0x3ce   : > { %v2874_v18 = vpop.f32.mrf.mxu0  ;;  %v2822_v23 = vadd.f32 %v7908_v45, %v7797_v16  ;;  %v2970_v49 = vmul.f32 0.5, %v7969_v43  ;;  %v2971_v45 = vmul.f32 0.5, %v7974_v55 }
 0x3cf   : > { %v2945_v34 = vpop.f32.mrf.mxu1  ;;  %v3006_v25 = vmul.f32 0.70710677, %v7989_v22  ;;  %v2875_v58 = vadd.f32 %v2874_v18, %v7854_v3  ;;  %v7995_v40 = vadd.f32 %v2943_v62, %v2873_v2  ;;  %6231 = verf.f32 %v3003_v59 }
 0x3d0   : > { %4483 = vmatpush2.bf16.msra.mxu0 %v6023_v7  ;;  %v2876_v12 = vpop.f32.mrf.mxu0  ;;  %v2974_v2 = vmul.f32 0.5, %v7979_v17 }
 0x3d1   : > { %v2947_v32 = vpop.f32.mrf.mxu1  ;;  %v3007_v8 = vmul.f32 0.70710677, %v7995_v40  ;;  %v2877_v56 = vadd.f32 %v2876_v12, %v7862_v20  ;;  %4484 = vmatprep.subr.bf16.mxu0 %v6031_v30  ;;  %6233 = verf.f32 %v3006_v25  ;;  %v8001_v28 = vadd.f32 %v2945_v34, %v2875_v58  ;;  %v6047_v34 = vld [vmem:[%s6835_s23 + $0x188] ss:$24 sps:$4 sm:$0xff]  }
 0x3d2   : > { %v2880_v51 = vpop.f32.mrf.mxu0 }
 0x3d3   : > { %v2951_v3 = vpop.f32.mrf.mxu1  ;;  %6235 = verf.f32 %v3007_v8  ;;  %v2881_v63 = vadd.f32 %v2880_v51, %v7873_v15  ;;  %v8004_v41 = vadd.f32 %v2947_v32, %v2877_v56  ;;  %v3010_v44 = vmul.f32 0.70710677, %v8001_v28 }
 0x3d4   : > { %4485 = vmatpush2.bf16.msra.mxu0 %v6029_v26  ;;  %v2882_v57 = vpop.f32.mrf.mxu0  ;;  %v2975_v8 = vmul.f32 0.5, %v7985_v24 }
 0x3d5   : > { %v2953_v52 = vpop.f32.mrf.mxu1  ;;  %v3011_v20 = vmul.f32 0.70710677, %v8004_v41  ;;  %v2883_v53 = vadd.f32 %v2882_v57, %v7881_v36  ;;  %v8010_v1 = vadd.f32 %v2951_v3, %v2881_v63  ;;  %4486 = vmatprep.subr.bf16.mxu0 %v6037_v4  ;;  %6237 = verf.f32 %v3010_v44 }
 0x3d6   : > { %v6226_v50 = vpop.eup %6225  ;;  %v2884_v15 = vpop.f32.mrf.mxu0 }
 0x3d7   : > { %v2955_v54 = vpop.f32.mrf.mxu1  ;;  %6239 = verf.f32 %v3011_v20  ;;  %v3014_v14 = vmul.f32 0.70710677, %v8010_v1  ;;  %v2885_v35 = vadd.f32 %v2884_v15, %v7890_v6  ;;  %v8015_v60 = vadd.f32 %v2953_v52, %v2883_v53  ;;  %v6053_v20 = vld [vmem:[%s6835_s23 + $0x160] ss:$24 sps:$4 sm:$0xff]   ;;  %v6061_v15 = vld [vmem:[%s6835_s23 + $0x134] ss:$24 sps:$4 sm:$0xff]  }
 0x3d8   : > { %4487 = vmatpush2.bf16.msra.mxu0 %v6035_v21  ;;  %v2886_v13 = vpop.f32.mrf.mxu0  ;;  %v6228_v37 = vpop.eup %6227  ;;  %v3054_v39 = vadd.f32 1.0, %v6226_v50 }
 0x3d9   : > { %v2957_v36 = vpop.f32.mrf.mxu1  ;;  %v2887_v5 = vadd.f32 %v2886_v13, %v7897_v61  ;;  %4488 = vmatprep.subr.bf16.mxu0 %v6043_v42  ;;  %6241 = verf.f32 %v3014_v14  ;;  %v3015_v6 = vmul.f32 0.70710677, %v8015_v60  ;;  %v8024_v0 = vadd.f32 %v2955_v54, %v2885_v35 }
 0x3da   : > { %v6230_v9 = vpop.eup %6229  ;;  %v2890_v7 = vpop.f32.mrf.mxu0  ;;  %v3055_v59 = vadd.f32 1.0, %v6228_v37  ;;  %v3082_v12 = vmul.f32 %v3054_v39, %v2970_v49  ;;  %v2982_v39 = vmul.f32 0.5, %v8001_v28  ;;  %v2983_v49 = vmul.f32 0.5, %v8004_v41  ;;  %v6065_v41 = vld [vmem:[%s6835_s23 + $0x100] ss:$24 sps:$4 sm:$0xff]  }
 0x3db   : > { %v2961_v62 = vpop.f32.mrf.mxu1  ;;  %v3058_v30 = vadd.f32 1.0, %v6230_v9  ;;  %v2891_v16 = vadd.f32 %v2890_v7, %v7906_v11  ;;  %v8028_v61 = vadd.f32 %v2957_v36, %v2887_v5  ;;  %6243 = verf.f32 %v3015_v6  ;;  %v6055_v11 = vld [vmem:[%s6835_s23 + $0x164] ss:$24 sps:$4 sm:$0xff]   ;;  %v6059_v36 = vld [vmem:[%s6835_s23 + $0x130] ss:$24 sps:$4 sm:$0xff]  }
 0x3dc   : > { %v3018_v43 = vmul.f32 0.70710677, %v8024_v0  ;;  %4489 = vmatpush2.bf16.msra.mxu0 %v6041_v10  ;;  %v2892_v18 = vpop.f32.mrf.mxu0  ;;  %v6232_v58 = vpop.eup %6231  ;;  %v3083_v21 = vmul.f32 %v3055_v59, %v2971_v45  ;;  %v6056_v10 = vld [vmem:[%s6835_s23 + $0x458] ss:$24 sps:$4 sm:$0xff]   ;;  %v2979_v9 = vmul.f32 0.5, %v7995_v40 }
 0x3dd   : > { %v2963_v25 = vpop.f32.mrf.mxu1  ;;  %v3086_v26 = vmul.f32 %v3058_v30, %v2974_v2  ;;  %v3019_v17 = vmul.f32 0.70710677, %v8028_v61  ;;  %v2893_v32 = vadd.f32 %v2892_v18, %v2822_v23  ;;  %4490 = vmatprep.subr.bf16.mxu0 %v6049_v27  ;;  %v3059_v55 = vadd.f32 1.0, %v6232_v58  ;;  %v6064_v27 = vld [vmem:[%s6835_s23 + $0x42c] ss:$24 sps:$4 sm:$0xff]  }
 0x3de   : > { %6245 = verf.f32 %v3018_v43  ;;  %v8036_v56 = vadd.f32 %v2961_v62, %v2891_v16  ;;  %v2894_v4 = vpop.f32.mrf.mxu0  ;;  %v6234_v3 = vpop.eup %6233  ;;  %v2978_v23 = vmul.f32 0.5, %v7989_v22  ;;  %v6067_v7 = vld [vmem:[%s6835_s23 + $0x104] ss:$24 sps:$4 sm:$0xff]   ;;  %v6062_v40 = vld [vmem:[%s6835_s23 + $0x428] ss:$24 sps:$4 sm:$0xff]  }
 0x3df   : > { %v2965_v51 = vpop.f32.mrf.mxu1  ;;  %v8038_v63 = vpack.c.bf16 %v3086_v26, %v3082_v12  ;;  %6247 = verf.f32 %v3019_v17  ;;  %v8040_v44 = vadd.f32 %v2963_v25, %v2893_v32  ;;  %v3087_v52 = vmul.f32 %v3059_v55, %v2975_v8  ;;  %v6070_v43 = vld [vmem:[%s6835_s23 + $0x3fc] ss:$24 sps:$4 sm:$0xff]   ;;  %v6068_v12 = vld [vmem:[%s6835_s23 + $0x3f8] ss:$24 sps:$4 sm:$0xff]   ;;  %v6076_v55 = vld [vmem:[%s6835_s23 + $0x3cc] ss:$24 sps:$4 sm:$0xff]  }
 0x3e0   : > { %v6236_v57 = vpop.eup %6235  ;;  %v3022_v24 = vmul.f32 0.70710677, %v8036_v56  ;;  %4491 = vmatpush2.bf16.msra.mxu0 %v6047_v34  ;;  %v2895_v53 = vpop.f32.mrf.mxu0  ;;  %v3062_v54 = vadd.f32 1.0, %v6234_v3  ;;  %v6073_v34 = vld [vmem:[%s6835_s23 + $0xd4] ss:$24 sps:$4 sm:$0xff]   ;;  %v2986_v32 = vmul.f32 0.5, %v8010_v1 }
 0x3e1   : > { %v2966_v42 = vpop.f32.mrf.mxu1  ;;  %v3023_v50 = vmul.f32 0.70710677, %v8040_v44  ;;  %4602 = vmatprep.subr.bf16.mxu0 %v6055_v11  ;;  %v8046_v14 = vpack.c.bf16 %v3087_v52, %v3083_v21  ;;  %v3063_v13 = vadd.f32 1.0, %v6236_v57  ;;  %v6071_v26 = vld [vmem:[%s6835_s23 + $0xd0] ss:$24 sps:$4 sm:$0xff]   ;;  %v2990_v11 = vmul.f32 0.5, %v8024_v0 }
 0x3e2   : > { %v6238_v35 = vpop.eup %6237  ;;  %v3090_v22 = vmul.f32 %v3062_v54, %v2978_v23  ;;  %v2987_v4 = vmul.f32 0.5, %v8015_v60  ;;  %v2991_v51 = vmul.f32 0.5, %v8028_v61  ;;  %v6079_v57 = vld [vmem:[%s6835_s23 + $0xa4] ss:$24 sps:$4 sm:$0xff]   ;;  %v6074_v60 = vld [vmem:[%s6835_s23 + $0x3c8] ss:$24 sps:$4 sm:$0xff]  }
 0x3e3   : > { %6249 = verf.f32 %v3023_v50  ;;  %4493 = vmatmul.mubr.bf16.vlgmr.msra.gmra.mxu0 %v7916_v48  ;;  %v3066_v5 = vadd.f32 1.0, %v6238_v35  ;;  %4421 = vmatprep.mubr.bf16.mxu1 %v8046_v14  ;;  %v3091_v2 = vmul.f32 %v3063_v13, %v2979_v9  ;;  %v6077_v61 = vld [vmem:[%s6835_s23 + $0xa0] ss:$24 sps:$4 sm:$0xff]   ;;  %v2995_v42 = vmul.f32 0.5, %v8040_v44  ;;  %v6085_v35 = vld [vmem:[%s6835_s23 + $0x74] ss:$24 sps:$4 sm:$0xff]  }
 0x3e4   : > { %v6240_v37 = vpop.eup %6239  ;;  %6251 = verf.f32 %v3022_v24  ;;  %4502 = vmatprep.mubr.bf16.mxu0 %v7928_v33  ;;  %4603 = vmatpush1.bf16.msra.mxu0 %v6053_v20  ;;  %v6080_v13 = vld [vmem:[%s6835_s23 + $0x398] ss:$24 sps:$4 sm:$0xff]  }
 0x3e5   : > { %v3067_v6 = vadd.f32 1.0, %v6240_v37  ;;  %4604 = vmatprep.subr.bf16.mxu0 %v6061_v15  ;;  %v3094_v28 = vmul.f32 %v3066_v5, %v2982_v39  ;;  %4422 = vmatmul.mubr.bf16.vlgmr.msra.gmra.mxu1 %v8038_v63  ;;  %v6082_v15 = vld [vmem:[%s6835_s23 + $0x39c] ss:$24 sps:$4 sm:$0xff]   ;;  %v6088_v37 = vld [vmem:[%s6835_s23 + $0x36c] ss:$24 sps:$4 sm:$0xff]   ;;  %v2994_v5 = vmul.f32 0.5, %v8036_v56 }
 0x3e6   : > { %v6242_v62 = vpop.eup %6241  ;;  %4532 = vmatpush1.bf16.msra.mxu1 %v6056_v10  ;;  %v6091_v39 = vld [vmem:[%s6835_s23 + $0x44] ss:$24 sps:$4 sm:$0xff]   ;;  %v6089_v9 = vld [vmem:[%s6835_s23 + $0x40] ss:$24 sps:$4 sm:$0xff]  }
 0x3e7   : > { %v3095_v30 = vmul.f32 %v3067_v6, %v2983_v49  ;;  %4533 = vmatprep.subr.bf16.mxu1 %v6064_v27  ;;  %v8062_v16 = vpack.c.bf16 %v3094_v28, %v3090_v22  ;;  %v3070_v18 = vadd.f32 1.0, %v6242_v62  ;;  %v6086_v27 = vld [vmem:[%s6835_s23 + $0x368] ss:$24 sps:$4 sm:$0xff]   ;;  %v6094_v6 = vld [vmem:[%s6835_s23 + $0x33c] ss:$24 sps:$4 sm:$0xff]  }
 0x3e8   : > { %4605 = vmatpush1.bf16.msra.mxu0 %v6059_v36  ;;  %v6244_v45 = vpop.eup %6243  ;;  %v6083_v36 = vld [vmem:[%s6835_s23 + $0x70] ss:$24 sps:$4 sm:$0xff]   ;;  %v6100_v62 = vld [vmem:[%s6835_s23 + $0x30c] ss:$24 sps:$4 sm:$0xff]  }
 0x3e9   : > { %4606 = vmatprep.subr.bf16.mxu0 %v6067_v7  ;;  %v8064_v59 = vpack.c.bf16 %v3095_v30, %v3091_v2  ;;  %v3071_v58 = vadd.f32 1.0, %v6244_v45  ;;  %v3098_v21 = vmul.f32 %v3070_v18, %v2986_v32  ;;  %v6097_v7 = vld [vmem:[%s6835_s23 + $0x14] ss:$24 sps:$4 sm:$0xff]   ;;  %v6092_v56 = vld [vmem:[%s6835_s23 + $0x338] ss:$24 sps:$4 sm:$0xff]  }
 0x3ea   : > { %4534 = vmatpush1.bf16.msra.mxu1 %v6062_v40  ;;  %v6095_v28 = vld [vmem:[%s6835_s23 + $0x10] ss:$24 sps:$4 sm:$0xff]   ;;  %v6103_v2 = vld [vmem:[%s6835_s23 + $0x2e4] ss:$24 sps:$4 sm:$0xff]  }
 0x3eb   : > { %v6246_v25 = vpop.eup %6245  ;;  %4503 = vmatmul.mubr.bf16.gmra.mxu0 %v7931_v29  ;;  %4431 = vmatprep.mubr.bf16.mxu1 %v8064_v59  ;;  %v3099_v0 = vmul.f32 %v3071_v58, %v2987_v4  ;;  %v6098_v30 = vld [vmem:[%s6835_s23 + $0x308] ss:$24 sps:$4 sm:$0xff]   ;;  %v6106_v40 = vld [vmem:[%s6835_s23 + $0x5dc] ss:$24 sps:$4 sm:$0xff]   ;;  %v6104_v45 = vld [vmem:[%s6835_s23 + $0x5d8] ss:$24 sps:$4 sm:$0xff]  }
 0x3ec   : > { %v6248_v17 = vpop.eup %6247  ;;  %v3074_v8 = vadd.f32 1.0, %v6246_v25  ;;  %4512 = vmatprep.mubr.bf16.mxu0 %v7945_v47  ;;  %4607 = vmatpush1.bf16.msra.mxu0 %v6065_v41  ;;  %v6109_v41 = vld [vmem:[%s6835_s23 + $0x2b4] ss:$24 sps:$4 sm:$0xff]   ;;  %v6110_v25 = vld [vmem:[%s6835_s23 + $0x5a8] ss:$24 sps:$4 sm:$0xff]  }
 0x3ed   : > { %v3075_v3 = vadd.f32 1.0, %v6248_v17  ;;  %4535 = vmatprep.subr.bf16.mxu1 %v6070_v43  ;;  %4432 = vmatmul.mubr.bf16.gmra.mxu1 %v8062_v16  ;;  %v6107_v43 = vld [vmem:[%s6835_s23 + $0x2b0] ss:$24 sps:$4 sm:$0xff]   ;;  %v6112_v18 = vld [vmem:[%s6835_s23 + $0x5ac] ss:$24 sps:$4 sm:$0xff]  }
 0x3ee   : > { %v3102_v1 = vmul.f32 %v3074_v8, %v2990_v11  ;;  %4608 = vmatprep.subr.bf16.mxu0 %v6073_v34  ;;  %4536 = vmatpush1.bf16.msra.mxu1 %v6068_v12  ;;  %v6115_v34 = vld [vmem:[%s6835_s23 + $0x284] ss:$24 sps:$4 sm:$0xff]   ;;  %v6113_v58 = vld [vmem:[%s6835_s23 + $0x280] ss:$24 sps:$4 sm:$0xff]   ;;  %v6119_v32 = vld [vmem:[%s6835_s23 + $0x250] ss:$24 sps:$4 sm:$0xff]  }
 0x3ef   : > { %v3103_v52 = vmul.f32 %v3075_v3, %v2991_v51  ;;  %4537 = vmatprep.subr.bf16.mxu1 %v6076_v55  ;;  %v6118_v12 = vld [vmem:[%s6835_s23 + $0x57c] ss:$24 sps:$4 sm:$0xff]   ;;  %v6116_v17 = vld [vmem:[%s6835_s23 + $0x578] ss:$24 sps:$4 sm:$0xff]   ;;  %v6124_v11 = vld [vmem:[%s6835_s23 + $0x54c] ss:$24 sps:$4 sm:$0xff]  }
 0x3f0   : > { %v6250_v24 = vpop.eup %6249  ;;  %4609 = vmatpush1.bf16.msra.mxu0 %v6071_v26  ;;  %v8082_v20 = vpack.c.bf16 %v3102_v1, %v3098_v21  ;;  %v6121_v26 = vld [vmem:[%s6835_s23 + $0x254] ss:$24 sps:$4 sm:$0xff]   ;;  %v6127_v8 = vld [vmem:[%s6835_s23 + $0x224] ss:$24 sps:$4 sm:$0xff]   ;;  %v6122_v55 = vld [vmem:[%s6835_s23 + $0x548] ss:$24 sps:$4 sm:$0xff]  }
 0x3f1   : > { %v6252_v53 = vpop.eup %6251  ;;  %4610 = vmatprep.subr.bf16.mxu0 %v6079_v57  ;;  %v8085_v50 = vpack.c.bf16 %v3103_v52, %v3099_v0  ;;  %v3079_v54 = vadd.f32 1.0, %v6250_v24  ;;  %v6125_v4 = vld [vmem:[%s6835_s23 + $0x220] ss:$24 sps:$4 sm:$0xff]   ;;  %v6130_v51 = vld [vmem:[%s6835_s23 + $0x51c] ss:$24 sps:$4 sm:$0xff]  }
 0x3f2   : > { %4538 = vmatpush1.bf16.msra.mxu1 %v6074_v60  ;;  %v3078_v44 = vadd.f32 1.0, %v6252_v53  ;;  %v6133_v3 = vld [vmem:[%s6835_s23 + $0x1f4] ss:$24 sps:$4 sm:$0xff]   ;;  %v6128_v57 = vld [vmem:[%s6835_s23 + $0x518] ss:$24 sps:$4 sm:$0xff]  }
 0x3f3   : > { %4513 = vmatmul.mubr.bf16.gmra.mxu0 %v7942_v19  ;;  %v3107_v10 = vmul.f32 %v3079_v54, %v2995_v42  ;;  %4441 = vmatprep.mubr.bf16.mxu1 %v8085_v50  ;;  %v6131_v21 = vld [vmem:[%s6835_s23 + $0x1f0] ss:$24 sps:$4 sm:$0xff]   ;;  %v6136_v1 = vld [vmem:[%s6835_s23 + $0x4ec] ss:$24 sps:$4 sm:$0xff]   ;;  %v6137_v60 = vld [vmem:[%s6835_s23 + $0x1c0] ss:$24 sps:$4 sm:$0xff]  }
 0x3f4   : > { %4522 = vmatprep.mubr.bf16.mxu0 %v7952_v31  ;;  %4611 = vmatpush1.bf16.msra.mxu0 %v6077_v61  ;;  %v3106_v49 = vmul.f32 %v3078_v44, %v2994_v5  ;;  %v6139_v0 = vld [vmem:[%s6835_s23 + $0x1c4] ss:$24 sps:$4 sm:$0xff]   ;;  %v6134_v52 = vld [vmem:[%s6835_s23 + $0x4e8] ss:$24 sps:$4 sm:$0xff]   ;;  %v6145_v61 = vld [vmem:[%s6835_s23 + $0x194] ss:$24 sps:$4 sm:$0xff]  }
 0x3f5   : > { %4539 = vmatprep.subr.bf16.mxu1 %v6082_v15  ;;  %v8095_v23 = vpack.c.bf16 %v3107_v10, %v3107_v10  ;;  %4442 = vmatmul.mubr.bf16.gmra.mxu1 %v8082_v20  ;;  %v6142_v24 = vld [vmem:[%s6835_s23 + $0x4bc] ss:$24 sps:$4 sm:$0xff]   ;;  %v6140_v53 = vld [vmem:[%s6835_s23 + $0x4b8] ss:$24 sps:$4 sm:$0xff]   ;;  %v6148_v15 = vld [vmem:[%s6835_s23 + $0x48c] ss:$24 sps:$4 sm:$0xff]  }
 0x3f6   : > { %4612 = vmatprep.subr.bf16.mxu0 %v6085_v35  ;;  %4540 = vmatpush1.bf16.msra.mxu1 %v6080_v13  ;;  %v8108_v22 = vpack.c.bf16 %v3106_v49, %v3106_v49  ;;  %v6143_v42 = vld [vmem:[%s6835_s23 + $0x190] ss:$24 sps:$4 sm:$0xff]   ;;  %v6151_v35 = vld [vmem:[%s6835_s23 + $0x464] ss:$24 sps:$4 sm:$0xff]   ;;  %v6149_v13 = vld [vmem:[%s6835_s23 + $0x460] ss:$24 sps:$4 sm:$0xff]  }
 0x3f7   : > { %4451 = vmatprep.mubr.bf16.mxu1 %v8095_v23  ;;  %4541 = vmatprep.subr.bf16.mxu1 %v6088_v37  ;;  %v6146_v54 = vld [vmem:[%s6835_s23 + $0x488] ss:$24 sps:$4 sm:$0xff]   ;;  %v6154_v10 = vld [vmem:[%s6835_s23 + $0x434] ss:$24 sps:$4 sm:$0xff]   ;;  %v6157_v37 = vld [vmem:[%s6835_s23 + $0x404] ss:$24 sps:$4 sm:$0xff]  }
 0x3f8   : > { %4613 = vmatpush1.bf16.msra.mxu0 %v6083_v36  ;;  %v6152_v36 = vld [vmem:[%s6835_s23 + $0x430] ss:$24 sps:$4 sm:$0xff]   ;;  %v6175_v49 = vld [vmem:[%s6835_s23 + $0x5e4] ss:$24 sps:$4 sm:$0xff]  }
 0x3f9   : > { %4614 = vmatprep.subr.bf16.mxu0 %v6091_v39  ;;  %v6158_v44 = vld [vmem:[%s6835_s23 + $0x3d0] ss:$24 sps:$4 sm:$0xff]   ;;  %v6163_v39 = vld [vmem:[%s6835_s23 + $0x3a4] ss:$24 sps:$4 sm:$0xff]  }
 0x3fa   : > { %4542 = vmatpush1.bf16.msra.mxu1 %v6086_v27  ;;  %v6164_v5 = vld [vmem:[%s6835_s23 + $0x370] ss:$24 sps:$4 sm:$0xff]   ;;  %v6169_v27 = vld [vmem:[%s6835_s23 + $0x344] ss:$24 sps:$4 sm:$0xff]  }
 0x3fb   : > { %4523 = vmatmul.mubr.bf16.gmra.mxu0 %v7958_v38  ;;  %4543 = vmatprep.subr.bf16.mxu1 %v6094_v6  ;;  %v6173_v6 = vld [vmem:[%s6835_s23 + $0x5e0] ss:$24 sps:$4 sm:$0xff]  }
 0x3fc   : > { %4615 = vmatpush1.bf16.msra.mxu0 %v6089_v9  ;;  %4634 = vmatprep.mubr.bf16.mxu0 %v7913_v46  ;;  %v6101_v46 = vld [vmem:[%s6835_s23 + $0x2e0] ss:$24 sps:$4 sm:$0xff]   ;;  %v6170_v9 = vld [vmem:[%s6835_s23 + $0x310] ss:$24 sps:$4 sm:$0xff]  }
 0x3fd   : > { %4616 = vmatprep.subr.bf16.mxu0 %v6097_v7  ;;  %4452 = vmatmul.mubr.bf16.gmra.mxu1 %v8108_v22  ;;  %v6176_v7 = vld [vmem:[%s6835_s23 + $0x5b0] ss:$24 sps:$4 sm:$0xff]  }
 0x3fe   : > { %4544 = vmatpush1.bf16.msra.mxu1 %v6092_v56  ;;  %4563 = vmatprep.mubr.bf16.mxu1 %v8046_v14  ;;  %v6181_v56 = vld [vmem:[%s6835_s23 + $0x584] ss:$24 sps:$4 sm:$0xff]  }
 0x3ff   : > { %4545 = vmatprep.subr.bf16.mxu1 %v6100_v62  ;;  %v6182_v62 = vld [vmem:[%s6835_s23 + $0x550] ss:$24 sps:$4 sm:$0xff]  }
 0x400   : > { %4617 = vmatpush1.bf16.msra.mxu0 %v6095_v28  ;;  %v6179_v28 = vld [vmem:[%s6835_s23 + $0x580] ss:$24 sps:$4 sm:$0xff]  }
 0x401   : > { %4618 = vmatprep.subr.bf16.mxu0 %v6103_v2  ;;  %v6187_v2 = vld [vmem:[%s6835_s23 + $0x524] ss:$24 sps:$4 sm:$0xff]  }
 0x402   : > { %4546 = vmatpush1.bf16.msra.mxu1 %v6098_v30  ;;  %v6185_v30 = vld [vmem:[%s6835_s23 + $0x520] ss:$24 sps:$4 sm:$0xff]  }
 0x403   : > { %4547 = vmatprep.subr.bf16.mxu1 %v6106_v40  ;;  %v6188_v40 = vld [vmem:[%s6835_s23 + $0x4f0] ss:$24 sps:$4 sm:$0xff]  }
 0x404   : > { %4619 = vmatpush2.bf16.msra.mxu0 %v6101_v46  ;;  %v6190_v46 = vld [vmem:[%s6835_s23 + $0x4f4] ss:$24 sps:$4 sm:$0xff]  }
 0x405   : > { %4620 = vmatprep.subr.bf16.mxu0 %v6109_v41  ;;  %v6193_v41 = vld [vmem:[%s6835_s23 + $0x4c4] ss:$24 sps:$4 sm:$0xff]  }
 0x406   : > { %4548 = vmatpush2.bf16.msra.mxu1 %v6104_v45  ;;  %v6191_v45 = vld [vmem:[%s6835_s23 + $0x4c0] ss:$24 sps:$4 sm:$0xff]  }
 0x407   : > { %4549 = vmatprep.subr.bf16.mxu1 %v6112_v18  ;;  %v6194_v18 = vld [vmem:[%s6835_s23 + $0x490] ss:$24 sps:$4 sm:$0xff]  }
 0x408   : > { %4621 = vmatpush2.bf16.msra.mxu0 %v6107_v43  ;;  %v6196_v43 = vld [vmem:[%s6835_s23 + $0x494] ss:$24 sps:$4 sm:$0xff]  }
 0x409   : > { %4622 = vmatprep.subr.bf16.mxu0 %v6115_v34 }
 0x40a   : > { %4550 = vmatpush2.bf16.msra.mxu1 %v6110_v25 }
 0x40b   : > { %4551 = vmatprep.subr.bf16.mxu1 %v6118_v12 }
 0x40c   : > { %4623 = vmatpush2.bf16.msra.mxu0 %v6113_v58 }
 0x40d   : > { %4624 = vmatprep.subr.bf16.mxu0 %v6121_v26 }
 0x40e   : > { %4552 = vmatpush2.bf16.msra.mxu1 %v6116_v17 }
 0x40f   : > { %4553 = vmatprep.subr.bf16.mxu1 %v6124_v11 }
 0x410   : > { %4625 = vmatpush2.bf16.msra.mxu0 %v6119_v32 }
 0x411   : > { %4626 = vmatprep.subr.bf16.mxu0 %v6127_v8 }
 0x412   : > { %4554 = vmatpush2.bf16.msra.mxu1 %v6122_v55 }
 0x413   : > { %4555 = vmatprep.subr.bf16.mxu1 %v6130_v51 }
 0x414   : > { %4627 = vmatpush2.bf16.msra.mxu0 %v6125_v4 }
 0x415   : > { %4628 = vmatprep.subr.bf16.mxu0 %v6133_v3 }
 0x416   : > { %4556 = vmatpush2.bf16.msra.mxu1 %v6128_v57 }
 0x417   : > { %4557 = vmatprep.subr.bf16.mxu1 %v6136_v1 }
 0x418   : > { %4629 = vmatpush2.bf16.msra.mxu0 %v6131_v21  ;;  %v3108_v21 = vld [vmem:[#allocation15] sm:$0xff] }
 0x419   : > { %4630 = vmatprep.subr.bf16.mxu0 %v6139_v0  ;;  %v3109_v0 = vld [vmem:[#allocation15 + $0x8] sm:$0xff] }
 0x41a   : > { %4558 = vmatpush2.bf16.msra.mxu1 %v6134_v52 }
 0x41b   : > { %4559 = vmatprep.subr.bf16.mxu1 %v6142_v24 }
 0x41c   : > { %4631 = vmatpush2.bf16.msra.mxu0 %v6137_v60 }
 0x41d   : > { %4632 = vmatprep.subr.bf16.mxu0 %v6145_v61 }
 0x41e   : > { %4560 = vmatpush2.bf16.msra.mxu1 %v6140_v53  ;;  %v3114_v53 = vld [vmem:[#allocation15 + $0x30] sm:$0xff] }
 0x41f   : > { %4561 = vmatprep.subr.bf16.mxu1 %v6148_v15 }
 0x420   : > { %4633 = vmatpush2.bf16.msra.mxu0 %v6143_v42 }
 0x422   : > { %4562 = vmatpush2.bf16.msra.mxu1 %v6146_v54 }
 0x423   : > { %4635 = vmatmul.mubr.bf16.vlgmr.msra.gmra.mxu0 %v7916_v48  ;;  %4673 = vmatprep.subr.bf16.mxu1 %v6151_v35  ;;  %v6155_v48 = vld [vmem:[%s6835_s23 + $0x400] ss:$24 sps:$4 sm:$0xff]  }
 0x424   : > { %4644 = vmatprep.mubr.bf16.mxu0 %v7928_v33  ;;  %v6160_v33 = vld [vmem:[%s6835_s23 + $0x3d4] ss:$24 sps:$4 sm:$0xff]   ;;  %v3115_v35 = vld [vmem:[#allocation15 + $0x38] sm:$0xff] }
 0x425   : > { %4564 = vmatmul.mubr.bf16.vlgmr.msra.gmra.mxu1 %v8038_v63 }
 0x426   : > { %4573 = vmatprep.mubr.bf16.mxu1 %v8064_v59  ;;  %4674 = vmatpush1.bf16.msra.mxu1 %v6149_v13 }
 0x427   : > { %4675 = vmatprep.subr.bf16.mxu1 %v6154_v10 }
 0x42a   : > { %4676 = vmatpush1.bf16.msra.mxu1 %v6152_v36 }
 0x42b   : > { %4645 = vmatmul.mubr.bf16.gmra.mxu0 %v7931_v29  ;;  %4677 = vmatprep.subr.bf16.mxu1 %v6157_v37  ;;  %v6161_v29 = vld [vmem:[%s6835_s23 + $0x3a0] ss:$24 sps:$4 sm:$0xff]  }
 0x42c   : > { %4654 = vmatprep.mubr.bf16.mxu0 %v7945_v47  ;;  %v6166_v47 = vld [vmem:[%s6835_s23 + $0x374] ss:$24 sps:$4 sm:$0xff]  }
 0x42d   : > { %4574 = vmatmul.mubr.bf16.gmra.mxu1 %v8062_v16 }
 0x42e   : > { %4583 = vmatprep.mubr.bf16.mxu1 %v8085_v50  ;;  %4678 = vmatpush1.bf16.msra.mxu1 %v6155_v48  ;;  %v3120_v48 = vld [vmem:[#allocation15 + $0x60] sm:$0xff] }
 0x42f   : > { %4679 = vmatprep.subr.bf16.mxu1 %v6160_v33 }
 0x432   : > { %4680 = vmatpush1.bf16.msra.mxu1 %v6158_v44 }
 0x433   : > { %4655 = vmatmul.mubr.bf16.gmra.mxu0 %v7942_v19  ;;  %4681 = vmatprep.subr.bf16.mxu1 %v6163_v39  ;;  %v6167_v19 = vld [vmem:[%s6835_s23 + $0x340] ss:$24 sps:$4 sm:$0xff]  }
 0x434   : > { %4664 = vmatprep.mubr.bf16.mxu0 %v7952_v31  ;;  %v6172_v31 = vld [vmem:[%s6835_s23 + $0x314] ss:$24 sps:$4 sm:$0xff]  }
 0x435   : > { %4584 = vmatmul.mubr.bf16.gmra.mxu1 %v8082_v20 }
 0x436   : > { %4593 = vmatprep.mubr.bf16.mxu1 %v8095_v23  ;;  %4682 = vmatpush1.bf16.msra.mxu1 %v6161_v29 }
 0x437   : > { %4683 = vmatprep.subr.bf16.mxu1 %v6166_v47  ;;  %v3121_v47 = vld [vmem:[#allocation15 + $0x68] sm:$0xff] }
 0x43a   : > { %4684 = vmatpush1.bf16.msra.mxu1 %v6164_v5 }
 0x43b   : > { %4665 = vmatmul.mubr.bf16.gmra.mxu0 %v7958_v38  ;;  %4685 = vmatprep.subr.bf16.mxu1 %v6169_v27  ;;  %v6178_v38 = vld [vmem:[%s6835_s23 + $0x5b4] ss:$24 sps:$4 sm:$0xff]  }
 0x43d   : > { %4594 = vmatmul.mubr.bf16.gmra.mxu1 %v8108_v22 }
 0x43e   : > { %4686 = vmatpush1.bf16.msra.mxu1 %v6167_v19  ;;  %4705 = vmatprep.mubr.bf16.mxu1 %v8046_v14  ;;  %v6184_v14 = vld [vmem:[%s6835_s23 + $0x554] ss:$24 sps:$4 sm:$0xff]  }
 0x43f   : > { %4687 = vmatprep.subr.bf16.mxu1 %v6172_v31 }
 0x442   : > { %4688 = vmatpush1.bf16.msra.mxu1 %v6170_v9  ;;  %v3126_v9 = vld [vmem:[#allocation15 + $0x90] sm:$0xff] }
 0x443   : > { %4689 = vmatprep.subr.bf16.mxu1 %v6175_v49 }
 0x446   : > { %4690 = vmatpush2.bf16.msra.mxu1 %v6173_v6 }
 0x447   : > { %4691 = vmatprep.subr.bf16.mxu1 %v6178_v38 }
 0x44a   : > { %4692 = vmatpush2.bf16.msra.mxu1 %v6176_v7 }
 0x44b   : > { %4693 = vmatprep.subr.bf16.mxu1 %v6181_v56  ;;  %v3127_v56 = vld [vmem:[#allocation15 + $0x98] sm:$0xff] }
 0x44e   : > { %4694 = vmatpush2.bf16.msra.mxu1 %v6179_v28 }
 0x44f   : > { %4695 = vmatprep.subr.bf16.mxu1 %v6184_v14 }
 0x452   : > { %4696 = vmatpush2.bf16.msra.mxu1 %v6182_v62 }
 0x453   : > { %4697 = vmatprep.subr.bf16.mxu1 %v6187_v2 }
 0x456   : > { %4698 = vmatpush2.bf16.msra.mxu1 %v6185_v30  ;;  %v3132_v30 = vld [vmem:[#allocation15 + $0xc0] sm:$0xff] }
 0x457   : > { %4699 = vmatprep.subr.bf16.mxu1 %v6190_v46 }
 0x45a   : > { %4700 = vmatpush2.bf16.msra.mxu1 %v6188_v40 }
 0x45b   : > { %4701 = vmatprep.subr.bf16.mxu1 %v6193_v41 }
 0x45e   : > { %4702 = vmatpush2.bf16.msra.mxu1 %v6191_v45 }
 0x45f   : > { %4703 = vmatprep.subr.bf16.mxu1 %v6196_v43  ;;  %v3133_v43 = vld [vmem:[#allocation15 + $0xc8] sm:$0xff] }
 0x462   : > { %v4352_v34 = vpop.f32.mrf.mxu0  ;;  %4704 = vmatpush2.bf16.msra.mxu1 %v6194_v18 }
 0x464   : > { %v4354_v25 = vpop.f32.mrf.mxu0 }
 0x465   : > { %4706 = vmatmul.mubr.bf16.vlgmr.msra.gmra.mxu1 %v8038_v63 }
 0x466   : > { %v4356_v58 = vpop.f32.mrf.mxu0  ;;  %4715 = vmatprep.mubr.bf16.mxu1 %v8064_v59 }
 0x468   : > { %v4358_v12 = vpop.f32.mrf.mxu0 }
 0x46a   : > { %v4362_v26 = vpop.f32.mrf.mxu0 }
 0x46c   : > { %v4364_v17 = vpop.f32.mrf.mxu0 }
 0x46d   : > { %4716 = vmatmul.mubr.bf16.gmra.mxu1 %v8062_v16 }
 0x46e   : > { %v4366_v32 = vpop.f32.mrf.mxu0  ;;  %4725 = vmatprep.mubr.bf16.mxu1 %v8085_v50 }
 0x470   : > { %v4368_v11 = vpop.f32.mrf.mxu0 }
 0x473   : > { %v4372_v8 = vpop.f32.mrf.mxu0 }
 0x475   : > { %v8198_v55 = vpop.f32.mrf.mxu0  ;;  %4726 = vmatmul.mubr.bf16.gmra.mxu1 %v8082_v20 }
 0x476   : > { %4735 = vmatprep.mubr.bf16.mxu1 %v8095_v23 }
 0x477   : > { %v8202_v63 = vpop.f32.mrf.mxu0 }
 0x479   : > { %v8204_v4 = vpop.f32.mrf.mxu0 }
 0x47b   : > { %v8206_v59 = vpop.f32.mrf.mxu0 }
 0x47d   : > { %v8208_v51 = vpop.f32.mrf.mxu0  ;;  %4736 = vmatmul.mubr.bf16.gmra.mxu1 %v8108_v22 }
 0x47f   : > { %v4386_v16 = vpop.f32.mrf.mxu0 }
 0x480   : > { %v3139_v16 = vld [vmem:[#allocation15 + $0xf8] sm:$0xff] }
 0x481   : > { %v4387_v50 = vpop.f32.mrf.mxu0 }
 0x4a3   : > { %v8211_v3 = vpop.f32.mrf.mxu0 }
 0x4a5   : > { %v8213_v57 = vpop.f32.mrf.mxu0  ;;  %v4423_v20 = vpop.f32.mrf.mxu1 }
 0x4a6   : > { %v4424_v1 = vadd.f32 %v4423_v20, %v4352_v34 }
 0x4a7   : > { %v8215_v23 = vpop.f32.mrf.mxu0  ;;  %v4425_v52 = vpop.f32.mrf.mxu1 }
 0x4a8   : > { %v4744_v60 = vadd.f32 %v4424_v1, %v3108_v21  ;;  %v4426_v24 = vadd.f32 %v4425_v52, %v4354_v25  ;;  %v3144_v1 = vld [vmem:[#allocation15 + $0x120] sm:$0x1] }
 0x4a9   : > { %v8217_v61 = vpop.f32.mrf.mxu0  ;;  %v4427_v42 = vpop.f32.mrf.mxu1 }
 0x4aa   : > { %4786 = vst [vmem:[#allocation15] sm:$0xff] %v4744_v60  ;;  %v4745_v22 = vadd.f32 %v4426_v24, %v3109_v0  ;;  %v4428_v15 = vadd.f32 %v4427_v42, %v4356_v58  ;;  %v3145_v24 = vld [vmem:[#allocation15 + $0x128] sm:$0x1] }
 0x4ab   : > { %v8219_v54 = vpop.f32.mrf.mxu0  ;;  %v4429_v13 = vpop.f32.mrf.mxu1 }
 0x4ac   : > { %4787 = vst [vmem:[#allocation15 + $0x8] sm:$0xff] %v4745_v22  ;;  %v4750_v10 = vadd.f32 %v4428_v15, %v3114_v53  ;;  %v4430_v36 = vadd.f32 %v4429_v13, %v4358_v12  ;;  %v3138_v12 = vld [vmem:[#allocation15 + $0xf0] sm:$0xff] }
 0x4ad   : > { %v8221_v37 = vpop.f32.mrf.mxu0  ;;  %v4433_v33 = vpop.f32.mrf.mxu1 }
 0x4ae   : > { %4792 = vst [vmem:[#allocation15 + $0x30] sm:$0xff] %v4750_v10  ;;  %v4751_v44 = vadd.f32 %v4430_v36, %v3115_v35  ;;  %v4434_v39 = vadd.f32 %v4433_v33, %v4362_v26  ;;  %v3110_v36 = vld [vmem:[#allocation15 + $0x10] sm:$0xff] }
 0x4af   : > { %v8223_v29 = vpop.f32.mrf.mxu0  ;;  %v4435_v5 = vpop.f32.mrf.mxu1 }
 0x4b0   : > { %4793 = vst [vmem:[#allocation15 + $0x38] sm:$0xff] %v4751_v44  ;;  %v4756_v27 = vadd.f32 %v4434_v39, %v3120_v48  ;;  %v4436_v19 = vadd.f32 %v4435_v5, %v4364_v17  ;;  %v3111_v44 = vld [vmem:[#allocation15 + $0x18] sm:$0xff] }
 0x4b1   : > { %v8225_v31 = vpop.f32.mrf.mxu0  ;;  %v4437_v49 = vpop.f32.mrf.mxu1 }
 0x4b2   : > { %4798 = vst [vmem:[#allocation15 + $0x60] sm:$0xff] %v4756_v27  ;;  %v4757_v6 = vadd.f32 %v4436_v19, %v3121_v47  ;;  %v4438_v38 = vadd.f32 %v4437_v49, %v4366_v32  ;;  %v3116_v27 = vld [vmem:[#allocation15 + $0x40] sm:$0xff] }
 0x4b3   : > { %v8227_v7 = vpop.f32.mrf.mxu0  ;;  %v4439_v28 = vpop.f32.mrf.mxu1 }
 0x4b4   : > { %4799 = vst [vmem:[#allocation15 + $0x68] sm:$0xff] %v4757_v6  ;;  %v4762_v14 = vadd.f32 %v4438_v38, %v3126_v9  ;;  %v4440_v62 = vadd.f32 %v4439_v28, %v4368_v11  ;;  %v3117_v38 = vld [vmem:[#allocation15 + $0x48] sm:$0xff] }
 0x4b5   : > { %v8229_v2 = vpop.f32.mrf.mxu0  ;;  %v4443_v46 = vpop.f32.mrf.mxu1 }
 0x4b6   : > { %4804 = vst [vmem:[#allocation15 + $0x90] sm:$0xff] %v4762_v14  ;;  %v4763_v40 = vadd.f32 %v4440_v62, %v3127_v56  ;;  %v4444_v41 = vadd.f32 %v4443_v46, %v4372_v8  ;;  %v3122_v62 = vld [vmem:[#allocation15 + $0x70] sm:$0xff] }
 0x4b7   : > { %v8231_v45 = vpop.f32.mrf.mxu0  ;;  %v4445_v18 = vpop.f32.mrf.mxu1 }
 0x4b8   : > { %4805 = vst [vmem:[#allocation15 + $0x98] sm:$0xff] %v4763_v40  ;;  %v4768_v34 = vadd.f32 %v4444_v41, %v3132_v30  ;;  %v4446_v25 = vadd.f32 %v4445_v18, %v8198_v55  ;;  %v3123_v41 = vld [vmem:[#allocation15 + $0x78] sm:$0xff] }
 0x4b9   : > { %v8234_v58 = vpop.f32.mrf.mxu0  ;;  %v4447_v26 = vpop.f32.mrf.mxu1 }
 0x4ba   : > { %4810 = vst [vmem:[#allocation15 + $0xc0] sm:$0xff] %v4768_v34  ;;  %v4769_v17 = vadd.f32 %v4446_v25, %v3133_v43  ;;  %v4448_v32 = vadd.f32 %v4447_v26, %v8202_v63  ;;  %v3128_v25 = vld [vmem:[#allocation15 + $0xa0] sm:$0xff] }
 0x4bb   : > { %v8237_v11 = vpop.f32.mrf.mxu0  ;;  %v4449_v8 = vpop.f32.mrf.mxu1 }
 0x4bc   : > { %4811 = vst [vmem:[#allocation15 + $0xc8] sm:$0xff] %v4769_v17  ;;  %v4774_v50 = vadd.f32 %v4448_v32, %v3138_v12  ;;  %v4450_v21 = vadd.f32 %v4449_v8, %v8204_v4  ;;  %v3129_v32 = vld [vmem:[#allocation15 + $0xa8] sm:$0xff] }
 0x4bd   : > { %v8240_v20 = vpop.f32.mrf.mxu0  ;;  %v4453_v55 = vpop.f32.mrf.mxu1 }
 0x4be   : > { %4816 = vst [vmem:[#allocation15 + $0xf0] sm:$0xff] %v4774_v50  ;;  %v4775_v0 = vadd.f32 %v4450_v21, %v3139_v16  ;;  %v4454_v52 = vadd.f32 %v4453_v55, %v8206_v59  ;;  %v3134_v21 = vld [vmem:[#allocation15 + $0xd0] sm:$0xff] }
 0x4bf   : > { %v4528_v60 = vpop.f32.mrf.mxu0  ;;  %v4455_v53 = vpop.f32.mrf.mxu1 }
 0x4c0   : > { %4817 = vst [vmem:[#allocation15 + $0xf8] sm:$0xff] %v4775_v0  ;;  %v4780_v63 = vadd.f32 %v4454_v52, %v3144_v1  ;;  %v4456_v42 = vadd.f32 %v4455_v53, %v8208_v51  ;;  %v3135_v52 = vld [vmem:[#allocation15 + $0xd8] sm:$0xff] }
 0x4c1   : > { %v4529_v22 = vpop.f32.mrf.mxu0  ;;  %v4457_v15 = vpop.f32.mrf.mxu1 }
 0x4c2   : > { %4822 = vst [vmem:[#allocation15 + $0x120] sm:$0x1] %v4780_v63  ;;  %v4781_v35 = vadd.f32 %v4456_v42, %v3145_v24  ;;  %v3140_v63 = vld [vmem:[#allocation15 + $0x100] sm:$0xff] }
 0x4c3   : > { %v4458_v4 = vpop.f32.mrf.mxu1 }
 0x4c4   : > { %4823 = vst [vmem:[#allocation15 + $0x128] sm:$0x1] %v4781_v35  ;;  %v3141_v35 = vld [vmem:[#allocation15 + $0x108] sm:$0xff] }
 0x4e3   : > { %v8244_v13 = vpop.f32.mrf.mxu0 }
 0x4e5   : > { %v8246_v10 = vpop.f32.mrf.mxu0  ;;  %v4565_v48 = vpop.f32.mrf.mxu1 }
 0x4e6   : > { %v4566_v59 = vadd.f32 %v4565_v48, %v8211_v3 }
 0x4e7   : > { %v8249_v33 = vpop.f32.mrf.mxu0  ;;  %v4567_v39 = vpop.f32.mrf.mxu1 }
 0x4e8   : > { %v4746_v47 = vadd.f32 %v4566_v59, %v3110_v36  ;;  %v4568_v51 = vadd.f32 %v4567_v39, %v8213_v57  ;;  %v3146_v59 = vld [vmem:[#allocation15 + $0x130] sm:$0x1] }
 0x4e9   : > { %v8252_v5 = vpop.f32.mrf.mxu0  ;;  %v4569_v19 = vpop.f32.mrf.mxu1 }
 0x4ea   : > { %4788 = vst [vmem:[#allocation15 + $0x10] sm:$0xff] %v4746_v47  ;;  %v4747_v9 = vadd.f32 %v4568_v51, %v3111_v44  ;;  %v4570_v49 = vadd.f32 %v4569_v19, %v8215_v23  ;;  %v3147_v51 = vld [vmem:[#allocation15 + $0x138] sm:$0x1] }
 0x4eb   : > { %v8255_v6 = vpop.f32.mrf.mxu0  ;;  %v4571_v56 = vpop.f32.mrf.mxu1 }
 0x4ec   : > { %4789 = vst [vmem:[#allocation15 + $0x18] sm:$0xff] %v4747_v9  ;;  %v4752_v3 = vadd.f32 %v4570_v49, %v3116_v27  ;;  %v4572_v28 = vadd.f32 %v4571_v56, %v8217_v61  ;;  %v3112_v56 = vld [vmem:[#allocation15 + $0x20] sm:$0xff] }
 0x4ed   : > { %v8258_v14 = vpop.f32.mrf.mxu0  ;;  %v4575_v57 = vpop.f32.mrf.mxu1 }
 0x4ee   : > { %4794 = vst [vmem:[#allocation15 + $0x40] sm:$0xff] %v4752_v3  ;;  %v4753_v30 = vadd.f32 %v4572_v28, %v3117_v38  ;;  %v4576_v46 = vadd.f32 %v4575_v57, %v8219_v54 }
 0x4ef   : > { %v8261_v40 = vpop.f32.mrf.mxu0  ;;  %v4577_v23 = vpop.f32.mrf.mxu1 }
 0x4f0   : > { %4795 = vst [vmem:[#allocation15 + $0x48] sm:$0xff] %v4753_v30  ;;  %v4758_v43 = vadd.f32 %v4576_v46, %v3122_v62  ;;  %v4578_v18 = vadd.f32 %v4577_v23, %v8221_v37  ;;  %v3113_v62 = vld [vmem:[#allocation15 + $0x28] sm:$0xff]  ;;  %v3118_v46 = vld [vmem:[#allocation15 + $0x50] sm:$0xff] }
 0x4f1   : > { %v8264_v34 = vpop.f32.mrf.mxu0  ;;  %v4579_v61 = vpop.f32.mrf.mxu1 }
 0x4f2   : > { %4800 = vst [vmem:[#allocation15 + $0x70] sm:$0xff] %v4758_v43  ;;  %v4759_v12 = vadd.f32 %v4578_v18, %v3123_v41  ;;  %v4580_v26 = vadd.f32 %v4579_v61, %v8223_v29  ;;  %v3119_v43 = vld [vmem:[#allocation15 + $0x58] sm:$0xff] }
 0x4f3   : > { %v8267_v17 = vpop.f32.mrf.mxu0  ;;  %v4581_v54 = vpop.f32.mrf.mxu1 }
 0x4f4   : > { %4801 = vst [vmem:[#allocation15 + $0x78] sm:$0xff] %v4759_v12  ;;  %v4764_v16 = vadd.f32 %v4580_v26, %v3128_v25  ;;  %v4582_v8 = vadd.f32 %v4581_v54, %v8225_v31  ;;  %v3124_v12 = vld [vmem:[#allocation15 + $0x80] sm:$0xff]  ;;  %v3125_v54 = vld [vmem:[#allocation15 + $0x88] sm:$0xff] }
 0x4f5   : > { %v8270_v50 = vpop.f32.mrf.mxu0  ;;  %v4585_v37 = vpop.f32.mrf.mxu1 }
 0x4f6   : > { %4806 = vst [vmem:[#allocation15 + $0xa0] sm:$0xff] %v4764_v16  ;;  %v4765_v1 = vadd.f32 %v4582_v8, %v3129_v32  ;;  %v4586_v55 = vadd.f32 %v4585_v37, %v8227_v7 }
 0x4f7   : > { %v8273_v0 = vpop.f32.mrf.mxu0  ;;  %v4587_v29 = vpop.f32.mrf.mxu1 }
 0x4f8   : > { %4807 = vst [vmem:[#allocation15 + $0xa8] sm:$0xff] %v4765_v1  ;;  %v4770_v60 = vadd.f32 %v4586_v55, %v3134_v21  ;;  %v4588_v24 = vadd.f32 %v4587_v29, %v8229_v2  ;;  %v3130_v21 = vld [vmem:[#allocation15 + $0xb0] sm:$0xff]  ;;  %v3131_v55 = vld [vmem:[#allocation15 + $0xb8] sm:$0xff] }
 0x4f9   : > { %v8276_v53 = vpop.f32.mrf.mxu0  ;;  %v4589_v31 = vpop.f32.mrf.mxu1 }
 0x4fa   : > { %4812 = vst [vmem:[#allocation15 + $0xd0] sm:$0xff] %v4770_v60  ;;  %v4771_v42 = vadd.f32 %v4588_v24, %v3135_v52  ;;  %v4590_v22 = vadd.f32 %v4589_v31, %v8231_v45  ;;  %v3136_v60 = vld [vmem:[#allocation15 + $0xe0] sm:$0xff]  ;;  %v3137_v31 = vld [vmem:[#allocation15 + $0xe8] sm:$0xff] }
 0x4fb   : > { %v8279_v15 = vpop.f32.mrf.mxu0  ;;  %v4591_v7 = vpop.f32.mrf.mxu1 }
 0x4fc   : > { %4813 = vst [vmem:[#allocation15 + $0xd8] sm:$0xff] %v4771_v42  ;;  %v4776_v4 = vadd.f32 %v4590_v22, %v3140_v63  ;;  %v4592_v36 = vadd.f32 %v4591_v7, %v8234_v58 }
 0x4fd   : > { %v8282_v48 = vpop.f32.mrf.mxu0  ;;  %v4595_v2 = vpop.f32.mrf.mxu1 }
 0x4fe   : > { %4818 = vst [vmem:[#allocation15 + $0x100] sm:$0xff] %v4776_v4  ;;  %v4777_v44 = vadd.f32 %v4592_v36, %v3141_v35  ;;  %v4596_v39 = vadd.f32 %v4595_v2, %v8237_v11  ;;  %v3142_v35 = vld [vmem:[#allocation15 + $0x110] sm:$0xff]  ;;  %v3143_v36 = vld [vmem:[#allocation15 + $0x118] sm:$0xff] }
 0x4ff   : > { %v4670_v47 = vpop.f32.mrf.mxu0  ;;  %v4597_v27 = vpop.f32.mrf.mxu1 }
 0x500   : > { %4819 = vst [vmem:[#allocation15 + $0x108] sm:$0xff] %v4777_v44  ;;  %v4782_v45 = vadd.f32 %v4596_v39, %v3146_v59  ;;  %v4598_v19 = vadd.f32 %v4597_v27, %v8240_v20 }
 0x501   : > { %v4671_v9 = vpop.f32.mrf.mxu0  ;;  %v4599_v49 = vpop.f32.mrf.mxu1 }
 0x502   : > { %4824 = vst [vmem:[#allocation15 + $0x130] sm:$0x1] %v4782_v45  ;;  %v4783_v38 = vadd.f32 %v4598_v19, %v3147_v51 }
 0x503   : > { %v4600_v58 = vpop.f32.mrf.mxu1 }
 0x504   : > { %4825 = vst [vmem:[#allocation15 + $0x138] sm:$0x1] %v4783_v38 }
 0x525   : > { %v4707_v3 = vpop.f32.mrf.mxu1 }
 0x526   : > { %v4708_v28 = vadd.f32 %v4707_v3, %v8244_v13 }
 0x527   : > { %v4709_v57 = vpop.f32.mrf.mxu1 }
 0x528   : > { %v4748_v11 = vadd.f32 %v4708_v28, %v3112_v56  ;;  %v4710_v30 = vadd.f32 %v4709_v57, %v8246_v10 }
 0x529   : > { %v4711_v41 = vpop.f32.mrf.mxu1 }
 0x52a   : > { %4790 = vst [vmem:[#allocation15 + $0x20] sm:$0xff] %v4748_v11  ;;  %v4749_v23 = vadd.f32 %v4710_v30, %v3113_v62  ;;  %v4712_v20 = vadd.f32 %v4711_v41, %v8249_v33 }
 0x52b   : > { %v4713_v18 = vpop.f32.mrf.mxu1 }
 0x52c   : > { %4791 = vst [vmem:[#allocation15 + $0x28] sm:$0xff] %v4749_v23  ;;  %v4754_v25 = vadd.f32 %v4712_v20, %v3118_v46  ;;  %v4714_v61 = vadd.f32 %v4713_v18, %v8252_v5 }
 0x52d   : > { %v4717_v26 = vpop.f32.mrf.mxu1 }
 0x52e   : > { %4796 = vst [vmem:[#allocation15 + $0x50] sm:$0xff] %v4754_v25  ;;  %v4755_v13 = vadd.f32 %v4714_v61, %v3119_v43  ;;  %v4718_v32 = vadd.f32 %v4717_v26, %v8255_v6 }
 0x52f   : > { %v4719_v10 = vpop.f32.mrf.mxu1 }
 0x530   : > { %4797 = vst [vmem:[#allocation15 + $0x58] sm:$0xff] %v4755_v13  ;;  %v4760_v16 = vadd.f32 %v4718_v32, %v3124_v12  ;;  %v4720_v8 = vadd.f32 %v4719_v10, %v8258_v14 }
 0x531   : > { %v4721_v33 = vpop.f32.mrf.mxu1 }
 0x532   : > { %4802 = vst [vmem:[#allocation15 + $0x80] sm:$0xff] %v4760_v16  ;;  %v4761_v37 = vadd.f32 %v4720_v8, %v3125_v54  ;;  %v4722_v1 = vadd.f32 %v4721_v33, %v8261_v40 }
 0x533   : > { %v4723_v5 = vpop.f32.mrf.mxu1 }
 0x534   : > { %4803 = vst [vmem:[#allocation15 + $0x88] sm:$0xff] %v4761_v37  ;;  %v4766_v52 = vadd.f32 %v4722_v1, %v3130_v21  ;;  %v4724_v29 = vadd.f32 %v4723_v5, %v8264_v34 }
 0x535   : > { %v4727_v6 = vpop.f32.mrf.mxu1 }
 0x536   : > { %4808 = vst [vmem:[#allocation15 + $0xb0] sm:$0xff] %v4766_v52  ;;  %v4767_v24 = vadd.f32 %v4724_v29, %v3131_v55  ;;  %v4728_v63 = vadd.f32 %v4727_v6, %v8267_v17  ;;  %v3148_v17 = vld [vmem:[#allocation15 + $0x140] sm:$0x1] }
 0x537   : > { %v4729_v14 = vpop.f32.mrf.mxu1 }
 0x538   : > { %4809 = vst [vmem:[#allocation15 + $0xb8] sm:$0xff] %v4767_v24  ;;  %v4772_v42 = vadd.f32 %v4728_v63, %v3136_v60  ;;  %v4730_v22 = vadd.f32 %v4729_v14, %v8270_v50  ;;  %v3149_v50 = vld [vmem:[#allocation15 + $0x148] sm:$0x1] }
 0x539   : > { %v4731_v40 = vpop.f32.mrf.mxu1 }
 0x53a   : > { %4814 = vst [vmem:[#allocation15 + $0xe0] sm:$0xff] %v4772_v42  ;;  %v4773_v7 = vadd.f32 %v4730_v22, %v3137_v31  ;;  %v4732_v4 = vadd.f32 %v4731_v40, %v8273_v0 }
 0x53b   : > { %v4733_v34 = vpop.f32.mrf.mxu1 }
 0x53c   : > { %4815 = vst [vmem:[#allocation15 + $0xe8] sm:$0xff] %v4773_v7  ;;  %v4778_v59 = vadd.f32 %v4732_v4, %v3142_v35  ;;  %v4734_v2 = vadd.f32 %v4733_v34, %v8276_v53 }
 0x53d   : > { %v4737_v44 = vpop.f32.mrf.mxu1 }
 0x53e   : > { %4820 = vst [vmem:[#allocation15 + $0x110] sm:$0xff] %v4778_v59  ;;  %v4779_v39 = vadd.f32 %v4734_v2, %v3143_v36  ;;  %v4738_v47 = vadd.f32 %v4737_v44, %v8279_v15 }
 0x53f   : > { %v4739_v51 = vpop.f32.mrf.mxu1 }
 0x540   : > { %4821 = vst [vmem:[#allocation15 + $0x118] sm:$0xff] %v4779_v39  ;;  %v4784_v0 = vadd.f32 %v4738_v47, %v3148_v17  ;;  %v4740_v27 = vadd.f32 %v4739_v51, %v8282_v48 }
 0x541   : > { %v4741_v45 = vpop.f32.mrf.mxu1 }
 0x542   : > { %4826 = vst [vmem:[#allocation15 + $0x140] sm:$0x1] %v4784_v0  ;;  %v4785_v53 = vadd.f32 %v4740_v27, %v3149_v50 }
 0x543   : > { %v4742_v19 = vpop.f32.mrf.mxu1 }
 0x544   : > { %4827 = vst [vmem:[#allocation15 + $0x148] sm:$0x1] %v4785_v53 }
 0x545   : > { %6485 = shalt.err (!%p6482_p4)
}
 0x546   : > { %s6568_s19 = smov 768   ;;  %s6569_s14 = smov 48  }
 0x547   : > { %s8407_s30 = sld [smem:[#allocation35_spill]] }
 0x54d   : > { %5485 = dma.vmem_to_hbm [thread:$0]  (%p5525_p9), %s4835_s17, 5376, %s8407_s30, [#allocation5], %s6568_s19, %s6568_s19, %s6569_s14  }
 0x54e   : > { %6533 = dma.done.wait (%p5525_p9), [#allocation5], 5376  }
 0x54f   : > { %6535 = vsyncadd (%p5525_p9), [#allocation5], 4294961920 }
 0x550 PF: > { %s8408_s30 = sld [smem:[#allocation23_spill]]  ;;  %s8411_s27 = smov %s6542_s28 }
 0x551   : > { %s8409_s22 = sld [smem:[#allocation22_spill]] }
 0x552   : > { %s8410_s29 = sld [smem:[#allocation24_spill]] }
 0x556   : > { %p19_p12 = scmp.ge.s32.totalorder %s8408_s30, 8  }
 0x557   : > { %s8412_s28 = smov %s8409_s22 }
 0x558   :  { %21 = sbr.rel (!%p19_p12) target bundleno = 10 (0xa), region = 134 }
 0x55d   :  { %4850 = vsyncpa [#allocation4], 1 }
 0x55e   :  { %4852 = vsyncpa [#allocation4 + $0x1], 1 }
 0x55f   :  { %4853 = vsyncpa [#allocation7], 1 }
 0x560   :  { %4854 = vsyncpa [#allocation10], 1 }
 0x561   :  { %4855 = vsyncpa [#allocation5], 1 }
 0x562   :  { %4857 = vsyncpa [#allocation5 + $0x1], 1 }

</bundles_post_ra>
